<compile_context>
chip_gen: v6e
topology: v6e:2x2x1
jax: 0.10.0
libtpu: 0.0.40
codegen_flags: <defaults>
</compile_context>

<pallas_src>
import functools

import jax
import jax.numpy as jnp
from jax import lax
from jax.experimental import pallas as pl
from jax.experimental.pallas import tpu as pltpu

INPUT_DIM = 768
HIDDEN_DIM = 512
NUM_TAGS = 256          # TODO(synk): NUM_TAGS not defined in the provided source; assumed 256.
LN_EPS = 1e-5           # torch nn.LayerNorm default

PARAM_ORDER = ("proj_w", "proj_b", "bn_g", "bn_b",
               "lin1_w", "lin1_b", "lin2_w", "lin2_b",
               "ln_g", "ln_b", "fc_w", "fc_b")
MATMUL_PARAMS = {"proj_w", "lin1_w", "lin2_w", "fc_w"}   # bf16 MXU operands


def _layer_norm(x, gamma, beta):
    """LayerNorm over the last dim, f32 stats (biased variance, torch-style)."""
    mu = jnp.mean(x, axis=-1, keepdims=True)
    var = jnp.mean((x - mu) ** 2, axis=-1, keepdims=True)
    return (x - mu) * lax.rsqrt(var + LN_EPS) * gamma + beta


# -----------------------------------------------------------------------------
# Kernel: one grid step processes a block of TB samples.
# -----------------------------------------------------------------------------
def network_kernel(
    embeds_ref,   # (TB, S, D)  f32  zero-padded tokens
    inv_len_ref,  # (TB, 1)     f32  exact 1/length per sample
    proj_w_ref,   # (D, H)      bf16
    proj_b_ref,   # (1, H)      f32
    bn_g_ref,     # (1, H)      f32
    bn_b_ref,     # (1, H)      f32
    lin1_w_ref,   # (H, H)      bf16
    lin1_b_ref,   # (1, H)      f32
    lin2_w_ref,   # (H, H)      bf16
    lin2_b_ref,   # (1, H)      f32
    ln_g_ref,     # (1, H)      f32
    ln_b_ref,     # (1, H)      f32
    fc_w_ref,     # (H, Cpad)   bf16
    fc_b_ref,     # (1, Cpad)   f32
    out_ref,      # (TB, Cpad)  f32
):
    # ---- pool first (linearity: mean(X) @ W == mean(X @ W)) ----------------
    # Padding tokens are zero, so a plain sum over S equals the masked sum.
    x = embeds_ref[...]                                   # (TB, S, D) f32
    pooled = jnp.sum(x, axis=1) * inv_len_ref[...]        # (TB, D) f32, exact

    # ---- projector: single (TB, D) @ (D, H) MXU matmul, f32 accumulation ---
    z = jnp.dot(pooled.astype(jnp.bfloat16), proj_w_ref[...],
                preferred_element_type=jnp.float32) + proj_b_ref[...]

    # ---- bn: LayerNorm(512), f32 math ---------------------------------------
    z = _layer_norm(z, bn_g_ref[...], bn_b_ref[...])      # (TB, H) f32

    # ---- lin: Linear -> ReLU -> Linear -> LayerNorm (bf16 MXU, f32 math) ----
    h1 = jnp.dot(z.astype(jnp.bfloat16), lin1_w_ref[...],
                 preferred_element_type=jnp.float32) + lin1_b_ref[...]
    h1 = jnp.maximum(h1, 0.0)
    h2 = jnp.dot(h1.astype(jnp.bfloat16), lin2_w_ref[...],
                 preferred_element_type=jnp.float32) + lin2_b_ref[...]
    h2 = _layer_norm(h2, ln_g_ref[...], ln_b_ref[...])

    # ---- fc head (lane-dense (TB, Cpad) output block) ------------------------
    out_ref[...] = jnp.dot(h2.astype(jnp.bfloat16), fc_w_ref[...],
                           preferred_element_type=jnp.float32) + fc_b_ref[...]


# -----------------------------------------------------------------------------
# Host-side helpers.
# -----------------------------------------------------------------------------
def _choose_tb(batch, seq, dim):
    """Batch tile: multiple of 8, capped at 128 (v5e MXU pass) and by a ~40 MiB
    double-buffer budget for the f32 embeds block (safe under v7x 48 MiB limit)."""
    budget = 40 * 1024 * 1024
    per_row = 2 * seq * dim * 4                     # double-buffered f32 rows
    tb_vmem = max(8, (budget // per_row) // 8 * 8)
    tb = min(128, tb_vmem)
    b_up = -(-batch // 8) * 8
    return b_up if b_up <= tb else tb


def prepare_params(params):
    """One-time dtype casts + lane padding of the fc head, OUTSIDE the jitted
    hot path.  Returns (tuple of weights in PARAM_ORDER, true num_classes)."""
    c = params["fc_b"].shape[-1]
    c_pad = -(-c // 128) * 128                      # lane-dense output width
    prepared = []
    for name in PARAM_ORDER:
        w = params[name].astype(
            jnp.bfloat16 if name in MATMUL_PARAMS else jnp.float32)
        if c_pad != c and name in ("fc_w", "fc_b"):
            w = jnp.pad(w, [(0, 0)] * (w.ndim - 1) + [(0, c_pad - c)])
        prepared.append(w)
    return tuple(prepared), c


@functools.partial(jax.jit, static_argnums=(3,))
def network_forward(weights, embeds, lengths, num_classes):
    """weights: prepare_params() tuple; embeds: (B,S,D) f32 zero-padded;
    lengths: (B,) int32."""
    B, S, D = embeds.shape
    C_pad = weights[-1].shape[-1]

    TB = _choose_tb(B, S, D)
    B_pad = -(-B // TB) * TB
    if B_pad != B:
        embeds = jnp.pad(embeds, ((0, B_pad - B), (0, 0), (0, 0)))
        lengths = jnp.pad(lengths, (0, B_pad - B), constant_values=1)

    # Exact per-row 1/length (tiny (B,) host-side op; no in-kernel approx rcp).
    inv_len = (1.0 / jnp.maximum(lengths, 1).astype(jnp.float32)).reshape(B_pad, 1)

    def batch_spec(shape):
        nrest = len(shape) - 1
        return pl.BlockSpec((TB,) + tuple(shape[1:]),
                            lambda b, n=nrest: (b,) + (0,) * n)

    def resident_spec(shape):
        nd = len(shape)
        return pl.BlockSpec(tuple(shape), lambda b, n=nd: (0,) * n)

    in_specs = [batch_spec((B_pad, S, D)), batch_spec((B_pad, 1))]
    in_specs += [resident_spec(w.shape) for w in weights]

    out = pl.pallas_call(
        network_kernel,
        out_shape=jax.ShapeDtypeStruct((B_pad, C_pad), jnp.float32),
        grid_spec=pltpu.PrefetchScalarGridSpec(
            num_scalar_prefetch=0,
            grid=(B_pad // TB,),
            in_specs=in_specs,
            out_specs=pl.BlockSpec((TB, C_pad), lambda b: (b, 0)),
        ),
        compiler_params=pltpu.CompilerParams(
            # Batch blocks are independent -> shard across TCs on v7x.
            dimension_semantics=("parallel",),
            # Fits v7x (64 MiB physical VMEM); fine on v5e/v6e.
            vmem_limit_bytes=48 * 1024 * 1024,
        ),
    )(embeds, inv_len, *weights)

    return out[:B, :num_classes]


# -----------------------------------------------------------------------------
# Parameters / reference / test harness.
# -----------------------------------------------------------------------------
def init_params(key, input_dim=INPUT_DIM, hidden_dim=HIDDEN_DIM,
                num_classes=NUM_TAGS):
    """Deterministic synthetic parameters, stored pre-transposed for x @ W."""
    ks = jax.random.split(key, 4)

    def w(k, shape, fan_in):
        return (jax.random.normal(k, shape, jnp.float32)
                / jnp.sqrt(float(fan_in))).astype(jnp.float32)

    return dict(
        proj_w=w(ks[0], (input_dim, hidden_dim), input_dim),
        proj_b=jnp.zeros((1, hidden_dim), jnp.float32),
        bn_g=jnp.ones((1, hidden_dim), jnp.float32),
        bn_b=jnp.zeros((1, hidden_dim), jnp.float32),
        lin1_w=w(ks[1], (hidden_dim, hidden_dim), hidden_dim),
        lin1_b=jnp.zeros((1, hidden_dim), jnp.float32),
        lin2_w=w(ks[2], (hidden_dim, hidden_dim), hidden_dim),
        lin2_b=jnp.zeros((1, hidden_dim), jnp.float32),
        ln_g=jnp.ones((1, hidden_dim), jnp.float32),
        ln_b=jnp.zeros((1, hidden_dim), jnp.float32),
        fc_w=w(ks[3], (hidden_dim, num_classes), hidden_dim),
        fc_b=jnp.zeros((1, num_classes), jnp.float32),
    )


def network_reference(params, embeds, lengths):
    """Pure-JAX f32 reference matching the PyTorch module semantics."""
    B, S, _ = embeds.shape
    mask = (jnp.arange(S)[None, :] < lengths[:, None]).astype(jnp.float32)
    xp = jnp.einsum("bsd,dh->bsh", embeds, params["proj_w"]) + params["proj_b"]
    pooled = (jnp.sum(xp * mask[..., None], axis=1)
              / lengths[:, None].astype(jnp.float32))
    z = _layer_norm(pooled, params["bn_g"], params["bn_b"])
    h1 = jnp.maximum(z @ params["lin1_w"] + params["lin1_b"], 0.0)
    h2 = _layer_norm(h1 @ params["lin2_w"] + params["lin2_b"],
                     params["ln_g"], params["ln_b"])
    return h2 @ params["fc_w"] + params["fc_b"]


def pack_embeds(embeds_list, input_dim=INPUT_DIM):
    """Mimic the module's list-of-ragged-tensors input: zero-pad + lengths."""
    S = max(int(e.shape[0]) for e in embeds_list)
    B = len(embeds_list)
    padded = jnp.zeros((B, S, input_dim), jnp.float32)
    lengths = []
    for i, e in enumerate(embeds_list):
        padded = padded.at[i, : e.shape[0]].set(e)
        lengths.append(int(e.shape[0]))
    return padded, jnp.array(lengths, jnp.int32)


if __name__ == "__main__":
    key = jax.random.PRNGKey(0)
    kp, k1, k2 = jax.random.split(key, 3)

    params = init_params(kp)
    weights, num_classes = prepare_params(params)   # one-time casts, outside jit

    # Ragged "list of sequences" input, as in the PyTorch forward.
    embeds_list = [
        jax.random.normal(k1, (8, INPUT_DIM), jnp.float32),
        jax.random.normal(k2, (5, INPUT_DIM), jnp.float32),
    ]
    embeds, lengths = pack_embeds(embeds_list)        # (2, 8, 768), (2,)

    outs = network_forward(weights, embeds, lengths, num_classes)
    outs = jax.block_until_ready(outs)

    assert outs.shape == (len(embeds_list), NUM_TAGS)
    assert bool(jnp.all(jnp.isfinite(outs)))

    # Check vs f32 reference (pooling is exact f32; matmuls use bf16 operands).
    ref = network_reference(params, embeds, lengths)
    max_err = float(jnp.max(jnp.abs(outs - ref)))
    assert max_err < 1e-1, f"max abs error {max_err}"

    print("KERNEL_OK")
</pallas_src>

<mosaic_0001>
module attributes {stable_mosaic.version = 11 : i64} {
  func.func @network_kernel(%arg0: i32, %arg1: memref<8x8x768xf32, #tpu.memory_space<vmem>>, %arg2: memref<8x1xf32, #tpu.memory_space<vmem>>, %arg3: memref<768x512xbf16, #tpu.memory_space<vmem>>, %arg4: memref<1x512xf32, #tpu.memory_space<vmem>>, %arg5: memref<1x512xf32, #tpu.memory_space<vmem>>, %arg6: memref<1x512xf32, #tpu.memory_space<vmem>>, %arg7: memref<512x512xbf16, #tpu.memory_space<vmem>>, %arg8: memref<1x512xf32, #tpu.memory_space<vmem>>, %arg9: memref<512x512xbf16, #tpu.memory_space<vmem>>, %arg10: memref<1x512xf32, #tpu.memory_space<vmem>>, %arg11: memref<1x512xf32, #tpu.memory_space<vmem>>, %arg12: memref<1x512xf32, #tpu.memory_space<vmem>>, %arg13: memref<512x256xbf16, #tpu.memory_space<vmem>>, %arg14: memref<1x256xf32, #tpu.memory_space<vmem>>, %arg15: memref<8x256xf32, #tpu.memory_space<vmem>>) attributes {dimension_semantics = [#tpu.dimension_semantics<parallel>], iteration_bounds = array<i64: 1>, scalar_prefetch = 0 : i64, scratch_operands = 0 : i64, tpu.core_type = #tpu.core_type<tc>, window_params = [{transform_indices = @transform_0, window_bounds = array<i64: 8, 8, 768>}, {transform_indices = @transform_1, window_bounds = array<i64: 8, 1>}, {pipeline_mode = #tpu.pipeline_mode<synchronous>, transform_indices = @transform_2, window_bounds = array<i64: 768, 512>}, {pipeline_mode = #tpu.pipeline_mode<synchronous>, transform_indices = @transform_3, window_bounds = array<i64: 1, 512>}, {pipeline_mode = #tpu.pipeline_mode<synchronous>, transform_indices = @transform_4, window_bounds = array<i64: 1, 512>}, {pipeline_mode = #tpu.pipeline_mode<synchronous>, transform_indices = @transform_5, window_bounds = array<i64: 1, 512>}, {pipeline_mode = #tpu.pipeline_mode<synchronous>, transform_indices = @transform_6, window_bounds = array<i64: 512, 512>}, {pipeline_mode = #tpu.pipeline_mode<synchronous>, transform_indices = @transform_7, window_bounds = array<i64: 1, 512>}, {pipeline_mode = #tpu.pipeline_mode<synchronous>, transform_indices = @transform_8, window_bounds = array<i64: 512, 512>}, {pipeline_mode = #tpu.pipeline_mode<synchronous>, transform_indices = @transform_9, window_bounds = array<i64: 1, 512>}, {pipeline_mode = #tpu.pipeline_mode<synchronous>, transform_indices = @transform_10, window_bounds = array<i64: 1, 512>}, {pipeline_mode = #tpu.pipeline_mode<synchronous>, transform_indices = @transform_11, window_bounds = array<i64: 1, 512>}, {pipeline_mode = #tpu.pipeline_mode<synchronous>, transform_indices = @transform_12, window_bounds = array<i64: 512, 256>}, {pipeline_mode = #tpu.pipeline_mode<synchronous>, transform_indices = @transform_13, window_bounds = array<i64: 1, 256>}, {transform_indices = @transform_14, window_bounds = array<i64: 8, 256>}]} {
    %c0 = arith.constant 0 : index
    %c0_0 = arith.constant 0 : index
    %c0_1 = arith.constant 0 : index
    %0 = vector.load %arg1[%c0, %c0_0, %c0_1] : memref<8x8x768xf32, #tpu.memory_space<vmem>>, vector<8x8x768xf32>
    %cst = arith.constant dense<0.000000e+00> : vector<8x768xf32>
    %1 = vector.multi_reduction <add>, %0, %cst [1] : vector<8x8x768xf32> to vector<8x768xf32>
    %c0_2 = arith.constant 0 : index
    %c0_3 = arith.constant 0 : index
    %2 = vector.load %arg2[%c0_2, %c0_3] : memref<8x1xf32, #tpu.memory_space<vmem>>, vector<8x1xf32>
    %3 = vector.broadcast %2 : vector<8x1xf32> to vector<8x768xf32>
    %4 = arith.mulf %1, %3 : vector<8x768xf32>
    %5 = arith.truncf %4 : vector<8x768xf32> to vector<8x768xbf16>
    %c0_4 = arith.constant 0 : index
    %c0_5 = arith.constant 0 : index
    %6 = vector.load %arg3[%c0_4, %c0_5] : memref<768x512xbf16, #tpu.memory_space<vmem>>, vector<768x512xbf16>
    %cst_6 = arith.constant dense<0.000000e+00> : vector<8x512xf32>
    %7 = tpu.matmul %5, %6, %cst_6 {dimension_numbers = #tpu.dot_dimension_numbers<[1], [0], [0], [1], [0, 0, 1, 1], [], []>} : vector<8x768xbf16>, vector<768x512xbf16>, vector<8x512xf32> -> vector<8x512xf32>
    %c0_7 = arith.constant 0 : index
    %c0_8 = arith.constant 0 : index
    %8 = vector.load %arg4[%c0_7, %c0_8] : memref<1x512xf32, #tpu.memory_space<vmem>>, vector<1x512xf32>
    %9 = vector.broadcast %8 : vector<1x512xf32> to vector<8x512xf32>
    %10 = arith.addf %7, %9 : vector<8x512xf32>
    %c0_9 = arith.constant 0 : index
    %c0_10 = arith.constant 0 : index
    %11 = vector.load %arg5[%c0_9, %c0_10] : memref<1x512xf32, #tpu.memory_space<vmem>>, vector<1x512xf32>
    %c0_11 = arith.constant 0 : index
    %c0_12 = arith.constant 0 : index
    %12 = vector.load %arg6[%c0_11, %c0_12] : memref<1x512xf32, #tpu.memory_space<vmem>>, vector<1x512xf32>
    %cst_13 = arith.constant dense<0.000000e+00> : vector<8xf32>
    %13 = vector.multi_reduction <add>, %10, %cst_13 [1] : vector<8x512xf32> to vector<8xf32>
    %14 = vector.shape_cast %13 : vector<8xf32> to vector<8x1xf32>
    %cst_14 = arith.constant 5.120000e+02 : f32
    %15 = vector.broadcast %cst_14 : f32 to vector<8x1xf32>
    %16 = arith.divf %14, %15 : vector<8x1xf32>
    %17 = vector.broadcast %16 : vector<8x1xf32> to vector<8x512xf32>
    %18 = arith.subf %10, %17 : vector<8x512xf32>
    %19 = arith.mulf %18, %18 : vector<8x512xf32>
    %cst_15 = arith.constant dense<0.000000e+00> : vector<8xf32>
    %20 = vector.multi_reduction <add>, %19, %cst_15 [1] : vector<8x512xf32> to vector<8xf32>
    %21 = vector.shape_cast %20 : vector<8xf32> to vector<8x1xf32>
    %cst_16 = arith.constant 5.120000e+02 : f32
    %22 = vector.broadcast %cst_16 : f32 to vector<8x1xf32>
    %23 = arith.divf %21, %22 : vector<8x1xf32>
    %24 = vector.broadcast %16 : vector<8x1xf32> to vector<8x512xf32>
    %25 = arith.subf %10, %24 : vector<8x512xf32>
    %cst_17 = arith.constant 9.99999974E-6 : f32
    %26 = vector.broadcast %cst_17 : f32 to vector<8x1xf32>
    %27 = arith.addf %23, %26 : vector<8x1xf32>
    %28 = math.rsqrt %27 : vector<8x1xf32>
    %29 = vector.broadcast %28 : vector<8x1xf32> to vector<8x512xf32>
    %30 = arith.mulf %25, %29 : vector<8x512xf32>
    %31 = vector.broadcast %11 : vector<1x512xf32> to vector<8x512xf32>
    %32 = arith.mulf %30, %31 : vector<8x512xf32>
    %33 = vector.broadcast %12 : vector<1x512xf32> to vector<8x512xf32>
    %34 = arith.addf %32, %33 : vector<8x512xf32>
    %35 = arith.truncf %34 : vector<8x512xf32> to vector<8x512xbf16>
    %c0_18 = arith.constant 0 : index
    %c0_19 = arith.constant 0 : index
    %36 = vector.load %arg7[%c0_18, %c0_19] : memref<512x512xbf16, #tpu.memory_space<vmem>>, vector<512x512xbf16>
    %cst_20 = arith.constant dense<0.000000e+00> : vector<8x512xf32>
    %37 = tpu.matmul %35, %36, %cst_20 {dimension_numbers = #tpu.dot_dimension_numbers<[1], [0], [0], [1], [0, 0, 1, 1], [], []>} : vector<8x512xbf16>, vector<512x512xbf16>, vector<8x512xf32> -> vector<8x512xf32>
    %c0_21 = arith.constant 0 : index
    %c0_22 = arith.constant 0 : index
    %38 = vector.load %arg8[%c0_21, %c0_22] : memref<1x512xf32, #tpu.memory_space<vmem>>, vector<1x512xf32>
    %39 = vector.broadcast %38 : vector<1x512xf32> to vector<8x512xf32>
    %40 = arith.addf %37, %39 : vector<8x512xf32>
    %cst_23 = arith.constant 0.000000e+00 : f32
    %41 = vector.broadcast %cst_23 : f32 to vector<8x512xf32>
    %42 = arith.maximumf %40, %41 : vector<8x512xf32>
    %43 = arith.truncf %42 : vector<8x512xf32> to vector<8x512xbf16>
    %c0_24 = arith.constant 0 : index
    %c0_25 = arith.constant 0 : index
    %44 = vector.load %arg9[%c0_24, %c0_25] : memref<512x512xbf16, #tpu.memory_space<vmem>>, vector<512x512xbf16>
    %cst_26 = arith.constant dense<0.000000e+00> : vector<8x512xf32>
    %45 = tpu.matmul %43, %44, %cst_26 {dimension_numbers = #tpu.dot_dimension_numbers<[1], [0], [0], [1], [0, 0, 1, 1], [], []>} : vector<8x512xbf16>, vector<512x512xbf16>, vector<8x512xf32> -> vector<8x512xf32>
    %c0_27 = arith.constant 0 : index
    %c0_28 = arith.constant 0 : index
    %46 = vector.load %arg10[%c0_27, %c0_28] : memref<1x512xf32, #tpu.memory_space<vmem>>, vector<1x512xf32>
    %47 = vector.broadcast %46 : vector<1x512xf32> to vector<8x512xf32>
    %48 = arith.addf %45, %47 : vector<8x512xf32>
    %c0_29 = arith.constant 0 : index
    %c0_30 = arith.constant 0 : index
    %49 = vector.load %arg11[%c0_29, %c0_30] : memref<1x512xf32, #tpu.memory_space<vmem>>, vector<1x512xf32>
    %c0_31 = arith.constant 0 : index
    %c0_32 = arith.constant 0 : index
    %50 = vector.load %arg12[%c0_31, %c0_32] : memref<1x512xf32, #tpu.memory_space<vmem>>, vector<1x512xf32>
    %cst_33 = arith.constant dense<0.000000e+00> : vector<8xf32>
    %51 = vector.multi_reduction <add>, %48, %cst_33 [1] : vector<8x512xf32> to vector<8xf32>
    %52 = vector.shape_cast %51 : vector<8xf32> to vector<8x1xf32>
    %cst_34 = arith.constant 5.120000e+02 : f32
    %53 = vector.broadcast %cst_34 : f32 to vector<8x1xf32>
    %54 = arith.divf %52, %53 : vector<8x1xf32>
    %55 = vector.broadcast %54 : vector<8x1xf32> to vector<8x512xf32>
    %56 = arith.subf %48, %55 : vector<8x512xf32>
    %57 = arith.mulf %56, %56 : vector<8x512xf32>
    %cst_35 = arith.constant dense<0.000000e+00> : vector<8xf32>
    %58 = vector.multi_reduction <add>, %57, %cst_35 [1] : vector<8x512xf32> to vector<8xf32>
    %59 = vector.shape_cast %58 : vector<8xf32> to vector<8x1xf32>
    %cst_36 = arith.constant 5.120000e+02 : f32
    %60 = vector.broadcast %cst_36 : f32 to vector<8x1xf32>
    %61 = arith.divf %59, %60 : vector<8x1xf32>
    %62 = vector.broadcast %54 : vector<8x1xf32> to vector<8x512xf32>
    %63 = arith.subf %48, %62 : vector<8x512xf32>
    %cst_37 = arith.constant 9.99999974E-6 : f32
    %64 = vector.broadcast %cst_37 : f32 to vector<8x1xf32>
    %65 = arith.addf %61, %64 : vector<8x1xf32>
    %66 = math.rsqrt %65 : vector<8x1xf32>
    %67 = vector.broadcast %66 : vector<8x1xf32> to vector<8x512xf32>
    %68 = arith.mulf %63, %67 : vector<8x512xf32>
    %69 = vector.broadcast %49 : vector<1x512xf32> to vector<8x512xf32>
    %70 = arith.mulf %68, %69 : vector<8x512xf32>
    %71 = vector.broadcast %50 : vector<1x512xf32> to vector<8x512xf32>
    %72 = arith.addf %70, %71 : vector<8x512xf32>
    %73 = arith.truncf %72 : vector<8x512xf32> to vector<8x512xbf16>
    %c0_38 = arith.constant 0 : index
    %c0_39 = arith.constant 0 : index
    %74 = vector.load %arg13[%c0_38, %c0_39] : memref<512x256xbf16, #tpu.memory_space<vmem>>, vector<512x256xbf16>
    %cst_40 = arith.constant dense<0.000000e+00> : vector<8x256xf32>
    %75 = tpu.matmul %73, %74, %cst_40 {dimension_numbers = #tpu.dot_dimension_numbers<[1], [0], [0], [1], [0, 0, 1, 1], [], []>} : vector<8x512xbf16>, vector<512x256xbf16>, vector<8x256xf32> -> vector<8x256xf32>
    %c0_41 = arith.constant 0 : index
    %c0_42 = arith.constant 0 : index
    %76 = vector.load %arg14[%c0_41, %c0_42] : memref<1x256xf32, #tpu.memory_space<vmem>>, vector<1x256xf32>
    %77 = vector.broadcast %76 : vector<1x256xf32> to vector<8x256xf32>
    %78 = arith.addf %75, %77 : vector<8x256xf32>
    %c0_43 = arith.constant 0 : index
    %c0_44 = arith.constant 0 : index
    %79 = vector.load %arg15[%c0_43, %c0_44] : memref<8x256xf32, #tpu.memory_space<vmem>>, vector<8x256xf32>
    tpu.vector_store %arg15[%c0_43, %c0_44], %78 {strides = array<i32>} : memref<8x256xf32, #tpu.memory_space<vmem>>, vector<8x256xf32>,
    return
  }
  func.func @transform_0(%arg0: i32) -> (i32, i32, i32) {
    %c0_i32 = arith.constant 0 : i32
    %c0_i32_0 = arith.constant 0 : i32
    %c0_i32_1 = arith.constant 0 : i32
    return %arg0, %c0_i32, %c0_i32_0 : i32, i32, i32
  }
  func.func @transform_1(%arg0: i32) -> (i32, i32) {
    %c0_i32 = arith.constant 0 : i32
    %c0_i32_0 = arith.constant 0 : i32
    return %arg0, %c0_i32 : i32, i32
  }
  func.func @transform_2(%arg0: i32) -> (i32, i32) {
    %c0_i32 = arith.constant 0 : i32
    %c0_i32_0 = arith.constant 0 : i32
    %c0_i32_1 = arith.constant 0 : i32
    return %c0_i32, %c0_i32_0 : i32, i32
  }
  func.func @transform_3(%arg0: i32) -> (i32, i32) {
    %c0_i32 = arith.constant 0 : i32
    %c0_i32_0 = arith.constant 0 : i32
    %c0_i32_1 = arith.constant 0 : i32
    return %c0_i32, %c0_i32_0 : i32, i32
  }
  func.func @transform_4(%arg0: i32) -> (i32, i32) {
    %c0_i32 = arith.constant 0 : i32
    %c0_i32_0 = arith.constant 0 : i32
    %c0_i32_1 = arith.constant 0 : i32
    return %c0_i32, %c0_i32_0 : i32, i32
  }
  func.func @transform_5(%arg0: i32) -> (i32, i32) {
    %c0_i32 = arith.constant 0 : i32
    %c0_i32_0 = arith.constant 0 : i32
    %c0_i32_1 = arith.constant 0 : i32
    return %c0_i32, %c0_i32_0 : i32, i32
  }
  func.func @transform_6(%arg0: i32) -> (i32, i32) {
    %c0_i32 = arith.constant 0 : i32
    %c0_i32_0 = arith.constant 0 : i32
    %c0_i32_1 = arith.constant 0 : i32
    return %c0_i32, %c0_i32_0 : i32, i32
  }
  func.func @transform_7(%arg0: i32) -> (i32, i32) {
    %c0_i32 = arith.constant 0 : i32
    %c0_i32_0 = arith.constant 0 : i32
    %c0_i32_1 = arith.constant 0 : i32
    return %c0_i32, %c0_i32_0 : i32, i32
  }
  func.func @transform_8(%arg0: i32) -> (i32, i32) {
    %c0_i32 = arith.constant 0 : i32
    %c0_i32_0 = arith.constant 0 : i32
    %c0_i32_1 = arith.constant 0 : i32
    return %c0_i32, %c0_i32_0 : i32, i32
  }
  func.func @transform_9(%arg0: i32) -> (i32, i32) {
    %c0_i32 = arith.constant 0 : i32
    %c0_i32_0 = arith.constant 0 : i32
    %c0_i32_1 = arith.constant 0 : i32
    return %c0_i32, %c0_i32_0 : i32, i32
  }
  func.func @transform_10(%arg0: i32) -> (i32, i32) {
    %c0_i32 = arith.constant 0 : i32
    %c0_i32_0 = arith.constant 0 : i32
    %c0_i32_1 = arith.constant 0 : i32
    return %c0_i32, %c0_i32_0 : i32, i32
  }
  func.func @transform_11(%arg0: i32) -> (i32, i32) {
    %c0_i32 = arith.constant 0 : i32
    %c0_i32_0 = arith.constant 0 : i32
    %c0_i32_1 = arith.constant 0 : i32
    return %c0_i32, %c0_i32_0 : i32, i32
  }
  func.func @transform_12(%arg0: i32) -> (i32, i32) {
    %c0_i32 = arith.constant 0 : i32
    %c0_i32_0 = arith.constant 0 : i32
    %c0_i32_1 = arith.constant 0 : i32
    return %c0_i32, %c0_i32_0 : i32, i32
  }
  func.func @transform_13(%arg0: i32) -> (i32, i32) {
    %c0_i32 = arith.constant 0 : i32
    %c0_i32_0 = arith.constant 0 : i32
    %c0_i32_1 = arith.constant 0 : i32
    return %c0_i32, %c0_i32_0 : i32, i32
  }
  func.func @transform_14(%arg0: i32) -> (i32, i32) {
    %c0_i32 = arith.constant 0 : i32
    %c0_i32_0 = arith.constant 0 : i32
    return %arg0, %c0_i32 : i32, i32
  }
}

</mosaic_0001>

<bundles_post_ra>
// kernel: network_forward.1
= control target key start
LH: loop header
LB: loop body
LE: loop exit
PB: predicated region body
PF: predicated region fallthrough
CT: control target
= control target key end

     0   :  { %19 = vsyncpa [#allocation3], 0  ;;  %s6814_s0 = inlined_call_operand.vmem [shape: f32[8,8,768], index: 0, kind: input, shape index: {}]   ;;  %s6815_s1 = inlined_call_operand.vmem [shape: f32[8,1], index: 1, kind: input, shape index: {}]   ;;  %s6816_s2 = inlined_call_operand.hbm [shape: bf16[768,512], index: 2, kind: input, shape index: {}]   ;;  %s6817_s3 = inlined_call_operand.vmem [shape: f32[1,512], index: 3, kind: input, shape index: {}]   ;;  %s6818_s4 = inlined_call_operand.vmem [shape: f32[1,512], index: 4, kind: input, shape index: {}]   ;;  %s6819_s5 = inlined_call_operand.vmem [shape: f32[1,512], index: 5, kind: input, shape index: {}]   ;;  %s6820_s6 = inlined_call_operand.hbm [shape: bf16[512,512], index: 6, kind: input, shape index: {}]   ;;  %s6821_s7 = inlined_call_operand.vmem [shape: f32[1,512], index: 7, kind: input, shape index: {}]   ;;  %s6822_s8 = inlined_call_operand.hbm [shape: bf16[512,512], index: 8, kind: input, shape index: {}]   ;;  %s6823_s9 = inlined_call_operand.vmem [shape: f32[1,512], index: 9, kind: input, shape index: {}]   ;;  %s6824_s10 = inlined_call_operand.vmem [shape: f32[1,512], index: 10, kind: input, shape index: {}]   ;;  %s6825_s11 = inlined_call_operand.vmem [shape: f32[1,512], index: 11, kind: input, shape index: {}]   ;;  %s6826_s12 = inlined_call_operand.hbm [shape: bf16[512,256], index: 12, kind: input, shape index: {}]   ;;  %s6827_s13 = inlined_call_operand.vmem [shape: f32[1,256], index: 13, kind: input, shape index: {}]   ;;  %s6828_s14 = inlined_call_operand.vmem [shape: f32[8,256], index: 14, kind: output, shape index: {}]  }
   0x1   :  { %20 = vsyncpa [#allocation5], 0 }
   0x2   :  { %21 = vsyncpa [#allocation8], 0  ;;  %s6121_s29 = smov [#allocation4]   ;;  %s6122_s15 = smov [#allocation2]  }
   0x3   :  { %s49_s30 = sshll.u32 %s6121_s29, 4  ;;  %s31_s16 = sshll.u32 %s6122_s15, 4  ;;  %s50_s30 = int_to_ptr.vmem [resolvable:$true] %s49_s30  ;;  %s32_s16 = int_to_ptr.vmem [resolvable:$true] %s31_s16 }
   0x4   :  { %s6043_s17 = scalar_lea.vmem %s50_s30, 16384  ;;  %p6048_p1 = scmp.lt.s32.totalorder %s50_s30, %s50_s30 }
   0x5   :  { %p6044_p0 = scmp.ne.s32.totalorder %s50_s30, %s6043_s17  ;;  %p6049_p2 = scmp.lt.s32.totalorder %s6043_s17, %s6043_s17 }
   0x7   :  { %p6050_p3 = por %p6049_p2, %p6048_p1 }
   0x9   :  { %p6051_p4 = pnand %p6050_p3, %p6044_p0 }
   0xb   :  { %6054 = shalt.err (!%p6051_p4)
}
   0xc   :  { %s6123_s18 = smov 256   ;;  %s6124_s19 = smov 16  }
   0xd   :  { %55 = dma.hbm_to_vmem [thread:$0]  %s6820_s6, 16384, %s50_s30, [#allocation5], %s6123_s18, %s6123_s18, %s6124_s19  }
   0xe   :  { %s6063_s22 = scalar_lea.vmem %s32_s16, 24576  ;;  %p6068_p6 = scmp.lt.s32.totalorder %s32_s16, %s32_s16 }
   0xf   :  { %p6064_p5 = scmp.ne.s32.totalorder %s32_s16, %s6063_s22  ;;  %p6069_p7 = scmp.lt.s32.totalorder %s6063_s22, %s6063_s22 }
  0x11   :  { %p6070_p8 = por %p6069_p7, %p6068_p6 }
  0x13   :  { %p6071_p9 = pnand %p6070_p8, %p6064_p5 }
  0x15   :  { %6074 = shalt.err (!%p6071_p9)
}
  0x16   :  { %37 = dma.hbm_to_vmem [thread:$0]  %s6816_s2, 24576, %s32_s16, [#allocation3], %s6123_s18, %s6123_s18, %s6124_s19  }
  0x17   :  { %s6125_s25 = smov [#allocation6]   ;;  %s6126_s27 = smov [#allocation7]  }
  0x18   :  { %s63_s26 = sshll.u32 %s6125_s25, 4  ;;  %s81_s28 = sshll.u32 %s6126_s27, 4  ;;  %s64_s26 = int_to_ptr.vmem [resolvable:$true] %s63_s26  ;;  %s82_s28 = int_to_ptr.vmem [resolvable:$true] %s81_s28 }
  0x19   :  { %s6083_s29 = scalar_lea.vmem %s64_s26, 16384  ;;  %p6088_p11 = scmp.lt.s32.totalorder %s64_s26, %s64_s26 }
  0x1a   :  { %p6084_p10 = scmp.ne.s32.totalorder %s64_s26, %s6083_s29  ;;  %p6089_p12 = scmp.lt.s32.totalorder %s6083_s29, %s6083_s29 }
  0x1c   :  { %p6090_p13 = por %p6089_p12, %p6088_p11 }
  0x1e   :  { %p6091_p0 = pnand %p6090_p13, %p6084_p10 }
  0x20   :  { %6094 = shalt.err (!%p6091_p0)
}
  0x21   :  { %69 = dma.hbm_to_vmem [thread:$0]  %s6822_s8, 16384, %s64_s26, [#allocation5], %s6123_s18, %s6123_s18, %s6124_s19  }
  0x22   :  { %s6103_s15 = scalar_lea.vmem %s82_s28, 8192  ;;  %p6108_p2 = scmp.lt.s32.totalorder %s82_s28, %s82_s28 }
  0x23   :  { %p6104_p1 = scmp.ne.s32.totalorder %s82_s28, %s6103_s15  ;;  %p6109_p3 = scmp.lt.s32.totalorder %s6103_s15, %s6103_s15 }
  0x25   :  { %p6110_p4 = por %p6109_p3, %p6108_p2 }
  0x27   :  { %p6111_p5 = pnand %p6110_p4, %p6104_p1 }
  0x29   :  { %6114 = shalt.err (!%p6111_p5)
}
  0x2a   :  { %s6127_s2 = smov 128   ;;  %s6128_s16 = smov 8  }
  0x2b   :  { %87 = dma.hbm_to_vmem [thread:$0]  %s6826_s12, 8192, %s82_s28, [#allocation8], %s6127_s2, %s6127_s2, %s6128_s16  }
  0x2c   :  { %6115 = dma.done.wait [#allocation3], 24576  }
  0x2d   :  { %6116 = vsyncadd [#allocation3], 4294942720 }
  0x2e   :  { %6117 = dma.done.wait [#allocation5], 32768  }
  0x2f   :  { %6118 = vsyncadd [#allocation5], 4294934528 }
  0x30   :  { %6119 = dma.done.wait [#allocation8], 8192  }
  0x31   :  { %6120 = vsyncadd [#allocation8], 4294959104  ;;  %v6129_v0 = vmov 0   ;;  %v438_v1 = vld [vmem:[%s6815_s1] sm:$0xff]  ;;  %v103_v50 = vld [vmem:[%s6814_s0 + $0x8] sm:$0xff]  ;;  %vm865_vm0 = vcmask 1041409  }
  0x32   :  { %5262 = vset.pattern.permute.xlu0 %v6129_v0  ;;  %v5263_v2 = vld [vmem:[#allocation2 + $0xe4] ss:$16 sps:$4 sm:$0xff]   ;;  %v5267_v4 = vld [vmem:[#allocation2 + $0xe0] ss:$16 sps:$4 sm:$0xff]   ;;  %v109_v53 = vld [vmem:[%s6814_s0 + $0x38] sm:$0xff]  ;;  %v156_v61 = vrot.slane %v103_v50, 4 }
  0x33   :  { %441 = vperm.xlu0 %5262, %v438_v1   ;;  %v5265_v3 = vld [vmem:[#allocation2 + $0x2e4] ss:$16 sps:$4 sm:$0xff]   ;;  %v5268_v5 = vld [vmem:[#allocation2 + $0x2e0] ss:$16 sps:$4 sm:$0xff]   ;;  %1927 = vmatprep.subr.bf16.mxu0 %v5263_v2  ;;  %v115_v55 = vld [vmem:[%s6814_s0 + $0x68] sm:$0xff]  ;;  %v192_v63 = vrot.slane %v109_v53, 4 }
  0x34   :  { %v5269_v6 = vld [vmem:[#allocation2 + $0xc4] ss:$16 sps:$4 sm:$0xff]   ;;  %1968 = vmatprep.subr.bf16.mxu1 %v5265_v3  ;;  %1928 = vmatpush1.bf16.msra.mxu0 %v5267_v4  ;;  %v5273_v8 = vld [vmem:[#allocation2 + $0xc0] ss:$16 sps:$4 sm:$0xff]   ;;  %v121_v56 = vld [vmem:[%s6814_s0 + $0x98] sm:$0xff]  ;;  %v228_v2 = vrot.slane %v115_v55, 4 }
  0x35   :  { %v5271_v7 = vld [vmem:[#allocation2 + $0x2c4] ss:$16 sps:$4 sm:$0xff]   ;;  %1969 = vmatpush1.bf16.msra.mxu1 %v5268_v5  ;;  %1929 = vmatprep.subr.bf16.mxu0 %v5269_v6  ;;  %v5274_v9 = vld [vmem:[#allocation2 + $0x2c0] ss:$16 sps:$4 sm:$0xff]   ;;  %v127_v58 = vld [vmem:[%s6814_s0 + $0xc8] sm:$0xff]  ;;  %v264_v3 = vrot.slane %v121_v56, 4 }
  0x36   :  { %1970 = vmatprep.subr.bf16.mxu1 %v5271_v7  ;;  %v5275_v10 = vld [vmem:[#allocation2 + $0xa4] ss:$16 sps:$4 sm:$0xff]   ;;  %v5279_v12 = vld [vmem:[#allocation2 + $0xa0] ss:$16 sps:$4 sm:$0xff]   ;;  %v133_v59 = vld [vmem:[%s6814_s0 + $0xf8] sm:$0xff]  ;;  %v300_v4 = vrot.slane %v127_v58, 4  ;;  %v157_v7 = vadd.f32 %v156_v61, %v103_v50 }
  0x37   :  { %v5277_v11 = vld [vmem:[#allocation2 + $0x2a4] ss:$16 sps:$4 sm:$0xff]   ;;  %v5280_v13 = vld [vmem:[#allocation2 + $0x2a0] ss:$16 sps:$4 sm:$0xff]   ;;  %v139_v60 = vld [vmem:[%s6814_s0 + $0x128] sm:$0xff]  ;;  %v336_v5 = vrot.slane %v133_v59, 4 }
  0x38   :  { %1930 = vmatpush1.bf16.msra.mxu0 %v5273_v8  ;;  %v5281_v14 = vld [vmem:[#allocation2 + $0x84] ss:$16 sps:$4 sm:$0xff]   ;;  %v5285_v16 = vld [vmem:[#allocation2 + $0x80] ss:$16 sps:$4 sm:$0xff]   ;;  %v145_v62 = vld [vmem:[%s6814_s0 + $0x158] sm:$0xff]  ;;  %v372_v6 = vrot.slane %v139_v60, 4 }
  0x39   :  { %1971 = vmatpush1.bf16.msra.mxu1 %v5274_v9  ;;  %1931 = vmatprep.subr.bf16.mxu0 %v5275_v10  ;;  %v5283_v15 = vld [vmem:[#allocation2 + $0x284] ss:$16 sps:$4 sm:$0xff]   ;;  %v5286_v17 = vld [vmem:[#allocation2 + $0x280] ss:$16 sps:$4 sm:$0xff]   ;;  %v408_v8 = vrot.slane %v145_v62, 4  ;;  %v193_v10 = vadd.f32 %v192_v63, %v109_v53  ;;  %vm868_vm1 = vcmask 1042434  }
  0x3a   :  { %1972 = vmatprep.subr.bf16.mxu1 %v5277_v11  ;;  %v5287_v18 = vld [vmem:[#allocation2 + $0x64] ss:$16 sps:$4 sm:$0xff]   ;;  %v5291_v20 = vld [vmem:[#allocation2 + $0x60] ss:$16 sps:$4 sm:$0xff]   ;;  %vm871_vm2 = vcmask 1043459   ;;  %vm874_vm3 = vcmask 1044484  }
  0x3b   :  { %v5289_v19 = vld [vmem:[#allocation2 + $0x264] ss:$16 sps:$4 sm:$0xff]   ;;  %v5292_v21 = vld [vmem:[#allocation2 + $0x260] ss:$16 sps:$4 sm:$0xff]   ;;  %vm877_vm4 = vcmask 1045509   ;;  %vm880_vm5 = vcmask 1046534  }
  0x3c   :  { %1932 = vmatpush1.bf16.msra.mxu0 %v5279_v12  ;;  %v5293_v22 = vld [vmem:[#allocation2 + $0x44] ss:$16 sps:$4 sm:$0xff]   ;;  %v5297_v24 = vld [vmem:[#allocation2 + $0x40] ss:$16 sps:$4 sm:$0xff]   ;;  %vm883_vm6 = vcmask 1047559  }
  0x3d   :  { %1973 = vmatpush1.bf16.msra.mxu1 %v5280_v13  ;;  %1933 = vmatprep.subr.bf16.mxu0 %v5281_v14  ;;  %v5295_v23 = vld [vmem:[#allocation2 + $0x244] ss:$16 sps:$4 sm:$0xff]   ;;  %v5298_v25 = vld [vmem:[#allocation2 + $0x240] ss:$16 sps:$4 sm:$0xff]   ;;  %v229_v13 = vadd.f32 %v228_v2, %v115_v55 }
  0x3e   :  { %1974 = vmatprep.subr.bf16.mxu1 %v5283_v15  ;;  %v5299_v26 = vld [vmem:[#allocation2 + $0x24] ss:$16 sps:$4 sm:$0xff]   ;;  %v5303_v28 = vld [vmem:[#allocation2 + $0x20] ss:$16 sps:$4 sm:$0xff]  }
  0x3f   :  { %v5301_v27 = vld [vmem:[#allocation2 + $0x224] ss:$16 sps:$4 sm:$0xff]   ;;  %v5304_v29 = vld [vmem:[#allocation2 + $0x220] ss:$16 sps:$4 sm:$0xff]  }
  0x40   :  { %1934 = vmatpush1.bf16.msra.mxu0 %v5285_v16  ;;  %v5305_v30 = vld [vmem:[#allocation2 + $0x4] ss:$16 sps:$4 sm:$0xff]   ;;  %v5309_v32 = vld [vmem:[#allocation2] ss:$16 sps:$4 sm:$0xff]   ;;  %v265_v16 = vadd.f32 %v264_v3, %v121_v56 }
  0x41   :  { %1975 = vmatpush1.bf16.msra.mxu1 %v5286_v17  ;;  %1935 = vmatprep.subr.bf16.mxu0 %v5287_v18  ;;  %v5307_v31 = vld [vmem:[#allocation2 + $0x204] ss:$16 sps:$4 sm:$0xff]   ;;  %v5310_v33 = vld [vmem:[#allocation2 + $0x200] ss:$16 sps:$4 sm:$0xff]   ;;  %v301_v17 = vadd.f32 %v300_v4, %v127_v58  ;;  %v337_v18 = vadd.f32 %v336_v5, %v133_v59  ;;  %v5364_v58 = vld [vmem:[#allocation2 + $0xec] ss:$16 sps:$4 sm:$0xff]  }
  0x42   :  { %1976 = vmatprep.subr.bf16.mxu1 %v5289_v19  ;;  %v5311_v34 = vld [vmem:[#allocation2 + $0x1e4] ss:$16 sps:$4 sm:$0xff]   ;;  %v5315_v36 = vld [vmem:[#allocation2 + $0x1e0] ss:$16 sps:$4 sm:$0xff]   ;;  %v373_v19 = vadd.f32 %v372_v6, %v139_v60 }
  0x43   :  { %v5313_v35 = vld [vmem:[#allocation2 + $0x3e4] ss:$16 sps:$4 sm:$0xff]   ;;  %v5316_v37 = vld [vmem:[#allocation2 + $0x3e0] ss:$16 sps:$4 sm:$0xff]  }
  0x44   :  { %1936 = vmatpush1.bf16.msra.mxu0 %v5291_v20  ;;  %v5317_v38 = vld [vmem:[#allocation2 + $0x1c4] ss:$16 sps:$4 sm:$0xff]   ;;  %v5321_v40 = vld [vmem:[#allocation2 + $0x1c0] ss:$16 sps:$4 sm:$0xff]  }
  0x45   :  { %1977 = vmatpush1.bf16.msra.mxu1 %v5292_v21  ;;  %1937 = vmatprep.subr.bf16.mxu0 %v5293_v22  ;;  %v5319_v39 = vld [vmem:[#allocation2 + $0x3c4] ss:$16 sps:$4 sm:$0xff]   ;;  %v5322_v41 = vld [vmem:[#allocation2 + $0x3c0] ss:$16 sps:$4 sm:$0xff]   ;;  %v158_v22 = vrot.slane %v157_v7, 2 }
  0x46   :  { %1978 = vmatprep.subr.bf16.mxu1 %v5295_v23  ;;  %v5323_v42 = vld [vmem:[#allocation2 + $0x1a4] ss:$16 sps:$4 sm:$0xff]   ;;  %v5327_v44 = vld [vmem:[#allocation2 + $0x1a0] ss:$16 sps:$4 sm:$0xff]   ;;  %v409_v23 = vadd.f32 %v408_v8, %v145_v62 }
  0x47   :  { %v5325_v43 = vld [vmem:[#allocation2 + $0x3a4] ss:$16 sps:$4 sm:$0xff]   ;;  %v5328_v45 = vld [vmem:[#allocation2 + $0x3a0] ss:$16 sps:$4 sm:$0xff]  }
  0x48   :  { %1938 = vmatpush1.bf16.msra.mxu0 %v5297_v24  ;;  %v5329_v46 = vld [vmem:[#allocation2 + $0x184] ss:$16 sps:$4 sm:$0xff]   ;;  %v5333_v48 = vld [vmem:[#allocation2 + $0x180] ss:$16 sps:$4 sm:$0xff]  }
  0x49   :  { %1979 = vmatpush1.bf16.msra.mxu1 %v5298_v25  ;;  %1939 = vmatprep.subr.bf16.mxu0 %v5299_v26  ;;  %v5331_v47 = vld [vmem:[#allocation2 + $0x384] ss:$16 sps:$4 sm:$0xff]   ;;  %v5334_v49 = vld [vmem:[#allocation2 + $0x380] ss:$16 sps:$4 sm:$0xff]   ;;  %v194_v25 = vrot.slane %v193_v10, 2  ;;  %v105_v26 = vld [vmem:[%s6814_s0 + $0x18] sm:$0xff] }
  0x4a   :  { %1980 = vmatprep.subr.bf16.mxu1 %v5301_v27  ;;  %v5335_v51 = vld [vmem:[#allocation2 + $0x164] ss:$16 sps:$4 sm:$0xff]   ;;  %v5339_v54 = vld [vmem:[#allocation2 + $0x160] ss:$16 sps:$4 sm:$0xff]   ;;  %v111_v27 = vld [vmem:[%s6814_s0 + $0x48] sm:$0xff] }
  0x4b   :  { %v5337_v52 = vld [vmem:[#allocation2 + $0x364] ss:$16 sps:$4 sm:$0xff]   ;;  %v5340_v57 = vld [vmem:[#allocation2 + $0x360] ss:$16 sps:$4 sm:$0xff]  }
  0x4c   :  { %1940 = vmatpush1.bf16.msra.mxu0 %v5303_v28  ;;  %v5341_v0 = vld [vmem:[#allocation2 + $0x144] ss:$16 sps:$4 sm:$0xff]   ;;  %v5345_v9 = vld [vmem:[#allocation2 + $0x140] ss:$16 sps:$4 sm:$0xff]   ;;  %v117_v28 = vld [vmem:[%s6814_s0 + $0x78] sm:$0xff] }
  0x4d   :  { %1981 = vmatpush1.bf16.msra.mxu1 %v5304_v29  ;;  %1941 = vmatprep.subr.bf16.mxu0 %v5305_v30  ;;  %v5343_v1 = vld [vmem:[#allocation2 + $0x344] ss:$16 sps:$4 sm:$0xff]   ;;  %v5346_v11 = vld [vmem:[#allocation2 + $0x340] ss:$16 sps:$4 sm:$0xff]   ;;  %v230_v29 = vrot.slane %v229_v13, 2  ;;  %v123_v30 = vld [vmem:[%s6814_s0 + $0xa8] sm:$0xff] }
  0x4e   :  { %1982 = vmatprep.subr.bf16.mxu1 %v5307_v31  ;;  %v5347_v12 = vld [vmem:[#allocation2 + $0x124] ss:$16 sps:$4 sm:$0xff]   ;;  %v5351_v15 = vld [vmem:[#allocation2 + $0x120] ss:$16 sps:$4 sm:$0xff]   ;;  %v129_v31 = vld [vmem:[%s6814_s0 + $0xd8] sm:$0xff] }
  0x4f   :  { %v5349_v14 = vld [vmem:[#allocation2 + $0x324] ss:$16 sps:$4 sm:$0xff]   ;;  %v5352_v20 = vld [vmem:[#allocation2 + $0x320] ss:$16 sps:$4 sm:$0xff]  }
  0x50   :  { %1942 = vmatpush1.bf16.msra.mxu0 %v5309_v32  ;;  %v5353_v21 = vld [vmem:[#allocation2 + $0x104] ss:$16 sps:$4 sm:$0xff]   ;;  %v135_v32 = vld [vmem:[%s6814_s0 + $0x108] sm:$0xff] }
  0x51   :  { %1983 = vmatpush1.bf16.msra.mxu1 %v5310_v33  ;;  %1943 = vmatprep.subr.bf16.mxu0 %v5311_v34  ;;  %v5355_v24 = vld [vmem:[#allocation2 + $0x304] ss:$16 sps:$4 sm:$0xff]   ;;  %v5357_v33 = vld [vmem:[#allocation2 + $0x100] ss:$16 sps:$4 sm:$0xff]   ;;  %v266_v34 = vrot.slane %v265_v16, 2  ;;  %v348_v50 = vrot.slane %v135_v32, 4 }
  0x52   :  { %1984 = vmatprep.subr.bf16.mxu1 %v5313_v35  ;;  %v302_v35 = vrot.slane %v301_v17, 2  ;;  %v5361_v53 = vld [vmem:[#allocation2 + $0x4e4] ss:$16 sps:$4 sm:$0xff]  }
  0x53   :  { %v349_v4 = vadd.f32 %v348_v50, %v135_v32 }
  0x54   :  { %1944 = vmatpush2.bf16.msra.mxu0 %v5315_v36  ;;  %v338_v36 = vrot.slane %v337_v18, 2  ;;  %v303_v55 = vadd.f32 %v302_v35, %v301_v17  ;;  %v132_v35 = vld [vmem:[%s6814_s0 + $0xf0] sm:$0xff] }
  0x55   :  { %1985 = vmatpush2.bf16.msra.mxu1 %v5316_v37  ;;  %1945 = vmatprep.subr.bf16.mxu0 %v5317_v38  ;;  %v374_v37 = vrot.slane %v373_v19, 2  ;;  %v141_v38 = vld [vmem:[%s6814_s0 + $0x138] sm:$0xff] }
  0x56   :  { %1986 = vmatprep.subr.bf16.mxu1 %v5319_v39  ;;  %v147_v39 = vld [vmem:[%s6814_s0 + $0x168] sm:$0xff]  ;;  %v339_v56 = vadd.f32 %v338_v36, %v337_v18  ;;  %v304_v8 = vrot.slane %v303_v55, 1  ;;  %v138_v36 = vld [vmem:[%s6814_s0 + $0x120] sm:$0xff] }
  0x57   :  { %v366_v50 = vrot.slane %v138_v36, 4 }
  0x58   :  { %1946 = vmatpush2.bf16.msra.mxu0 %v5321_v40  ;;  %v159_v40 = vadd.f32 %v158_v22, %v157_v7  ;;  %v350_v22 = vrot.slane %v349_v4, 2 }
  0x59   :  { %1987 = vmatpush2.bf16.msra.mxu1 %v5322_v41  ;;  %1947 = vmatprep.subr.bf16.mxu0 %v5323_v42  ;;  %v410_v41 = vrot.slane %v409_v23, 2  ;;  %v168_v42 = vrot.slane %v105_v26, 4 }
  0x5a   :  { %1988 = vmatprep.subr.bf16.mxu1 %v5325_v43  ;;  %v204_v43 = vrot.slane %v111_v27, 4  ;;  %v160_v59 = vrot.slane %v159_v40, 1 }
  0x5b   :  { %v411_v60 = vadd.f32 %v410_v41, %v409_v23  ;;  %v169_v61 = vadd.f32 %v168_v42, %v105_v26  ;;  %v120_v26 = vld [vmem:[%s6814_s0 + $0x90] sm:$0xff] }
  0x5c   :  { %1948 = vmatpush2.bf16.msra.mxu0 %v5327_v44  ;;  %v5358_v44 = vld [vmem:[#allocation2 + $0x300] ss:$16 sps:$4 sm:$0xff]   ;;  %v205_v62 = vadd.f32 %v204_v43, %v111_v27  ;;  %v351_v43 = vadd.f32 %v350_v22, %v349_v4 }
  0x5d   :  { %1989 = vmatpush2.bf16.msra.mxu1 %v5328_v45  ;;  %1949 = vmatprep.subr.bf16.mxu0 %v5329_v46  ;;  %v195_v45 = vadd.f32 %v194_v25, %v193_v10  ;;  %v240_v46 = vrot.slane %v117_v28, 4  ;;  %v114_v25 = vld [vmem:[%s6814_s0 + $0x60] sm:$0xff]  ;;  %v144_v41 = vld [vmem:[%s6814_s0 + $0x150] sm:$0xff] }
  0x5e   :  { %1990 = vmatprep.subr.bf16.mxu1 %v5331_v47  ;;  %v276_v47 = vrot.slane %v123_v30, 4 }
  0x5f   :  { %v196_v63 = vrot.slane %v195_v45, 1 }
  0x60   :  { %1950 = vmatpush2.bf16.msra.mxu0 %v5333_v48  ;;  %v312_v48 = vrot.slane %v129_v31, 4 }
  0x61   :  { %1991 = vmatpush2.bf16.msra.mxu1 %v5334_v49  ;;  %1951 = vmatprep.subr.bf16.mxu0 %v5335_v51  ;;  %v231_v49 = vadd.f32 %v230_v29, %v229_v13  ;;  %v384_v51 = vrot.slane %v141_v38, 4  ;;  %v170_v13 = vrot.slane %v169_v61, 2 }
  0x62   :  { %1992 = vmatprep.subr.bf16.mxu1 %v5337_v52  ;;  %v420_v52 = vrot.slane %v147_v39, 4  ;;  %v313_v2 = vadd.f32 %v312_v48, %v129_v31  ;;  %v126_v31 = vld [vmem:[%s6814_s0 + $0xc0] sm:$0xff] }
  0x63   :  { %v232_v3 = vrot.slane %v231_v49, 1  ;;  %v385_v5 = vadd.f32 %v384_v51, %v141_v38  ;;  %v294_v48 = vrot.slane %v126_v31, 4 }
  0x64   :  { %1952 = vmatpush2.bf16.msra.mxu0 %v5339_v54  ;;  %v267_v54 = vadd.f32 %v266_v34, %v265_v16  ;;  %v421_v6 = vadd.f32 %v420_v52, %v147_v39  ;;  %v314_v18 = vrot.slane %v313_v2, 2 }
  0x65   :  { %1993 = vmatpush2.bf16.msra.mxu1 %v5340_v57  ;;  %1953 = vmatprep.subr.bf16.mxu0 %v5341_v0  ;;  %v375_v57 = vadd.f32 %v374_v37, %v373_v19  ;;  %v241_v0 = vadd.f32 %v240_v46, %v117_v28  ;;  %v102_v19 = vld [vmem:[%s6814_s0] sm:$0xff]  ;;  %v386_v23 = vrot.slane %v385_v5, 2  ;;  %v6288_v28 = vadd.f32 %v304_v8, %v303_v55 }
  0x66   :  { %1994 = vmatprep.subr.bf16.mxu1 %v5343_v1  ;;  %v277_v1 = vadd.f32 %v276_v47, %v123_v30  ;;  %v268_v7 = vrot.slane %v267_v54, 1  ;;  %v150_v37 = vrot.slane %v102_v19, 4  ;;  %v222_v46 = vrot.slane %v114_v25, 4  ;;  %v110_v8 = vld [vmem:[%s6814_s0 + $0x40] sm:$0xff] }
  0x67   :  { %v376_v10 = vrot.slane %v375_v57, 1  ;;  %v242_v16 = vrot.slane %v241_v0, 2  ;;  %v258_v47 = vrot.slane %v120_v26, 4 }
  0x68   :  { %1954 = vmatpush2.bf16.msra.mxu0 %v5345_v9  ;;  %v340_v9 = vrot.slane %v339_v56, 1  ;;  %v278_v17 = vrot.slane %v277_v1, 2  ;;  %v6286_v27 = vadd.f32 %v268_v7, %v267_v54  ;;  %v402_v54 = vrot.slane %v144_v41, 4 }
  0x69   :  { %1995 = vmatpush2.bf16.msra.mxu1 %v5346_v11  ;;  %1955 = vmatprep.subr.bf16.mxu0 %v5347_v12  ;;  %v6268_v11 = vadd.f32 %v160_v59, %v159_v40  ;;  %v412_v12 = vrot.slane %v411_v60, 1  ;;  %v6292_v30 = vadd.f32 %v376_v10, %v375_v57  ;;  %v243_v38 = vadd.f32 %v242_v16, %v241_v0  ;;  %v122_v16 = vld [vmem:[%s6814_s0 + $0xa0] sm:$0xff] }
  0x6a   :  { %1996 = vmatprep.subr.bf16.mxu1 %v5349_v14  ;;  %v206_v14 = vrot.slane %v205_v62, 2  ;;  %v6290_v29 = vadd.f32 %v340_v9, %v339_v56  ;;  %v279_v39 = vadd.f32 %v278_v17, %v277_v1  ;;  %v315_v40 = vadd.f32 %v314_v18, %v313_v2  ;;  %v116_v9 = vld [vmem:[%s6814_s0 + $0x70] sm:$0xff] }
  0x6b   :  { %v6297_v32 = vadd.f32 %v412_v12, %v411_v60  ;;  %v244_v55 = vrot.slane %v243_v38, 1  ;;  %v352_v59 = vrot.slane %v351_v43, 1  ;;  %v295_v0 = vadd.f32 %v294_v48, %v126_v31  ;;  %v128_v17 = vld [vmem:[%s6814_s0 + $0xd0] sm:$0xff] }
  0x6c   :  { %1956 = vmatpush2.bf16.msra.mxu0 %v5351_v15  ;;  %v6270_v15 = vadd.f32 %v196_v63, %v195_v45  ;;  %v207_v34 = vadd.f32 %v206_v14, %v205_v62  ;;  %v280_v56 = vrot.slane %v279_v39, 1  ;;  %v316_v57 = vrot.slane %v315_v40, 1 }
  0x6d   :  { %1997 = vmatpush2.bf16.msra.mxu1 %v5352_v20  ;;  %1957 = vmatprep.subr.bf16.mxu0 %v5353_v21  ;;  %v108_v20 = vld [vmem:[%s6814_s0 + $0x30] sm:$0xff]  ;;  %v6278_v21 = vadd.f32 %v232_v3, %v231_v49  ;;  %v330_v49 = vrot.slane %v132_v35, 4  ;;  %v223_v62 = vadd.f32 %v222_v46, %v114_v25  ;;  %v259_v63 = vadd.f32 %v258_v47, %v120_v26 }
  0x6e   :  { %1998 = vmatprep.subr.bf16.mxu1 %v5355_v24  ;;  %v422_v24 = vrot.slane %v421_v6, 2  ;;  %v186_v42 = vrot.slane %v108_v20, 4  ;;  %v208_v52 = vrot.slane %v207_v34, 1  ;;  %v367_v2 = vadd.f32 %v366_v50, %v138_v36  ;;  %v104_v3 = vld [vmem:[%s6814_s0 + $0x10] sm:$0xff] }
  0x6f   :  { %v331_v1 = vadd.f32 %v330_v49, %v132_v35  ;;  %v403_v7 = vadd.f32 %v402_v54, %v144_v41  ;;  %v6321_v10 = vadd.f32 %v244_v55, %v243_v38  ;;  %v6323_v12 = vadd.f32 %v280_v56, %v279_v39 }
  0x70   :  { %1958 = vmatpush2.bf16.msra.mxu0 %v5357_v33  ;;  %v171_v33 = vadd.f32 %v170_v13, %v169_v61  ;;  %v423_v45 = vadd.f32 %v422_v24, %v421_v6  ;;  %v6325_v13 = vadd.f32 %v316_v57, %v315_v40  ;;  %v6333_v18 = vadd.f32 %v352_v59, %v351_v43  ;;  %v140_v24 = vld [vmem:[%s6814_s0 + $0x130] sm:$0xff] }
  0x71   :  { %1999 = vmatpush2.bf16.msra.mxu1 %v5358_v44  ;;  %2009 = vmatprep.subr.bf16.mxu0 %v5361_v53  ;;  %v387_v44 = vadd.f32 %v386_v23, %v385_v5  ;;  %v151_v53 = vadd.f32 %v150_v37, %v102_v19  ;;  %v6313_v5 = vadd.f32 %v208_v52, %v207_v34  ;;  %v224_v22 = vrot.slane %v223_v62, 2  ;;  %v134_v23 = vld [vmem:[%s6814_s0 + $0x100] sm:$0xff] }
  0x72   :  { %2050 = vmatprep.subr.bf16.mxu1 %v5364_v58  ;;  %v172_v51 = vrot.slane %v171_v33, 1  ;;  %v187_v58 = vadd.f32 %v186_v42, %v108_v20  ;;  %v424_v61 = vrot.slane %v423_v45, 1  ;;  %v260_v25 = vrot.slane %v259_v63, 2  ;;  %v146_v34 = vld [vmem:[%s6814_s0 + $0x160] sm:$0xff] }
  0x73   :  { %v388_v60 = vrot.slane %v387_v44, 1  ;;  %v152_v6 = vrot.slane %v151_v53, 2  ;;  %v296_v26 = vrot.slane %v295_v0, 2  ;;  %v332_v31 = vrot.slane %v331_v1, 2 }
  0x74   :  { %v6311_v4 = vadd.f32 %v172_v51, %v171_v33  ;;  %v188_v14 = vrot.slane %v187_v58, 2  ;;  %v6337_v20 = vadd.f32 %v424_v61, %v423_v45  ;;  %v368_v33 = vrot.slane %v367_v2, 2 }
  0x75   :  { %v6335_v19 = vadd.f32 %v388_v60, %v387_v44  ;;  %v153_v35 = vadd.f32 %v152_v6, %v151_v53  ;;  %v404_v36 = vrot.slane %v403_v7, 2  ;;  %v162_v37 = vrot.slane %v104_v3, 4 }
  0x76   :  { %6829 = vst [vmem:[#allocation12_spill] sm:$0xff] %v6337_v20  ;;  %v198_v38 = vrot.slane %v110_v8, 4  ;;  %v189_v39 = vadd.f32 %v188_v14, %v187_v58  ;;  %v234_v40 = vrot.slane %v116_v9, 4  ;;  %v270_v41 = vrot.slane %v122_v16, 4 }
  0x77   :  { %v306_v42 = vrot.slane %v128_v17, 4  ;;  %v225_v43 = vadd.f32 %v224_v22, %v223_v62  ;;  %v342_v44 = vrot.slane %v134_v23, 4  ;;  %v378_v45 = vrot.slane %v140_v24, 4 }
  0x78   :  { %v414_v46 = vrot.slane %v146_v34, 4  ;;  %v261_v47 = vadd.f32 %v260_v25, %v259_v63  ;;  %v297_v48 = vadd.f32 %v296_v26, %v295_v0  ;;  %v333_v49 = vadd.f32 %v332_v31, %v331_v1  ;;  %v119_v31 = vld [vmem:[%s6814_s0 + $0x88] sm:$0xff] }
  0x79   :  { %v369_v50 = vadd.f32 %v368_v33, %v367_v2  ;;  %v154_v51 = vrot.slane %v153_v35, 1  ;;  %v405_v52 = vadd.f32 %v404_v36, %v403_v7  ;;  %v163_v54 = vadd.f32 %v162_v37, %v104_v3  ;;  %v125_v33 = vld [vmem:[%s6814_s0 + $0xb8] sm:$0xff] }
  0x7a   :  { %v199_v55 = vadd.f32 %v198_v38, %v110_v8  ;;  %v190_v53 = vrot.slane %v189_v39, 1  ;;  %v235_v56 = vadd.f32 %v234_v40, %v116_v9  ;;  %v271_v57 = vadd.f32 %v270_v41, %v122_v16  ;;  %v107_v16 = vld [vmem:[%s6814_s0 + $0x28] sm:$0xff] }
  0x7b   :  { %v307_v59 = vadd.f32 %v306_v42, %v128_v17  ;;  %v226_v58 = vrot.slane %v225_v43, 1  ;;  %v343_v60 = vadd.f32 %v342_v44, %v134_v23  ;;  %v379_v61 = vadd.f32 %v378_v45, %v140_v24  ;;  %v113_v17 = vld [vmem:[%s6814_s0 + $0x58] sm:$0xff]  ;;  %v131_v38 = vld [vmem:[%s6814_s0 + $0xe8] sm:$0xff] }
  0x7c   :  { %v415_v6 = vadd.f32 %v414_v46, %v146_v34  ;;  %v262_v62 = vrot.slane %v261_v47, 1  ;;  %v298_v14 = vrot.slane %v297_v48, 1  ;;  %v334_v22 = vrot.slane %v333_v49, 1  ;;  %v137_v42 = vld [vmem:[%s6814_s0 + $0x118] sm:$0xff] }
  0x7d   :  { %v370_v20 = vrot.slane %v369_v50, 1  ;;  %v6348_v63 = vadd.f32 %v154_v51, %v153_v35  ;;  %v406_v0 = vrot.slane %v405_v52, 1  ;;  %v164_v1 = vrot.slane %v163_v54, 2 }
  0x7e   :  { %v200_v2 = vrot.slane %v199_v55, 2  ;;  %v6350_v7 = vadd.f32 %v190_v53, %v189_v39  ;;  %v236_v3 = vrot.slane %v235_v56, 2  ;;  %v272_v8 = vrot.slane %v271_v57, 2 }
  0x7f   :  { %v308_v9 = vrot.slane %v307_v59, 2  ;;  %v6358_v23 = vadd.f32 %v226_v58, %v225_v43  ;;  %v344_v24 = vrot.slane %v343_v60, 2  ;;  %v380_v25 = vrot.slane %v379_v61, 2  ;;  %v143_v43 = vld [vmem:[%s6814_s0 + $0x148] sm:$0xff] }
  0x80   :  { %6830 = vst [vmem:[#allocation13_spill] sm:$0xff] %v6350_v7  ;;  %v416_v26 = vrot.slane %v415_v6, 2  ;;  %v6366_v34 = vadd.f32 %v262_v62, %v261_v47  ;;  %v6368_v35 = vadd.f32 %v298_v14, %v297_v48  ;;  %v6370_v36 = vadd.f32 %v334_v22, %v333_v49  ;;  %v149_v47 = vld [vmem:[%s6814_s0 + $0x178] sm:$0xff] }
  0x81   :  { %6831 = vst [vmem:[#allocation14_spill] sm:$0xff] %v6358_v23  ;;  %v6372_v37 = vadd.f32 %v370_v20, %v369_v50  ;;  %v6377_v39 = vadd.f32 %v406_v0, %v405_v52  ;;  %v165_v40 = vadd.f32 %v164_v1, %v163_v54  ;;  %v201_v41 = vadd.f32 %v200_v2, %v199_v55 }
  0x82   :  { %6832 = vst [vmem:[#allocation15_spill] sm:$0xff] %v6366_v34  ;;  %6833 = vst [vmem:[#allocation16_spill] sm:$0xff] %v6368_v35  ;;  %v180_v44 = vrot.slane %v107_v16, 4  ;;  %v237_v45 = vadd.f32 %v236_v3, %v235_v56  ;;  %v273_v20 = vadd.f32 %v272_v8, %v271_v57  ;;  %v309_v46 = vadd.f32 %v308_v9, %v307_v59 }
  0x83   :  { %6834 = vst [vmem:[#allocation17_spill] sm:$0xff] %v6370_v36  ;;  %6835 = vst [vmem:[#allocation18_spill] sm:$0xff] %v6372_v37  ;;  %v216_v48 = vrot.slane %v113_v17, 4  ;;  %v345_v49 = vadd.f32 %v344_v24, %v343_v60  ;;  %v381_v50 = vadd.f32 %v380_v25, %v379_v61  ;;  %v417_v51 = vadd.f32 %v416_v26, %v415_v6 }
  0x84   :  { %6836 = vst [vmem:[#allocation19_spill] sm:$0xff] %v6377_v39  ;;  %v252_v52 = vrot.slane %v119_v31, 4  ;;  %v288_v54 = vrot.slane %v125_v33, 4  ;;  %v324_v55 = vrot.slane %v131_v38, 4  ;;  %v360_v53 = vrot.slane %v137_v42, 4 }
  0x85   :  { %v396_v58 = vrot.slane %v143_v43, 4  ;;  %v166_v62 = vrot.slane %v165_v40, 1  ;;  %v202_v14 = vrot.slane %v201_v41, 1  ;;  %v181_v22 = vadd.f32 %v180_v44, %v107_v16 }
  0x86   :  { %v432_v0 = vrot.slane %v149_v47, 4  ;;  %v238_v56 = vrot.slane %v237_v45, 1  ;;  %v274_v57 = vrot.slane %v273_v20, 1  ;;  %v310_v59 = vrot.slane %v309_v46, 1 }
  0x87   :  { %v217_v1 = vadd.f32 %v216_v48, %v113_v17  ;;  %v346_v2 = vrot.slane %v345_v49, 1  ;;  %v382_v3 = vrot.slane %v381_v50, 1  ;;  %v418_v8 = vrot.slane %v417_v51, 1 }
  0x88   :  { %v253_v9 = vadd.f32 %v252_v52, %v119_v31  ;;  %v289_v60 = vadd.f32 %v288_v54, %v125_v33  ;;  %v325_v61 = vadd.f32 %v324_v55, %v131_v38  ;;  %v361_v6 = vadd.f32 %v360_v53, %v137_v42  ;;  %v142_v53 = vld [vmem:[%s6814_s0 + $0x140] sm:$0xff] }
  0x89   :  { %v397_v24 = vadd.f32 %v396_v58, %v143_v43  ;;  %v6388_v25 = vadd.f32 %v166_v62, %v165_v40  ;;  %v6390_v26 = vadd.f32 %v202_v14, %v201_v41  ;;  %v182_v39 = vrot.slane %v181_v22, 2  ;;  %v148_v58 = vld [vmem:[%s6814_s0 + $0x170] sm:$0xff] }
  0x8a   :  { %v433_v37 = vadd.f32 %v432_v0, %v149_v47  ;;  %v6392_v16 = vadd.f32 %v238_v56, %v237_v45  ;;  %v6394_v44 = vadd.f32 %v274_v57, %v273_v20  ;;  %v6396_v36 = vadd.f32 %v310_v59, %v309_v46  ;;  %v106_v45 = vld [vmem:[%s6814_s0 + $0x20] sm:$0xff]  ;;  %v112_v20 = vld [vmem:[%s6814_s0 + $0x50] sm:$0xff] }
  0x8b   :  { %6837 = vst [vmem:[#allocation20_spill] sm:$0xff] %v6388_v25  ;;  %6838 = vst [vmem:[#allocation21_spill] sm:$0xff] %v6390_v26  ;;  %v218_v17 = vrot.slane %v217_v1, 2  ;;  %v6398_v48 = vadd.f32 %v346_v2, %v345_v49  ;;  %v6400_v31 = vadd.f32 %v382_v3, %v381_v50  ;;  %v6402_v33 = vadd.f32 %v418_v8, %v417_v51  ;;  %v118_v49 = vld [vmem:[%s6814_s0 + $0x80] sm:$0xff]  ;;  %v124_v50 = vld [vmem:[%s6814_s0 + $0xb0] sm:$0xff] }
  0x8c   :  { %6839 = vst [vmem:[#allocation22_spill] sm:$0xff] %v6392_v16  ;;  %6840 = vst [vmem:[#allocation23_spill] sm:$0xff] %v6394_v44  ;;  %v254_v38 = vrot.slane %v253_v9, 2  ;;  %v290_v40 = vrot.slane %v289_v60, 2  ;;  %v326_v42 = vrot.slane %v325_v61, 2  ;;  %v362_v41 = vrot.slane %v361_v6, 2 }
  0x8d   :  { %6841 = vst [vmem:[#allocation24_spill] sm:$0xff] %v6396_v36  ;;  %6842 = vst [vmem:[#allocation25_spill] sm:$0xff] %v6398_v48  ;;  %v398_v43 = vrot.slane %v397_v24, 2  ;;  %v183_v46 = vadd.f32 %v182_v39, %v181_v22  ;;  %v434_v47 = vrot.slane %v433_v37, 2  ;;  %v130_v51 = vld [vmem:[%s6814_s0 + $0xe0] sm:$0xff]  ;;  %v174_v52 = vrot.slane %v106_v45, 4 }
  0x8e   :  { %6843 = vst [vmem:[#allocation26_spill] sm:$0xff] %v6400_v31  ;;  %6844 = vst [vmem:[#allocation27_spill] sm:$0xff] %v6402_v33  ;;  %v210_v54 = vrot.slane %v112_v20, 4  ;;  %v219_v55 = vadd.f32 %v218_v17, %v217_v1  ;;  %v136_v39 = vld [vmem:[%s6814_s0 + $0x110] sm:$0xff]  ;;  %v246_v62 = vrot.slane %v118_v49, 4  ;;  %v282_v14 = vrot.slane %v124_v50, 4 }
  0x8f   :  { %v318_v22 = vrot.slane %v130_v51, 4  ;;  %v175_v0 = vadd.f32 %v174_v52, %v106_v45  ;;  %v354_v57 = vrot.slane %v136_v39, 4  ;;  %v390_v59 = vrot.slane %v142_v53, 4 }
  0x90   :  { %v211_v56 = vadd.f32 %v210_v54, %v112_v20  ;;  %v247_v1 = vadd.f32 %v246_v62, %v118_v49  ;;  %v283_v2 = vadd.f32 %v282_v14, %v124_v50  ;;  %v426_v8 = vrot.slane %v148_v58, 4 }
  0x91   :  { %v319_v3 = vadd.f32 %v318_v22, %v130_v51  ;;  %v176_v17 = vrot.slane %v175_v0, 2  ;;  %v355_v31 = vadd.f32 %v354_v57, %v136_v39  ;;  %v391_v48 = vadd.f32 %v390_v59, %v142_v53 }
  0x92   :  { %v212_v33 = vrot.slane %v211_v56, 2  ;;  %v248_v36 = vrot.slane %v247_v1, 2  ;;  %v284_v44 = vrot.slane %v283_v2, 2  ;;  %v427_v26 = vadd.f32 %v426_v8, %v148_v58 }
  0x93   :  { %v320_v16 = vrot.slane %v319_v3, 2  ;;  %v255_v25 = vadd.f32 %v254_v38, %v253_v9  ;;  %v291_v35 = vadd.f32 %v290_v40, %v289_v60  ;;  %v356_v34 = vrot.slane %v355_v31, 2 }
  0x94   :  { %v392_v23 = vrot.slane %v391_v48, 2  ;;  %v327_v45 = vadd.f32 %v326_v42, %v325_v61  ;;  %v363_v20 = vadd.f32 %v362_v41, %v361_v6  ;;  %v399_v52 = vadd.f32 %v398_v43, %v397_v24 }
  0x95   :  { %v435_v54 = vadd.f32 %v434_v47, %v433_v37  ;;  %v177_v49 = vadd.f32 %v176_v17, %v175_v0  ;;  %v213_v50 = vadd.f32 %v212_v33, %v211_v56  ;;  %v249_v51 = vadd.f32 %v248_v36, %v247_v1 }
  0x96   :  { %v285_v62 = vadd.f32 %v284_v44, %v283_v2  ;;  %v321_v14 = vadd.f32 %v320_v16, %v319_v3  ;;  %v357_v22 = vadd.f32 %v356_v34, %v355_v31  ;;  %v393_v39 = vadd.f32 %v392_v23, %v391_v48 }
  0x97   :  { %v428_v53 = vrot.slane %v427_v26, 2  ;;  %v184_v57 = vrot.slane %v183_v46, 1  ;;  %v220_v59 = vrot.slane %v219_v55, 1  ;;  %v256_v7 = vrot.slane %v255_v25, 1 }
  0x98   :  { %v292_v58 = vrot.slane %v291_v35, 1  ;;  %v328_v9 = vrot.slane %v327_v45, 1  ;;  %v364_v60 = vrot.slane %v363_v20, 1  ;;  %v400_v38 = vrot.slane %v399_v52, 1 }
  0x99   :  { %v436_v40 = vrot.slane %v435_v54, 1  ;;  %v178_v61 = vrot.slane %v177_v49, 1  ;;  %v214_v6 = vrot.slane %v213_v50, 1  ;;  %v250_v24 = vrot.slane %v249_v51, 1 }
  0x9a   :  { %v286_v37 = vrot.slane %v285_v62, 1  ;;  %v322_v42 = vrot.slane %v321_v14, 1  ;;  %v358_v33 = vrot.slane %v357_v22, 1  ;;  %v394_v36 = vrot.slane %v393_v39, 1 }
  0x9b   :  { %v6428_v44 = vadd.f32 %v428_v53, %v427_v26  ;;  %v6430_v34 = vadd.f32 %v184_v57, %v183_v46  ;;  %v6432_v23 = vadd.f32 %v220_v59, %v219_v55  ;;  %v6434_v16 = vadd.f32 %v256_v7, %v255_v25 }
  0x9c   :  { %v6436_v48 = vadd.f32 %v292_v58, %v291_v35  ;;  %v6438_v31 = vadd.f32 %v328_v9, %v327_v45  ;;  %v6440_v41 = vadd.f32 %v364_v60, %v363_v20  ;;  %v6442_v43 = vadd.f32 %v400_v38, %v399_v52 }
  0x9d   :  { %v6444_v47 = vadd.f32 %v436_v40, %v435_v54  ;;  %v6446_v0 = vadd.f32 %v178_v61, %v177_v49  ;;  %v6448_v26 = vadd.f32 %v214_v6, %v213_v50  ;;  %v6450_v46 = vadd.f32 %v250_v24, %v249_v51 }
  0x9e   :  { %v6452_v55 = vadd.f32 %v286_v37, %v285_v62  ;;  %v6456_v35 = vadd.f32 %v322_v42, %v321_v14  ;;  %v6458_v25 = vadd.f32 %v358_v33, %v357_v22  ;;  %v6460_v56 = vadd.f32 %v394_v36, %v393_v39 }
  0x9f   :  { %v430_v1 = vrot.slane %v6428_v44, 1 }
  0xae   :  { %v6454_v7 = vpop.permute.xlu0 %441 }
  0xaf   :  { %v6464_v2 = vrot.slane %v6454_v7, 1  ;;  %v6467_v3 = vrot.slane %v6454_v7, 2  ;;  %v6470_v8 = vrot.slane %v6454_v7, 3  ;;  %v6473_v17 = vrot.slane %v6454_v7, 4 }
  0xb0   :  { %v6476_v45 = vrot.slane %v6454_v7, 5  ;;  %v6479_v20 = vrot.slane %v6454_v7, 6  ;;  %v6482_v52 = vrot.slane %v6454_v7, 7  ;;  %v459_v54 = vmul.f32 %v6454_v7, %v6268_v11 }
  0xb1   :  { %v465_v49 = vmul.f32 %v6464_v2, %v6270_v15  ;;  %v471_v50 = vmul.f32 %v6467_v3, %v6278_v21  ;;  %v477_v51 = vmul.f32 %v6470_v8, %v6286_v27  ;;  %v483_v62 = vmul.f32 %v6473_v17, %v6288_v28 }
  0xb2   :  { %v489_v14 = vmul.f32 %v6476_v45, %v6290_v29  ;;  %v495_v11 = vmul.f32 %v6479_v20, %v6292_v30  ;;  %v501_v22 = vmul.f32 %v6482_v52, %v6297_v32  ;;  %v507_v15 = vpack.c.bf16 %v459_v54, %v459_v54 }
  0xb3   :  { %v513_v39 = vpack.c.bf16 %v465_v49, %v465_v49  ;;  %v519_v21 = vpack.c.bf16 %v471_v50, %v471_v50  ;;  %v525_v53 = vpack.c.bf16 %v477_v51, %v477_v51  ;;  %v531_v57 = vpack.c.bf16 %v483_v62, %v483_v62 }
  0xb4   :  { %v537_v27 = vpack.c.bf16 %v489_v14, %v489_v14  ;;  %v543_v59 = vpack.c.bf16 %v495_v11, %v495_v11  ;;  %v549_v28 = vpack.c.bf16 %v501_v22, %v501_v22  ;;  %v817_v58 = vunpack.c.l.b16 %v507_v15 }
  0xb5   :  { %v823_v9 = vunpack.c.l.b16 %v513_v39  ;;  %v829_v29 = vunpack.c.l.b16 %v519_v21  ;;  %v835_v60 = vunpack.c.l.b16 %v525_v53  ;;  %v841_v38 = vunpack.c.l.b16 %v531_v57 }
  0xb6   :  { %v847_v30 = vunpack.c.l.b16 %v537_v27  ;;  %v853_v40 = vunpack.c.l.b16 %v543_v59  ;;  %v859_v61 = vunpack.c.l.b16 %v549_v28  ;;  %v461_v32 = vmul.f32 %v6454_v7, %v6311_v4 }
  0xb7   :  { %v885_v6 = vrot.slane %v823_v9, 7  ;;  %v887_v24 = vrot.slane %v829_v29, 6  ;;  %v889_v37 = vrot.slane %v835_v60, 5  ;;  %v891_v42 = vrot.slane %v841_v38, 4 }
  0xb8   :  { %v893_v33 = vrot.slane %v847_v30, 3  ;;  %v895_v36 = vrot.slane %v853_v40, 2  ;;  %v897_v54 = vrot.slane %v859_v61, 1  ;;  %v467_v49 = vmul.f32 %v6464_v2, %v6313_v5  ;;  %v6845_v5 = vld [vmem:[#allocation12_spill] sm:$0xff] }
  0xb9   :  { %v886_v50 = vsel %vm865_vm0, %v885_v6, %v817_v58  ;;  %v473_v51 = vmul.f32 %v6467_v3, %v6321_v10  ;;  %v479_v62 = vmul.f32 %v6470_v8, %v6323_v12  ;;  %v485_v4 = vmul.f32 %v6473_v17, %v6325_v13 }
  0xba   :  { %v888_v14 = vsel %vm868_vm1, %v887_v24, %v886_v50  ;;  %v491_v11 = vmul.f32 %v6476_v45, %v6333_v18  ;;  %v497_v22 = vmul.f32 %v6479_v20, %v6335_v19  ;;  %v503_v15 = vmul.f32 %v6482_v52, %v6845_v5  ;;  %v6848_v5 = vld [vmem:[#allocation15_spill] sm:$0xff] }
  0xbb   :  { %v890_v39 = vsel %vm871_vm2, %v889_v37, %v888_v14  ;;  %v509_v10 = vpack.c.bf16 %v461_v32, %v461_v32  ;;  %v515_v21 = vpack.c.bf16 %v467_v49, %v467_v49  ;;  %v521_v53 = vpack.c.bf16 %v473_v51, %v473_v51 }
  0xbc   :  { %v892_v12 = vsel %vm874_vm3, %v891_v42, %v890_v39  ;;  %v527_v57 = vpack.c.bf16 %v479_v62, %v479_v62  ;;  %v533_v13 = vpack.c.bf16 %v485_v4, %v485_v4  ;;  %v539_v27 = vpack.c.bf16 %v491_v11, %v491_v11  ;;  %v6846_v62 = vld [vmem:[#allocation13_spill] sm:$0xff]  ;;  %v6847_v11 = vld [vmem:[#allocation14_spill] sm:$0xff]  ;;  %v6849_v39 = vld [vmem:[#allocation16_spill] sm:$0xff] }
  0xbd   :  { %v894_v59 = vsel %vm877_vm4, %v893_v33, %v892_v12  ;;  %v545_v28 = vpack.c.bf16 %v497_v22, %v497_v22  ;;  %v551_v18 = vpack.c.bf16 %v503_v15, %v503_v15  ;;  %v819_v58 = vunpack.c.l.b16 %v509_v10 }
  0xbe   :  { %v896_v19 = vsel %vm880_vm5, %v895_v36, %v894_v59  ;;  %v825_v9 = vunpack.c.l.b16 %v515_v21  ;;  %v831_v29 = vunpack.c.l.b16 %v521_v53  ;;  %v837_v60 = vunpack.c.l.b16 %v527_v57  ;;  %v6850_v53 = vld [vmem:[#allocation17_spill] sm:$0xff] }
  0xbf   :  { %v898_v38 = vsel %vm883_vm6, %v897_v54, %v896_v19  ;;  %v843_v30 = vunpack.c.l.b16 %v533_v13  ;;  %v849_v40 = vunpack.c.l.b16 %v539_v27  ;;  %v855_v61 = vunpack.c.l.b16 %v545_v28  ;;  %v6852_v13 = vld [vmem:[#allocation19_spill] sm:$0xff] }
  0xc0   :  { %v6523_v32 = vpack.c.b16 %v898_v38, %v898_v38  ;;  %v861_v6 = vunpack.c.l.b16 %v551_v18  ;;  %v913_v24 = vrot.slane %v825_v9, 7  ;;  %v915_v37 = vrot.slane %v831_v29, 6 }
  0xc1   :  { %v917_v42 = vrot.slane %v837_v60, 5  ;;  %v919_v33 = vrot.slane %v843_v30, 4  ;;  %v921_v49 = vrot.slane %v849_v40, 3  ;;  %v923_v50 = vrot.slane %v855_v61, 2 }
  0xc2   :  { %1959 = vmatprep.mubr.bf16.mxu0 %v6523_v32  ;;  %v914_v36 = vsel %vm865_vm0, %v913_v24, %v819_v58  ;;  %v925_v51 = vrot.slane %v861_v6, 1  ;;  %v458_v54 = vmul.f32 %v6454_v7, %v6348_v63  ;;  %v464_v4 = vmul.f32 %v6464_v2, %v6846_v62  ;;  %v6851_v63 = vld [vmem:[#allocation18_spill] sm:$0xff] }
  0xc3   :  { %v916_v14 = vsel %vm868_vm1, %v915_v37, %v914_v36  ;;  %v470_v22 = vmul.f32 %v6467_v3, %v6847_v11  ;;  %v476_v15 = vmul.f32 %v6470_v8, %v6848_v5  ;;  %v482_v10 = vmul.f32 %v6473_v17, %v6849_v39 }
  0xc4   :  { %v918_v21 = vsel %vm871_vm2, %v917_v42, %v916_v14  ;;  %v488_v12 = vmul.f32 %v6476_v45, %v6850_v53  ;;  %v494_v57 = vmul.f32 %v6479_v20, %v6851_v63  ;;  %v500_v27 = vmul.f32 %v6482_v52, %v6852_v13  ;;  %v6856_v13 = vld [vmem:[#allocation23_spill] sm:$0xff] }
  0xc5   :  { %v920_v59 = vsel %vm874_vm3, %v919_v33, %v918_v21  ;;  %v506_v28 = vpack.c.bf16 %v458_v54, %v458_v54  ;;  %v512_v18 = vpack.c.bf16 %v464_v4, %v464_v4  ;;  %v518_v58 = vpack.c.bf16 %v470_v22, %v470_v22  ;;  %v6854_v21 = vld [vmem:[#allocation21_spill] sm:$0xff] }
  0xc6   :  { %v922_v19 = vsel %vm877_vm4, %v921_v49, %v920_v59  ;;  %v524_v9 = vpack.c.bf16 %v476_v15, %v476_v15  ;;  %v530_v29 = vpack.c.bf16 %v482_v10, %v482_v10  ;;  %v536_v60 = vpack.c.bf16 %v488_v12, %v488_v12  ;;  %v6853_v15 = vld [vmem:[#allocation20_spill] sm:$0xff]  ;;  %v6855_v12 = vld [vmem:[#allocation22_spill] sm:$0xff] }
  0xc7   :  { %v924_v38 = vsel %vm880_vm5, %v923_v50, %v922_v19  ;;  %v542_v30 = vpack.c.bf16 %v494_v57, %v494_v57  ;;  %v548_v40 = vpack.c.bf16 %v500_v27, %v500_v27  ;;  %v816_v61 = vunpack.c.l.b16 %v506_v28  ;;  %v6857_v59 = vld [vmem:[#allocation24_spill] sm:$0xff] }
  0xc8   :  { %v926_v6 = vsel %vm883_vm6, %v925_v51, %v924_v38  ;;  %v822_v24 = vunpack.c.l.b16 %v512_v18  ;;  %v828_v37 = vunpack.c.l.b16 %v518_v58  ;;  %v834_v42 = vunpack.c.l.b16 %v524_v9  ;;  %v6858_v18 = vld [vmem:[#allocation25_spill] sm:$0xff]  ;;  %v6859_v9 = vld [vmem:[#allocation26_spill] sm:$0xff] }
  0xc9   :  { %v6549_v36 = vpack.c.b16 %v926_v6, %v926_v6  ;;  %v840_v33 = vunpack.c.l.b16 %v530_v29  ;;  %v846_v54 = vunpack.c.l.b16 %v536_v60  ;;  %v852_v62 = vunpack.c.l.b16 %v542_v30  ;;  %v6860_v60 = vld [vmem:[#allocation27_spill] sm:$0xff] }
  0xca   :  { %v858_v4 = vunpack.c.l.b16 %v548_v40  ;;  %v864_v49 = vrot.slane %v822_v24, 7  ;;  %v867_v14 = vrot.slane %v828_v37, 6  ;;  %v870_v11 = vrot.slane %v834_v42, 5  ;;  %v5359_v37 = vld [vmem:[#allocation2 + $0x4e0] ss:$16 sps:$4 sm:$0xff]  }
  0xcb   :  { %2000 = vmatprep.mubr.bf16.mxu1 %v6549_v36  ;;  %v873_v50 = vrot.slane %v840_v33, 4  ;;  %v876_v22 = vrot.slane %v846_v54, 3  ;;  %v879_v5 = vrot.slane %v852_v62, 2  ;;  %v460_v51 = vmul.f32 %v6454_v7, %v6853_v15  ;;  %v5367_v15 = vld [vmem:[#allocation2 + $0x4c4] ss:$16 sps:$4 sm:$0xff]  }
  0xcc   :  { %v866_v39 = vsel %vm865_vm0, %v864_v49, %v816_v61  ;;  %v882_v10 = vrot.slane %v858_v4, 1  ;;  %v466_v53 = vmul.f32 %v6464_v2, %v6854_v21  ;;  %v472_v63 = vmul.f32 %v6467_v3, %v6855_v12 }
  0xcd   :  { %v869_v57 = vsel %vm868_vm1, %v867_v14, %v866_v39  ;;  %v478_v27 = vmul.f32 %v6470_v8, %v6856_v13  ;;  %v484_v28 = vmul.f32 %v6473_v17, %v6857_v59  ;;  %v490_v58 = vmul.f32 %v6476_v45, %v6858_v18 }
  0xce   :  { %v872_v19 = vsel %vm871_vm2, %v870_v11, %v869_v57  ;;  %v496_v29 = vmul.f32 %v6479_v20, %v6859_v9  ;;  %v502_v38 = vmul.f32 %v6482_v52, %v6860_v60  ;;  %v508_v30 = vpack.c.bf16 %v460_v51, %v460_v51  ;;  %v5365_v60 = vld [vmem:[#allocation2 + $0x4c0] ss:$16 sps:$4 sm:$0xff]  }
  0xcf   :  { %v875_v40 = vsel %vm874_vm3, %v873_v50, %v872_v19  ;;  %v514_v61 = vpack.c.bf16 %v466_v53, %v466_v53  ;;  %v520_v6 = vpack.c.bf16 %v472_v63, %v472_v63  ;;  %v526_v24 = vpack.c.bf16 %v478_v27, %v478_v27 }
  0xd0   :  { %v878_v42 = vsel %vm877_vm4, %v876_v22, %v875_v40  ;;  %v532_v33 = vpack.c.bf16 %v484_v28, %v484_v28  ;;  %v538_v54 = vpack.c.bf16 %v490_v58, %v490_v58  ;;  %v544_v62 = vpack.c.bf16 %v496_v29, %v496_v29 }
  0xd1   :  { %v881_v4 = vsel %vm880_vm5, %v879_v5, %v878_v42  ;;  %v550_v49 = vpack.c.bf16 %v502_v38, %v502_v38  ;;  %v818_v14 = vunpack.c.l.b16 %v508_v30  ;;  %v824_v11 = vunpack.c.l.b16 %v514_v61  ;;  %v5373_v38 = vld [vmem:[#allocation2 + $0x4a4] ss:$16 sps:$4 sm:$0xff]  }
  0xd2   :  { %v884_v39 = vsel %vm883_vm6, %v882_v10, %v881_v4  ;;  %v830_v51 = vunpack.c.l.b16 %v520_v6  ;;  %v836_v21 = vunpack.c.l.b16 %v526_v24  ;;  %v842_v50 = vunpack.c.l.b16 %v532_v33  ;;  %v5371_v24 = vld [vmem:[#allocation2 + $0x4a0] ss:$16 sps:$4 sm:$0xff]  }
  0xd3   :  { %v6575_v53 = vpack.c.b16 %v884_v39, %v884_v39  ;;  %v848_v12 = vunpack.c.l.b16 %v538_v54  ;;  %v854_v63 = vunpack.c.l.b16 %v544_v62  ;;  %v860_v57 = vunpack.c.l.b16 %v550_v49  ;;  %v5379_v54 = vld [vmem:[#allocation2 + $0x484] ss:$16 sps:$4 sm:$0xff]   ;;  %v5362_v62 = vld [vmem:[#allocation2 + $0xe8] ss:$16 sps:$4 sm:$0xff]   ;;  %v5370_v39 = vld [vmem:[#allocation2 + $0xcc] ss:$16 sps:$4 sm:$0xff]  }
  0xd4   :  { %v899_v22 = vrot.slane %v824_v11, 7  ;;  %v901_v13 = vrot.slane %v830_v51, 6  ;;  %v903_v27 = vrot.slane %v836_v21, 5  ;;  %v905_v59 = vrot.slane %v842_v50, 4 }
  0xd5   :  { %1960 = vmatmul.mubr.bf16.vlgmr.msra.gmra.mxu0 %v6575_v53  ;;  %v907_v5 = vrot.slane %v848_v12, 3  ;;  %v909_v28 = vrot.slane %v854_v63, 2  ;;  %v911_v18 = vrot.slane %v860_v57, 1  ;;  %v463_v10 = vmul.f32 %v6454_v7, %v6430_v34  ;;  %v5377_v63 = vld [vmem:[#allocation2 + $0x480] ss:$16 sps:$4 sm:$0xff]  }
  0xd6   :  { %v900_v58 = vsel %vm865_vm0, %v899_v22, %v818_v14  ;;  %2010 = vmatpush1.bf16.msra.mxu0 %v5359_v37  ;;  %v469_v19 = vmul.f32 %v6464_v2, %v6432_v23  ;;  %v475_v9 = vmul.f32 %v6467_v3, %v6434_v16  ;;  %v481_v29 = vmul.f32 %v6470_v8, %v6436_v48 }
  0xd7   :  { %v902_v30 = vsel %vm868_vm1, %v901_v13, %v900_v58  ;;  %v487_v40 = vmul.f32 %v6473_v17, %v6438_v31  ;;  %v493_v34 = vmul.f32 %v6476_v45, %v6440_v41  ;;  %v499_v61 = vmul.f32 %v6479_v20, %v6442_v43  ;;  %2011 = vmatprep.subr.bf16.mxu0 %v5367_v15 }
  0xd8   :  { %v904_v23 = vsel %vm871_vm2, %v903_v27, %v902_v30  ;;  %v505_v16 = vmul.f32 %v6482_v52, %v6444_v47  ;;  %v511_v48 = vpack.c.bf16 %v463_v10, %v463_v10  ;;  %v517_v6 = vpack.c.bf16 %v469_v19, %v469_v19 }
  0xd9   :  { %v906_v37 = vsel %vm874_vm3, %v905_v59, %v904_v23  ;;  %v523_v42 = vpack.c.bf16 %v475_v9, %v475_v9  ;;  %v529_v33 = vpack.c.bf16 %v481_v29, %v481_v29  ;;  %v535_v31 = vpack.c.bf16 %v487_v40, %v487_v40  ;;  %v5376_v29 = vld [vmem:[#allocation2 + $0xac] ss:$16 sps:$4 sm:$0xff]   ;;  %v5391_v23 = vld [vmem:[#allocation2 + $0x444] ss:$16 sps:$4 sm:$0xff]  }
  0xda   :  { %v908_v41 = vsel %vm877_vm4, %v907_v5, %v906_v37  ;;  %v541_v4 = vpack.c.bf16 %v493_v34, %v493_v34  ;;  %v547_v43 = vpack.c.bf16 %v499_v61, %v499_v61  ;;  %v553_v49 = vpack.c.bf16 %v505_v16, %v505_v16  ;;  %2012 = vmatpush1.bf16.msra.mxu0 %v5365_v60  ;;  %v5385_v60 = vld [vmem:[#allocation2 + $0x464] ss:$16 sps:$4 sm:$0xff]   ;;  %v5383_v34 = vld [vmem:[#allocation2 + $0x460] ss:$16 sps:$4 sm:$0xff]  }
  0xdb   :  { %v910_v14 = vsel %vm880_vm5, %v909_v28, %v908_v41  ;;  %v821_v11 = vunpack.c.l.b16 %v511_v48  ;;  %v827_v47 = vunpack.c.l.b16 %v517_v6  ;;  %v833_v15 = vunpack.c.l.b16 %v523_v42  ;;  %2013 = vmatprep.subr.bf16.mxu0 %v5373_v38  ;;  %v5368_v28 = vld [vmem:[#allocation2 + $0xc8] ss:$16 sps:$4 sm:$0xff]   ;;  %v5382_v6 = vld [vmem:[#allocation2 + $0x8c] ss:$16 sps:$4 sm:$0xff]  }
  0xdc   :  { %v912_v51 = vsel %vm883_vm6, %v911_v18, %v910_v14  ;;  %v839_v21 = vunpack.c.l.b16 %v529_v33  ;;  %v845_v50 = vunpack.c.l.b16 %v535_v31  ;;  %v851_v12 = vunpack.c.l.b16 %v541_v4  ;;  %v5374_v48 = vld [vmem:[#allocation2 + $0xa8] ss:$16 sps:$4 sm:$0xff]   ;;  %v5388_v4 = vld [vmem:[#allocation2 + $0x6c] ss:$16 sps:$4 sm:$0xff]  }
  0xdd   :  { %v6601_v57 = vpack.c.b16 %v912_v51, %v912_v51  ;;  %v857_v22 = vunpack.c.l.b16 %v547_v43  ;;  %v863_v13 = vunpack.c.l.b16 %v553_v49  ;;  %v941_v27 = vrot.slane %v827_v47, 7  ;;  %v5380_v31 = vld [vmem:[#allocation2 + $0x88] ss:$16 sps:$4 sm:$0xff]  }
  0xde   :  { %v943_v59 = vrot.slane %v833_v15, 6  ;;  %v945_v5 = vrot.slane %v839_v21, 5  ;;  %v947_v10 = vrot.slane %v845_v50, 4  ;;  %2014 = vmatpush1.bf16.msra.mxu0 %v5371_v24  ;;  %v431_v58 = vadd.f32 %v430_v1, %v6428_v44 }
  0xdf   :  { %2001 = vmatmul.mubr.bf16.vlgmr.msra.gmra.mxu1 %v6601_v57  ;;  %v942_v18 = vsel %vm865_vm0, %v941_v27, %v821_v11  ;;  %v949_v19 = vrot.slane %v851_v12, 3  ;;  %v951_v9 = vrot.slane %v857_v22, 2  ;;  %2015 = vmatprep.subr.bf16.mxu0 %v5379_v54  ;;  %v462_v38 = vmul.f32 %v6454_v7, %v6446_v0  ;;  %v5395_v11 = vld [vmem:[#allocation2 + $0x420] ss:$16 sps:$4 sm:$0xff]   ;;  %v5386_v12 = vld [vmem:[#allocation2 + $0x68] ss:$16 sps:$4 sm:$0xff]  }
  0xe0   :  { %2051 = vmatpush1.bf16.msra.mxu1 %v5362_v62  ;;  %v944_v30 = vsel %vm868_vm1, %v943_v59, %v942_v18  ;;  %v953_v40 = vrot.slane %v863_v13, 1  ;;  %2082 = vmatprep.mubr.bf16.mxu1 %v6523_v32  ;;  %v468_v44 = vmul.f32 %v6464_v2, %v6448_v26  ;;  %v474_v1 = vmul.f32 %v6467_v3, %v6450_v46  ;;  %v5394_v13 = vld [vmem:[#allocation2 + $0x4c] ss:$16 sps:$4 sm:$0xff]  }
  0xe1   :  { %v946_v61 = vsel %vm871_vm2, %v945_v5, %v944_v30  ;;  %2052 = vmatprep.subr.bf16.mxu1 %v5370_v39  ;;  %v480_v0 = vmul.f32 %v6470_v8, %v6452_v55  ;;  %v486_v7 = vmul.f32 %v6473_v17, %v6456_v35  ;;  %v492_v32 = vmul.f32 %v6476_v45, %v6458_v25  ;;  %v5389_v25 = vld [vmem:[#allocation2 + $0x440] ss:$16 sps:$4 sm:$0xff]   ;;  %v5403_v39 = vld [vmem:[#allocation2 + $0x404] ss:$16 sps:$4 sm:$0xff]  }
  0xe2   :  { %v948_v16 = vsel %vm874_vm3, %v947_v10, %v946_v61  ;;  %2016 = vmatpush1.bf16.msra.mxu0 %v5377_v63  ;;  %v498_v26 = vmul.f32 %v6479_v20, %v6460_v56  ;;  %v504_v46 = vmul.f32 %v6482_v52, %v431_v58  ;;  %v510_v2 = vpack.c.bf16 %v462_v38, %v462_v38  ;;  %v5397_v56 = vld [vmem:[#allocation2 + $0x424] ss:$16 sps:$4 sm:$0xff]   ;;  %v5401_v5 = vld [vmem:[#allocation2 + $0x400] ss:$16 sps:$4 sm:$0xff]  }
  0xe3   :  { %v950_v3 = vsel %vm877_vm4, %v949_v19, %v948_v16  ;;  %2017 = vmatprep.subr.bf16.mxu0 %v5385_v60  ;;  %v516_v55 = vpack.c.bf16 %v468_v44, %v468_v44  ;;  %v522_v8 = vpack.c.bf16 %v474_v1, %v474_v1  ;;  %v528_v35 = vpack.c.bf16 %v480_v0, %v480_v0  ;;  %v5409_v58 = vld [vmem:[#allocation2 + $0x5e4] ss:$16 sps:$4 sm:$0xff]   ;;  %v5400_v60 = vld [vmem:[#allocation2 + $0x2c] ss:$16 sps:$4 sm:$0xff]   ;;  %v5407_v30 = vld [vmem:[#allocation2 + $0x5e0] ss:$16 sps:$4 sm:$0xff]  }
  0xe4   :  { %v952_v17 = vsel %vm880_vm5, %v951_v9, %v950_v3  ;;  %2053 = vmatpush1.bf16.msra.mxu1 %v5368_v28  ;;  %v534_v45 = vpack.c.bf16 %v486_v7, %v486_v7  ;;  %v540_v24 = vpack.c.bf16 %v492_v32, %v492_v32  ;;  %v546_v37 = vpack.c.bf16 %v498_v26, %v498_v26  ;;  %v5392_v9 = vld [vmem:[#allocation2 + $0x48] ss:$16 sps:$4 sm:$0xff]   ;;  %v5406_v44 = vld [vmem:[#allocation2 + $0xc] ss:$16 sps:$4 sm:$0xff]   ;;  %v5413_v1 = vld [vmem:[#allocation2 + $0x5c0] ss:$16 sps:$4 sm:$0xff]  }
  0xe5   :  { %v954_v42 = vsel %vm883_vm6, %v953_v40, %v952_v17  ;;  %2054 = vmatprep.subr.bf16.mxu1 %v5376_v29  ;;  %v552_v20 = vpack.c.bf16 %v504_v46, %v504_v46  ;;  %v826_v52 = vunpack.c.l.b16 %v516_v55  ;;  %v832_v54 = vunpack.c.l.b16 %v522_v8  ;;  %v5415_v40 = vld [vmem:[#allocation2 + $0x5c4] ss:$16 sps:$4 sm:$0xff]   ;;  %v5412_v0 = vld [vmem:[#allocation2 + $0x1ec] ss:$16 sps:$4 sm:$0xff]   ;;  %v5419_v7 = vld [vmem:[#allocation2 + $0x5a0] ss:$16 sps:$4 sm:$0xff]  }
  0xe6   :  { %v6630_v33 = vpack.c.b16 %v954_v42, %v954_v42  ;;  %2018 = vmatpush1.bf16.msra.mxu0 %v5383_v34  ;;  %v838_v62 = vunpack.c.l.b16 %v528_v35  ;;  %v844_v41 = vunpack.c.l.b16 %v534_v45  ;;  %v820_v43 = vunpack.c.l.b16 %v510_v2  ;;  %v5398_v34 = vld [vmem:[#allocation2 + $0x28] ss:$16 sps:$4 sm:$0xff]   ;;  %v5421_v61 = vld [vmem:[#allocation2 + $0x5a4] ss:$16 sps:$4 sm:$0xff]   ;;  %v5425_v26 = vld [vmem:[#allocation2 + $0x580] ss:$16 sps:$4 sm:$0xff]  }
  0xe7   :  { %2019 = vmatprep.subr.bf16.mxu0 %v5391_v23  ;;  %v850_v49 = vunpack.c.l.b16 %v540_v24  ;;  %v927_v14 = vrot.slane %v826_v52, 7  ;;  %v856_v47 = vunpack.c.l.b16 %v546_v37  ;;  %v929_v15 = vrot.slane %v832_v54, 6  ;;  %v5404_v23 = vld [vmem:[#allocation2 + $0x8] ss:$16 sps:$4 sm:$0xff]   ;;  %v5427_v32 = vld [vmem:[#allocation2 + $0x584] ss:$16 sps:$4 sm:$0xff]  }
  0xe8   :  { %2041 = vmatprep.mubr.bf16.mxu0 %v6630_v33  ;;  %2055 = vmatpush1.bf16.msra.mxu1 %v5374_v48  ;;  %v862_v51 = vunpack.c.l.b16 %v552_v20  ;;  %v931_v50 = vrot.slane %v838_v62, 5  ;;  %v933_v22 = vrot.slane %v844_v41, 4  ;;  %v5410_v16 = vld [vmem:[#allocation2 + $0x1e8] ss:$16 sps:$4 sm:$0xff]   ;;  %v5418_v48 = vld [vmem:[#allocation2 + $0x1cc] ss:$16 sps:$4 sm:$0xff]  }
  0xe9   :  { %2056 = vmatprep.subr.bf16.mxu1 %v5382_v6  ;;  %v928_v21 = vsel %vm865_vm0, %v927_v14, %v820_v43  ;;  %v935_v59 = vrot.slane %v850_v49, 3  ;;  %v937_v28 = vrot.slane %v856_v47, 2  ;;  %v5433_v46 = vld [vmem:[#allocation2 + $0x564] ss:$16 sps:$4 sm:$0xff]   ;;  %v5416_v2 = vld [vmem:[#allocation2 + $0x1c8] ss:$16 sps:$4 sm:$0xff]  }
  0xea   :  { %2020 = vmatpush1.bf16.msra.mxu0 %v5389_v25  ;;  %v930_v63 = vsel %vm868_vm1, %v929_v15, %v928_v21  ;;  %v939_v19 = vrot.slane %v862_v51, 1  ;;  %v5424_v3 = vld [vmem:[#allocation2 + $0x1ac] ss:$16 sps:$4 sm:$0xff]   ;;  %v5431_v6 = vld [vmem:[#allocation2 + $0x560] ss:$16 sps:$4 sm:$0xff]  }
  0xeb   :  { %2021 = vmatprep.subr.bf16.mxu0 %v5397_v56  ;;  %v932_v27 = vsel %vm871_vm2, %v931_v50, %v930_v63  ;;  %v5439_v55 = vld [vmem:[#allocation2 + $0x544] ss:$16 sps:$4 sm:$0xff]   ;;  %v5422_v8 = vld [vmem:[#allocation2 + $0x1a8] ss:$16 sps:$4 sm:$0xff]   ;;  %v5430_v35 = vld [vmem:[#allocation2 + $0x18c] ss:$16 sps:$4 sm:$0xff]  }
  0xec   :  { %2057 = vmatpush1.bf16.msra.mxu1 %v5380_v31  ;;  %v934_v10 = vsel %vm874_vm3, %v933_v22, %v932_v27  ;;  %v5437_v17 = vld [vmem:[#allocation2 + $0x540] ss:$16 sps:$4 sm:$0xff]   ;;  %v5445_v25 = vld [vmem:[#allocation2 + $0x524] ss:$16 sps:$4 sm:$0xff]   ;;  %v5428_v45 = vld [vmem:[#allocation2 + $0x188] ss:$16 sps:$4 sm:$0xff]  }
  0xed   :  { %2058 = vmatprep.subr.bf16.mxu1 %v5388_v4  ;;  %v936_v18 = vsel %vm877_vm4, %v935_v59, %v934_v10  ;;  %v5436_v24 = vld [vmem:[#allocation2 + $0x16c] ss:$16 sps:$4 sm:$0xff]   ;;  %v5443_v37 = vld [vmem:[#allocation2 + $0x520] ss:$16 sps:$4 sm:$0xff]   ;;  %v5451_v42 = vld [vmem:[#allocation2 + $0x504] ss:$16 sps:$4 sm:$0xff]  }
  0xee   :  { %2022 = vmatpush1.bf16.msra.mxu0 %v5395_v11  ;;  %v938_v29 = vsel %vm880_vm5, %v937_v28, %v936_v18  ;;  %v5434_v56 = vld [vmem:[#allocation2 + $0x168] ss:$16 sps:$4 sm:$0xff]   ;;  %v5442_v20 = vld [vmem:[#allocation2 + $0x14c] ss:$16 sps:$4 sm:$0xff]   ;;  %v5449_v52 = vld [vmem:[#allocation2 + $0x500] ss:$16 sps:$4 sm:$0xff]  }
  0xef   :  { %2023 = vmatprep.subr.bf16.mxu0 %v5403_v39  ;;  %v6640_v38 = vsel %vm883_vm6, %v939_v19, %v938_v29  ;;  %v5457_v31 = vld [vmem:[#allocation2 + $0x2ec] ss:$16 sps:$4 sm:$0xff]   ;;  %v5440_v54 = vld [vmem:[#allocation2 + $0x148] ss:$16 sps:$4 sm:$0xff]  }
  0xf0   :  { %2059 = vmatpush1.bf16.msra.mxu1 %v5386_v12  ;;  %v5448_v62 = vld [vmem:[#allocation2 + $0x12c] ss:$16 sps:$4 sm:$0xff]   ;;  %v5455_v41 = vld [vmem:[#allocation2 + $0x2e8] ss:$16 sps:$4 sm:$0xff]   ;;  %v6644_v14 = vpack.c.b16 %v6640_v38, %v6640_v38 }
  0xf1   :  { %2060 = vmatprep.subr.bf16.mxu1 %v5394_v13  ;;  %v5463_v4 = vld [vmem:[#allocation2 + $0x2cc] ss:$16 sps:$4 sm:$0xff]   ;;  %v5446_v43 = vld [vmem:[#allocation2 + $0x128] ss:$16 sps:$4 sm:$0xff]  }
  0xf2   :  { %2024 = vmatpush1.bf16.msra.mxu0 %v5401_v5  ;;  %v5454_v49 = vld [vmem:[#allocation2 + $0x10c] ss:$16 sps:$4 sm:$0xff]   ;;  %v5461_v11 = vld [vmem:[#allocation2 + $0x2c8] ss:$16 sps:$4 sm:$0xff]  }
  0xf3   :  { %2025 = vmatprep.subr.bf16.mxu0 %v5409_v58  ;;  %v5469_v47 = vld [vmem:[#allocation2 + $0x2ac] ss:$16 sps:$4 sm:$0xff]   ;;  %v5452_v15 = vld [vmem:[#allocation2 + $0x108] ss:$16 sps:$4 sm:$0xff]  }
  0xf4   :  { %2061 = vmatpush1.bf16.msra.mxu1 %v5392_v9  ;;  %v5460_v39 = vld [vmem:[#allocation2 + $0x4ec] ss:$16 sps:$4 sm:$0xff]   ;;  %v5467_v51 = vld [vmem:[#allocation2 + $0x2a8] ss:$16 sps:$4 sm:$0xff]  }
  0xf5   :  { %2062 = vmatprep.subr.bf16.mxu1 %v5400_v60  ;;  %v5475_v21 = vld [vmem:[#allocation2 + $0x28c] ss:$16 sps:$4 sm:$0xff]   ;;  %v5458_v50 = vld [vmem:[#allocation2 + $0x4e8] ss:$16 sps:$4 sm:$0xff]  }
  0xf6   :  { %2026 = vmatpush2.bf16.msra.mxu0 %v5407_v30  ;;  %v5466_v12 = vld [vmem:[#allocation2 + $0x4cc] ss:$16 sps:$4 sm:$0xff]   ;;  %v5473_v63 = vld [vmem:[#allocation2 + $0x288] ss:$16 sps:$4 sm:$0xff]  }
  0xf7   :  { %2027 = vmatprep.subr.bf16.mxu0 %v5415_v40  ;;  %v5481_v22 = vld [vmem:[#allocation2 + $0x26c] ss:$16 sps:$4 sm:$0xff]   ;;  %v5464_v13 = vld [vmem:[#allocation2 + $0x4c8] ss:$16 sps:$4 sm:$0xff]  }
  0xf8   :  { %2063 = vmatpush1.bf16.msra.mxu1 %v5398_v34  ;;  %v5472_v27 = vld [vmem:[#allocation2 + $0x4ac] ss:$16 sps:$4 sm:$0xff]   ;;  %v5470_v5 = vld [vmem:[#allocation2 + $0x4a8] ss:$16 sps:$4 sm:$0xff]  }
  0xf9   :  { %2064 = vmatprep.subr.bf16.mxu1 %v5406_v44  ;;  %v5487_v59 = vld [vmem:[#allocation2 + $0x24c] ss:$16 sps:$4 sm:$0xff]   ;;  %v5485_v28 = vld [vmem:[#allocation2 + $0x248] ss:$16 sps:$4 sm:$0xff]  }
  0xfa   :  { %2028 = vmatpush2.bf16.msra.mxu0 %v5413_v1  ;;  %v5478_v10 = vld [vmem:[#allocation2 + $0x48c] ss:$16 sps:$4 sm:$0xff]   ;;  %v5476_v18 = vld [vmem:[#allocation2 + $0x488] ss:$16 sps:$4 sm:$0xff]  }
  0xfb   :  { %2029 = vmatprep.subr.bf16.mxu0 %v5421_v61  ;;  %v5493_v58 = vld [vmem:[#allocation2 + $0x22c] ss:$16 sps:$4 sm:$0xff]   ;;  %v5497_v60 = vld [vmem:[#allocation2 + $0x208] ss:$16 sps:$4 sm:$0xff]  }
  0xfc   :  { %2065 = vmatpush1.bf16.msra.mxu1 %v5404_v23  ;;  %v5484_v19 = vld [vmem:[#allocation2 + $0x46c] ss:$16 sps:$4 sm:$0xff]   ;;  %v5488_v30 = vld [vmem:[#allocation2 + $0x448] ss:$16 sps:$4 sm:$0xff]  }
  0xfd   :  { %2066 = vmatprep.subr.bf16.mxu1 %v5412_v0  ;;  %v5499_v9 = vld [vmem:[#allocation2 + $0x20c] ss:$16 sps:$4 sm:$0xff]   ;;  %v5503_v34 = vld [vmem:[#allocation2 + $0x3e8] ss:$16 sps:$4 sm:$0xff]  }
  0xfe   :  { %2030 = vmatpush2.bf16.msra.mxu0 %v5419_v7  ;;  %v5490_v29 = vld [vmem:[#allocation2 + $0x44c] ss:$16 sps:$4 sm:$0xff]   ;;  %v5494_v1 = vld [vmem:[#allocation2 + $0x428] ss:$16 sps:$4 sm:$0xff]  }
  0xff   :  { %2031 = vmatprep.subr.bf16.mxu0 %v5427_v32  ;;  %v5505_v38 = vld [vmem:[#allocation2 + $0x3ec] ss:$16 sps:$4 sm:$0xff]   ;;  %v5509_v23 = vld [vmem:[#allocation2 + $0x3c8] ss:$16 sps:$4 sm:$0xff]  }
 0x100   :  { %2067 = vmatpush2.bf16.msra.mxu1 %v5410_v16  ;;  %v5496_v40 = vld [vmem:[#allocation2 + $0x42c] ss:$16 sps:$4 sm:$0xff]   ;;  %v5500_v7 = vld [vmem:[#allocation2 + $0x408] ss:$16 sps:$4 sm:$0xff]  }
 0x101   :  { %2068 = vmatprep.subr.bf16.mxu1 %v5418_v48  ;;  %v5511_v44 = vld [vmem:[#allocation2 + $0x3cc] ss:$16 sps:$4 sm:$0xff]   ;;  %v5515_v16 = vld [vmem:[#allocation2 + $0x3a8] ss:$16 sps:$4 sm:$0xff]  }
 0x102   :  { %2032 = vmatpush2.bf16.msra.mxu0 %v5425_v26  ;;  %v5502_v61 = vld [vmem:[#allocation2 + $0x40c] ss:$16 sps:$4 sm:$0xff]   ;;  %v5506_v26 = vld [vmem:[#allocation2 + $0x5e8] ss:$16 sps:$4 sm:$0xff]  }
 0x103   :  { %2033 = vmatprep.subr.bf16.mxu0 %v5433_v46  ;;  %v5517_v0 = vld [vmem:[#allocation2 + $0x3ac] ss:$16 sps:$4 sm:$0xff]  }
 0x104   :  { %2069 = vmatpush2.bf16.msra.mxu1 %v5416_v2  ;;  %v5508_v32 = vld [vmem:[#allocation2 + $0x5ec] ss:$16 sps:$4 sm:$0xff]   ;;  %v5521_v2 = vld [vmem:[#allocation2 + $0x388] ss:$16 sps:$4 sm:$0xff]  }
 0x105   :  { %2070 = vmatprep.subr.bf16.mxu1 %v5424_v3  ;;  %v5523_v48 = vld [vmem:[#allocation2 + $0x38c] ss:$16 sps:$4 sm:$0xff]  }
 0x106   :  { %2034 = vmatpush2.bf16.msra.mxu0 %v5431_v6  ;;  %v5514_v46 = vld [vmem:[#allocation2 + $0x5cc] ss:$16 sps:$4 sm:$0xff]   ;;  %v5512_v6 = vld [vmem:[#allocation2 + $0x5c8] ss:$16 sps:$4 sm:$0xff]  }
 0x107   :  { %2035 = vmatprep.subr.bf16.mxu0 %v5439_v55  ;;  %v5529_v3 = vld [vmem:[#allocation2 + $0x36c] ss:$16 sps:$4 sm:$0xff]  }
 0x108   :  { %2071 = vmatpush2.bf16.msra.mxu1 %v5422_v8  ;;  %v5520_v55 = vld [vmem:[#allocation2 + $0x5ac] ss:$16 sps:$4 sm:$0xff]   ;;  %v5527_v8 = vld [vmem:[#allocation2 + $0x368] ss:$16 sps:$4 sm:$0xff]  }
 0x109   :  { %2072 = vmatprep.subr.bf16.mxu1 %v5430_v35  ;;  %v5535_v35 = vld [vmem:[#allocation2 + $0x34c] ss:$16 sps:$4 sm:$0xff]  }
 0x10a   :  { %2036 = vmatpush2.bf16.msra.mxu0 %v5437_v17  ;;  %v5518_v17 = vld [vmem:[#allocation2 + $0x5a8] ss:$16 sps:$4 sm:$0xff]  }
 0x10b   :  { %2037 = vmatprep.subr.bf16.mxu0 %v5445_v25  ;;  %v5526_v25 = vld [vmem:[#allocation2 + $0x58c] ss:$16 sps:$4 sm:$0xff]  }
 0x10c   :  { %2073 = vmatpush2.bf16.msra.mxu1 %v5428_v45  ;;  %v5533_v45 = vld [vmem:[#allocation2 + $0x348] ss:$16 sps:$4 sm:$0xff]  }
 0x10d   :  { %2074 = vmatprep.subr.bf16.mxu1 %v5436_v24  ;;  %v5541_v24 = vld [vmem:[#allocation2 + $0x32c] ss:$16 sps:$4 sm:$0xff]  }
 0x10e   :  { %2038 = vmatpush2.bf16.msra.mxu0 %v5443_v37  ;;  %v5524_v37 = vld [vmem:[#allocation2 + $0x588] ss:$16 sps:$4 sm:$0xff]  }
 0x10f   :  { %2039 = vmatprep.subr.bf16.mxu0 %v5451_v42  ;;  %v5532_v42 = vld [vmem:[#allocation2 + $0x56c] ss:$16 sps:$4 sm:$0xff]  }
 0x110   :  { %2075 = vmatpush2.bf16.msra.mxu1 %v5434_v56  ;;  %v5539_v56 = vld [vmem:[#allocation2 + $0x328] ss:$16 sps:$4 sm:$0xff]  }
 0x111   :  { %2076 = vmatprep.subr.bf16.mxu1 %v5442_v20  ;;  %v5547_v20 = vld [vmem:[#allocation2 + $0x30c] ss:$16 sps:$4 sm:$0xff]  }
 0x112   :  { %2040 = vmatpush2.bf16.msra.mxu0 %v5449_v52  ;;  %v5530_v52 = vld [vmem:[#allocation2 + $0x568] ss:$16 sps:$4 sm:$0xff]  }
 0x113   :  { %2091 = vmatprep.subr.bf16.mxu0 %v5457_v31  ;;  %v5538_v31 = vld [vmem:[#allocation2 + $0x54c] ss:$16 sps:$4 sm:$0xff]  }
 0x114   :  { %2077 = vmatpush2.bf16.msra.mxu1 %v5440_v54  ;;  %v5545_v54 = vld [vmem:[#allocation2 + $0x308] ss:$16 sps:$4 sm:$0xff]  }
 0x115   :  { %2078 = vmatprep.subr.bf16.mxu1 %v5448_v62  ;;  %2042 = vmatmul.mubr.bf16.vlgmr.msra.gmra.mxu0 %v6644_v14  ;;  %v5536_v62 = vld [vmem:[#allocation2 + $0x548] ss:$16 sps:$4 sm:$0xff]  }
 0x116   :  { %2092 = vmatpush1.bf16.msra.mxu0 %v5455_v41  ;;  %2123 = vmatprep.mubr.bf16.mxu0 %v6549_v36  ;;  %v5479_v36 = vld [vmem:[#allocation2 + $0x268] ss:$16 sps:$4 sm:$0xff]   ;;  %v5544_v41 = vld [vmem:[#allocation2 + $0x52c] ss:$16 sps:$4 sm:$0xff]  }
 0x117   :  { %2093 = vmatprep.subr.bf16.mxu0 %v5463_v4  ;;  %v5542_v4 = vld [vmem:[#allocation2 + $0x528] ss:$16 sps:$4 sm:$0xff]  }
 0x118   :  { %2079 = vmatpush2.bf16.msra.mxu1 %v5446_v43  ;;  %v5550_v43 = vld [vmem:[#allocation2 + $0x50c] ss:$16 sps:$4 sm:$0xff]  }
 0x119   :  { %2080 = vmatprep.subr.bf16.mxu1 %v5454_v49  ;;  %v5548_v49 = vld [vmem:[#allocation2 + $0x508] ss:$16 sps:$4 sm:$0xff]  }
 0x11a   :  { %2094 = vmatpush1.bf16.msra.mxu0 %v5461_v11  ;;  %v748_v11 = vlaneseq }
 0x11b   :  { %2095 = vmatprep.subr.bf16.mxu0 %v5469_v47 }
 0x11c   :  { %2081 = vmatpush2.bf16.msra.mxu1 %v5452_v15  ;;  %v749_v47 = vshrl.u32 %v748_v11, 7  ;;  %v5569_v11 = vld [vmem:[#allocation4 + $0x80] ss:$16 sps:$4 sm:$0xff]  }
 0x11d   :  { %2132 = vmatprep.subr.bf16.mxu1 %v5460_v39  ;;  %v746_v39 = vld [vmem:[%s6817_s3] sm:$0xf] }
 0x11e   :  { %2096 = vmatpush1.bf16.msra.mxu0 %v5467_v51  ;;  %v6652_v15 = vsub.s32 0, %v749_v47 }
 0x11f   :  { %2083 = vmatmul.mubr.bf16.vlgmr.msra.gmra.mxu1 %v6575_v53  ;;  %2097 = vmatprep.subr.bf16.mxu0 %v5475_v21  ;;  %v5491_v53 = vld [vmem:[#allocation2 + $0x228] ss:$16 sps:$4 sm:$0xff]   ;;  %v6657_v21 = vsub.s32 1, %v749_v47 }
 0x120   :  { %2133 = vmatpush1.bf16.msra.mxu1 %v5458_v50  ;;  %2164 = vmatprep.mubr.bf16.mxu1 %v6630_v33  ;;  %v5482_v33 = vld [vmem:[#allocation2 + $0x468] ss:$16 sps:$4 sm:$0xff]  }
 0x121   :  { %2134 = vmatprep.subr.bf16.mxu1 %v5466_v12 }
 0x122   :  { %2098 = vmatpush1.bf16.msra.mxu0 %v5473_v63  ;;  %v755_v63 = vrot.slane %v746_v39, %v6657_v21 }
 0x123   :  { %2099 = vmatprep.subr.bf16.mxu0 %v5481_v22 }
 0x124   :  { %2135 = vmatpush1.bf16.msra.mxu1 %v5464_v13 }
 0x125   :  { %2136 = vmatprep.subr.bf16.mxu1 %v5472_v27 }
 0x126   :  { %2100 = vmatpush1.bf16.msra.mxu0 %v5479_v36 }
 0x127   :  { %2101 = vmatprep.subr.bf16.mxu0 %v5487_v59 }
 0x128   :  { %2137 = vmatpush1.bf16.msra.mxu1 %v5470_v5 }
 0x129   :  { %2138 = vmatprep.subr.bf16.mxu1 %v5478_v10 }
 0x12a   :  { %2102 = vmatpush1.bf16.msra.mxu0 %v5485_v28 }
 0x12b   :  { %2103 = vmatprep.subr.bf16.mxu0 %v5493_v58 }
 0x12c   :  { %2139 = vmatpush1.bf16.msra.mxu1 %v5476_v18 }
 0x12d   :  { %2140 = vmatprep.subr.bf16.mxu1 %v5484_v19 }
 0x12e   :  { %2104 = vmatpush1.bf16.msra.mxu0 %v5491_v53 }
 0x12f   :  { %2105 = vmatprep.subr.bf16.mxu0 %v5499_v9 }
 0x130   :  { %2141 = vmatpush1.bf16.msra.mxu1 %v5482_v33 }
 0x131   :  { %2142 = vmatprep.subr.bf16.mxu1 %v5490_v29 }
 0x132   :  { %2106 = vmatpush1.bf16.msra.mxu0 %v5497_v60 }
 0x133   :  { %2107 = vmatprep.subr.bf16.mxu0 %v5505_v38 }
 0x134   :  { %2143 = vmatpush1.bf16.msra.mxu1 %v5488_v30 }
 0x135   :  { %2144 = vmatprep.subr.bf16.mxu1 %v5496_v40  ;;  %v6665_v40 = vsub.s32 2, %v749_v47 }
 0x136   :  { %2108 = vmatpush2.bf16.msra.mxu0 %v5503_v34  ;;  %v6667_v34 = vsub.s32 3, %v749_v47  ;;  %v5572_v47 = vld [vmem:[#allocation4 + $0x280] ss:$16 sps:$4 sm:$0xff]  }
 0x137   :  { %2109 = vmatprep.subr.bf16.mxu0 %v5511_v44 }
 0x138   :  { %2145 = vmatpush1.bf16.msra.mxu1 %v5494_v1  ;;  %v759_v1 = vrot.slane %v746_v39, %v6665_v40 }
 0x139   :  { %2146 = vmatprep.subr.bf16.mxu1 %v5502_v61 }
 0x13a   :  { %2110 = vmatpush2.bf16.msra.mxu0 %v5509_v23  ;;  %v763_v23 = vrot.slane %v746_v39, %v6667_v34 }
 0x13b   :  { %2111 = vmatprep.subr.bf16.mxu0 %v5517_v0 }
 0x13c   :  { %2147 = vmatpush1.bf16.msra.mxu1 %v5500_v7 }
 0x13d   :  { %2148 = vmatprep.subr.bf16.mxu1 %v5508_v32 }
 0x13e   :  { %2112 = vmatpush2.bf16.msra.mxu0 %v5515_v16 }
 0x13f   :  { %2113 = vmatprep.subr.bf16.mxu0 %v5523_v48 }
 0x140   :  { %2149 = vmatpush2.bf16.msra.mxu1 %v5506_v26 }
 0x141   :  { %2150 = vmatprep.subr.bf16.mxu1 %v5514_v46 }
 0x142   :  { %2114 = vmatpush2.bf16.msra.mxu0 %v5521_v2 }
 0x143   :  { %2115 = vmatprep.subr.bf16.mxu0 %v5529_v3 }
 0x144   :  { %2151 = vmatpush2.bf16.msra.mxu1 %v5512_v6 }
 0x145   :  { %2152 = vmatprep.subr.bf16.mxu1 %v5520_v55 }
 0x146   :  { %2116 = vmatpush2.bf16.msra.mxu0 %v5527_v8 }
 0x147   :  { %2117 = vmatprep.subr.bf16.mxu0 %v5535_v35 }
 0x148   :  { %2153 = vmatpush2.bf16.msra.mxu1 %v5518_v17 }
 0x149   :  { %2154 = vmatprep.subr.bf16.mxu1 %v5526_v25 }
 0x14a   :  { %2118 = vmatpush2.bf16.msra.mxu0 %v5533_v45  ;;  %v5551_v45 = vld [vmem:[#allocation4 + $0xe0] ss:$16 sps:$4 sm:$0xff]  }
 0x14b   :  { %2119 = vmatprep.subr.bf16.mxu0 %v5541_v24  ;;  %v5553_v24 = vld [vmem:[#allocation4 + $0xe4] ss:$16 sps:$4 sm:$0xff]  }
 0x14c   :  { %2155 = vmatpush2.bf16.msra.mxu1 %v5524_v37  ;;  %v5554_v37 = vld [vmem:[#allocation4 + $0x2e0] ss:$16 sps:$4 sm:$0xff]  }
 0x14d   :  { %2156 = vmatprep.subr.bf16.mxu1 %v5532_v42  ;;  %v5556_v42 = vld [vmem:[#allocation4 + $0x2e4] ss:$16 sps:$4 sm:$0xff]  }
 0x14e   :  { %2120 = vmatpush2.bf16.msra.mxu0 %v5539_v56  ;;  %v5559_v56 = vld [vmem:[#allocation4 + $0xc4] ss:$16 sps:$4 sm:$0xff]  }
 0x14f   :  { %2121 = vmatprep.subr.bf16.mxu0 %v5547_v20  ;;  %v5562_v20 = vld [vmem:[#allocation4 + $0x2c4] ss:$16 sps:$4 sm:$0xff]  }
 0x150   :  { %2157 = vmatpush2.bf16.msra.mxu1 %v5530_v52  ;;  %v5557_v52 = vld [vmem:[#allocation4 + $0xc0] ss:$16 sps:$4 sm:$0xff]  }
 0x151   :  { %2158 = vmatprep.subr.bf16.mxu1 %v5538_v31  ;;  %v5560_v31 = vld [vmem:[#allocation4 + $0x2c0] ss:$16 sps:$4 sm:$0xff]  }
 0x152   :  { %2122 = vmatpush2.bf16.msra.mxu0 %v5545_v54  ;;  %v5565_v54 = vld [vmem:[#allocation4 + $0xa4] ss:$16 sps:$4 sm:$0xff]  }
 0x153   :  { %3046 = vmatprep.subr.bf16.mxu0 %v5553_v24  ;;  %v5625_v24 = vld [vmem:[#allocation4 + $0x164] ss:$16 sps:$4 sm:$0xff]  }
 0x154   :  { %2159 = vmatpush2.bf16.msra.mxu1 %v5536_v62  ;;  %v5568_v62 = vld [vmem:[#allocation4 + $0x2a4] ss:$16 sps:$4 sm:$0xff]  }
 0x155   :  { %2160 = vmatprep.subr.bf16.mxu1 %v5544_v41  ;;  %2124 = vmatmul.mubr.bf16.vlgmr.msra.gmra.mxu0 %v6601_v57  ;;  %v751_v57 = vrot.slane %v746_v39, %v6652_v15  ;;  %v5563_v41 = vld [vmem:[#allocation4 + $0xa0] ss:$16 sps:$4 sm:$0xff]   ;;  %v5577_v39 = vld [vmem:[#allocation4 + $0x64] ss:$16 sps:$4 sm:$0xff]  }
 0x156   :  { %3047 = vmatpush1.bf16.msra.mxu0 %v5551_v45  ;;  %v5620_v45 = vld [vmem:[#allocation4 + $0x380] ss:$16 sps:$4 sm:$0xff]  }
 0x157   :  { %3048 = vmatprep.subr.bf16.mxu0 %v5559_v56  ;;  %v5626_v56 = vld [vmem:[#allocation4 + $0x360] ss:$16 sps:$4 sm:$0xff]  }
 0x158   :  { %2161 = vmatpush2.bf16.msra.mxu1 %v5542_v4  ;;  %v5566_v4 = vld [vmem:[#allocation4 + $0x2a0] ss:$16 sps:$4 sm:$0xff]  }
 0x159   :  { %2162 = vmatprep.subr.bf16.mxu1 %v5550_v43  ;;  %v5571_v43 = vld [vmem:[#allocation4 + $0x84] ss:$16 sps:$4 sm:$0xff]  }
 0x15a   :  { %3049 = vmatpush1.bf16.msra.mxu0 %v5557_v52  ;;  %v5634_v52 = vld [vmem:[#allocation4 + $0x344] ss:$16 sps:$4 sm:$0xff]  }
 0x15b   :  { %3050 = vmatprep.subr.bf16.mxu0 %v5565_v54  ;;  %v5632_v54 = vld [vmem:[#allocation4 + $0x340] ss:$16 sps:$4 sm:$0xff]  }
 0x15c   :  { %2163 = vmatpush2.bf16.msra.mxu1 %v5548_v49  ;;  %v5574_v49 = vld [vmem:[#allocation4 + $0x284] ss:$16 sps:$4 sm:$0xff]  }
 0x15d   :  { %3087 = vmatprep.subr.bf16.mxu1 %v5556_v42  ;;  %v5623_v42 = vld [vmem:[#allocation4 + $0x160] ss:$16 sps:$4 sm:$0xff]  }
 0x15e   :  { %3051 = vmatpush1.bf16.msra.mxu0 %v5563_v41  ;;  %v5640_v41 = vld [vmem:[#allocation4 + $0x324] ss:$16 sps:$4 sm:$0xff]  }
 0x15f   :  { %2165 = vmatmul.mubr.bf16.vlgmr.msra.gmra.mxu1 %v6644_v14  ;;  %3052 = vmatprep.subr.bf16.mxu0 %v5571_v43  ;;  %v5638_v43 = vld [vmem:[#allocation4 + $0x320] ss:$16 sps:$4 sm:$0xff]  }
 0x160   :  { %3088 = vmatpush1.bf16.msra.mxu1 %v5554_v37  ;;  %v5628_v37 = vld [vmem:[#allocation4 + $0x364] ss:$16 sps:$4 sm:$0xff]  }
 0x161   :  { %3089 = vmatprep.subr.bf16.mxu1 %v5562_v20  ;;  %v5631_v20 = vld [vmem:[#allocation4 + $0x144] ss:$16 sps:$4 sm:$0xff]  }
 0x162   :  { %3053 = vmatpush1.bf16.msra.mxu0 %v5569_v11  ;;  %v5646_v11 = vld [vmem:[#allocation4 + $0x304] ss:$16 sps:$4 sm:$0xff]  }
 0x163   :  { %3054 = vmatprep.subr.bf16.mxu0 %v5577_v39  ;;  %v5644_v39 = vld [vmem:[#allocation4 + $0x300] ss:$16 sps:$4 sm:$0xff]  }
 0x164   :  { %3090 = vmatpush1.bf16.msra.mxu1 %v5560_v31  ;;  %v5629_v31 = vld [vmem:[#allocation4 + $0x140] ss:$16 sps:$4 sm:$0xff]  }
 0x165   :  { %3091 = vmatprep.subr.bf16.mxu1 %v5568_v62  ;;  %v5637_v62 = vld [vmem:[#allocation4 + $0x124] ss:$16 sps:$4 sm:$0xff]  }
 0x168   :  { %3092 = vmatpush1.bf16.msra.mxu1 %v5566_v4  ;;  %v5635_v4 = vld [vmem:[#allocation4 + $0x120] ss:$16 sps:$4 sm:$0xff]  }
 0x169   :  { %3093 = vmatprep.subr.bf16.mxu1 %v5574_v49  ;;  %v5643_v49 = vld [vmem:[#allocation4 + $0x104] ss:$16 sps:$4 sm:$0xff]  }
 0x16c   :  { %3094 = vmatpush1.bf16.msra.mxu1 %v5572_v47  ;;  %v5641_v47 = vld [vmem:[#allocation4 + $0x100] ss:$16 sps:$4 sm:$0xff]  }
 0x195   :  { %v1961_v51 = vpop.f32.mrf.mxu0 }
 0x196   :  { %v1962_v13 = vadd.f32 %v1961_v51, %v751_v57  ;;  %v5580_v51 = vld [vmem:[#allocation4 + $0x264] ss:$16 sps:$4 sm:$0xff]   ;;  %v5578_v57 = vld [vmem:[#allocation4 + $0x260] ss:$16 sps:$4 sm:$0xff]  }
 0x197   :  { %v1963_v50 = vpop.f32.mrf.mxu0  ;;  %3095 = vmatprep.subr.bf16.mxu1 %v5580_v51  ;;  %v5649_v51 = vld [vmem:[#allocation4 + $0xec] ss:$16 sps:$4 sm:$0xff]  }
 0x198   :  { %v1964_v14 = vadd.f32 %v1963_v50, %v755_v63  ;;  %v5575_v50 = vld [vmem:[#allocation4 + $0x60] ss:$16 sps:$4 sm:$0xff]   ;;  %v5586_v63 = vld [vmem:[#allocation4 + $0x244] ss:$16 sps:$4 sm:$0xff]   ;;  %3096 = vmatpush1.bf16.msra.mxu1 %v5578_v57 }
 0x199   :  { %v1965_v12 = vpop.f32.mrf.mxu0  ;;  %3055 = vmatpush1.bf16.msra.mxu0 %v5575_v50  ;;  %3097 = vmatprep.subr.bf16.mxu1 %v5586_v63  ;;  %v5652_v50 = vld [vmem:[#allocation4 + $0x2ec] ss:$16 sps:$4 sm:$0xff]  }
 0x19a   :  { %v5583_v12 = vld [vmem:[#allocation4 + $0x44] ss:$16 sps:$4 sm:$0xff]  }
 0x19b   :  { %v1966_v22 = vpop.f32.mrf.mxu0  ;;  %3056 = vmatprep.subr.bf16.mxu0 %v5583_v12 }
 0x19c   :  { %v5581_v22 = vld [vmem:[#allocation4 + $0x40] ss:$16 sps:$4 sm:$0xff]  }
 0x19d   :  { %3057 = vmatpush1.bf16.msra.mxu0 %v5581_v22  ;;  %v2173_v22 = vld [vmem:[%s6818_s4] sm:$0xf] }
 0x19f   :  { %v2002_v27 = vpop.f32.mrf.mxu1 }
 0x1a0   :  { %v2003_v36 = vadd.f32 %v2002_v27, %v1962_v13  ;;  %v5584_v13 = vld [vmem:[#allocation4 + $0x240] ss:$16 sps:$4 sm:$0xff]   ;;  %v5592_v27 = vld [vmem:[#allocation4 + $0x224] ss:$16 sps:$4 sm:$0xff]  }
 0x1a1   :  { %v2004_v59 = vpop.f32.mrf.mxu1  ;;  %3098 = vmatpush1.bf16.msra.mxu1 %v5584_v13  ;;  %v2174_v13 = vld [vmem:[%s6819_s5] sm:$0xf] }
 0x1a2   :  { %v2005_v5 = vadd.f32 %v2004_v59, %v1964_v14  ;;  %v5589_v14 = vld [vmem:[#allocation4 + $0x24] ss:$16 sps:$4 sm:$0xff]   ;;  %v5590_v59 = vld [vmem:[#allocation4 + $0x220] ss:$16 sps:$4 sm:$0xff]   ;;  %3099 = vmatprep.subr.bf16.mxu1 %v5592_v27  ;;  %v2218_v27 = vrot.slane %v2173_v22, %v6667_v34 }
 0x1a3   :  { %v2006_v10 = vpop.f32.mrf.mxu1  ;;  %3058 = vmatprep.subr.bf16.mxu0 %v5589_v14  ;;  %v2210_v14 = vrot.slane %v2173_v22, %v6657_v21 }
 0x1a4   :  { %v5598_v10 = vld [vmem:[#allocation4 + $0x204] ss:$16 sps:$4 sm:$0xff]  }
 0x1a5   :  { %v2007_v28 = vpop.f32.mrf.mxu1  ;;  %3100 = vmatpush1.bf16.msra.mxu1 %v5590_v59  ;;  %v2214_v59 = vrot.slane %v2173_v22, %v6665_v40 }
 0x1a6   :  { %v5593_v28 = vld [vmem:[#allocation4] ss:$16 sps:$4 sm:$0xff]   ;;  %3101 = vmatprep.subr.bf16.mxu1 %v5598_v10  ;;  %v2235_v10 = vrot.slane %v2174_v13, %v6657_v21 }
 0x1d5   :  { %v2043_v58 = vpop.f32.mrf.mxu0 }
 0x1d6   :  { %v6661_v18 = vadd.f32 %v2043_v58, %v2003_v36  ;;  %v5587_v36 = vld [vmem:[#allocation4 + $0x20] ss:$16 sps:$4 sm:$0xff]  }
 0x1d7   :  { %v2045_v19 = vpop.f32.mrf.mxu0  ;;  %3059 = vmatpush1.bf16.msra.mxu0 %v5587_v36  ;;  %v5596_v58 = vld [vmem:[#allocation4 + $0x200] ss:$16 sps:$4 sm:$0xff]   ;;  %v2206_v36 = vrot.slane %v2173_v22, %v6652_v15  ;;  %v5698_v22 = vld [vmem:[#allocation4 + $0x3e8] ss:$16 sps:$4 sm:$0xff]  }
 0x1d8   :  { %v6663_v53 = vadd.f32 %v2045_v19, %v2005_v5  ;;  %v5595_v5 = vld [vmem:[#allocation4 + $0x4] ss:$16 sps:$4 sm:$0xff]   ;;  %3102 = vmatpush1.bf16.msra.mxu1 %v5596_v58  ;;  %v2231_v58 = vrot.slane %v2174_v13, %v6652_v15 }
 0x1d9   :  { %v2047_v9 = vpop.f32.mrf.mxu0  ;;  %3060 = vmatprep.subr.bf16.mxu0 %v5595_v5  ;;  %v5601_v19 = vld [vmem:[#allocation4 + $0x1e4] ss:$16 sps:$4 sm:$0xff]  }
 0x1da   :  { %v2175_v2 = vadd.f32 %v6663_v53, %v6661_v18  ;;  %v5604_v9 = vld [vmem:[#allocation4 + $0x3e4] ss:$16 sps:$4 sm:$0xff]  }
 0x1db   :  { %v2048_v33 = vpop.f32.mrf.mxu0  ;;  %3061 = vmatpush1.bf16.msra.mxu0 %v5593_v28  ;;  %3103 = vmatprep.subr.bf16.mxu1 %v5604_v9  ;;  %v2243_v28 = vrot.slane %v2174_v13, %v6667_v34 }
 0x1dc   :  { %v5599_v33 = vld [vmem:[#allocation4 + $0x1e0] ss:$16 sps:$4 sm:$0xff]   ;;  %3062 = vmatprep.subr.bf16.mxu0 %v5601_v19  ;;  %v2239_v19 = vrot.slane %v2174_v13, %v6665_v40  ;;  %v5703_v13 = vld [vmem:[#allocation4 + $0x1cc] ss:$16 sps:$4 sm:$0xff]  }
 0x1df   :  { %v2084_v29 = vpop.f32.mrf.mxu1  ;;  %3063 = vmatpush2.bf16.msra.mxu0 %v5599_v33 }
 0x1e0   :  { %v2085_v7 = vadd.f32 %v2084_v29, %v759_v1  ;;  %v5602_v29 = vld [vmem:[#allocation4 + $0x3e0] ss:$16 sps:$4 sm:$0xff]  }
 0x1e1   :  { %v2086_v60 = vpop.f32.mrf.mxu1  ;;  %3104 = vmatpush2.bf16.msra.mxu1 %v5602_v29 }
 0x1e2   :  { %v2087_v16 = vadd.f32 %v2086_v60, %v763_v23  ;;  %v5607_v60 = vld [vmem:[#allocation4 + $0x1c4] ss:$16 sps:$4 sm:$0xff]  }
 0x1e3   :  { %v2088_v38 = vpop.f32.mrf.mxu1  ;;  %3064 = vmatprep.subr.bf16.mxu0 %v5607_v60 }
 0x1e4   :  { %v5610_v38 = vld [vmem:[#allocation4 + $0x3c4] ss:$16 sps:$4 sm:$0xff]  }
 0x1e5   :  { %v2089_v30 = vpop.f32.mrf.mxu1  ;;  %3105 = vmatprep.subr.bf16.mxu1 %v5610_v38 }
 0x1e6   :  { %v5605_v30 = vld [vmem:[#allocation4 + $0x1c0] ss:$16 sps:$4 sm:$0xff]  }
 0x1e7   :  { %3065 = vmatpush2.bf16.msra.mxu0 %v5605_v30 }
 0x215   :  { %v2125_v44 = vpop.f32.mrf.mxu0 }
 0x216   :  { %v2126_v48 = vadd.f32 %v2125_v44, %v2085_v7  ;;  %v5608_v44 = vld [vmem:[#allocation4 + $0x3c0] ss:$16 sps:$4 sm:$0xff]  }
 0x217   :  { %v2127_v61 = vpop.f32.mrf.mxu0  ;;  %3106 = vmatpush2.bf16.msra.mxu1 %v5608_v44 }
 0x218   :  { %v2128_v26 = vadd.f32 %v2127_v61, %v2087_v16 }
 0x219   :  { %v2129_v0 = vpop.f32.mrf.mxu0 }
 0x21b   :  { %v2130_v32 = vpop.f32.mrf.mxu0 }
 0x21f   :  { %v2166_v46 = vpop.f32.mrf.mxu1 }
 0x220   :  { %v6673_v3 = vadd.f32 %v2166_v46, %v2126_v48 }
 0x221   :  { %v2168_v6 = vpop.f32.mrf.mxu1 }
 0x222   :  { %v2176_v55 = vadd.f32 %v2175_v2, %v6673_v3  ;;  %v6676_v8 = vadd.f32 %v2168_v6, %v2128_v26  ;;  %v5613_v6 = vld [vmem:[#allocation4 + $0x1a4] ss:$16 sps:$4 sm:$0xff]  }
 0x223   :  { %v2170_v35 = vpop.f32.mrf.mxu1  ;;  %3066 = vmatprep.subr.bf16.mxu0 %v5613_v6  ;;  %v5656_v6 = vld [vmem:[#allocation4 + $0x2c8] ss:$16 sps:$4 sm:$0xff]  }
 0x224   :  { %v2177_v17 = vadd.f32 %v2176_v55, %v6676_v8  ;;  %v5614_v55 = vld [vmem:[#allocation4 + $0x3a0] ss:$16 sps:$4 sm:$0xff]   ;;  %v5619_v35 = vld [vmem:[#allocation4 + $0x184] ss:$16 sps:$4 sm:$0xff]  }
 0x225   :  { %v2171_v25 = vpop.f32.mrf.mxu1 }
 0x226   :  { %2178 = vadd.xlane.f32.xlu0 %v2177_v17  ;;  %v5622_v17 = vld [vmem:[#allocation4 + $0x384] ss:$16 sps:$4 sm:$0xff]   ;;  %v5617_v25 = vld [vmem:[#allocation4 + $0x180] ss:$16 sps:$4 sm:$0xff]  }
 0x2af   :  { %v2179_v1 = vpop.xlane.xlu0 %2178 }
 0x2b0   :  { %v2181_v61 = vmul.f32 0.001953125, %v2179_v1 }
 0x2b2   :  { %v6680_v23 = vsub.f32 %v6661_v18, %v2181_v61  ;;  %v6683_v0 = vsub.f32 %v6663_v53, %v2181_v61  ;;  %v6686_v7 = vsub.f32 %v6673_v3, %v2181_v61  ;;  %v6689_v32 = vsub.f32 %v6676_v8, %v2181_v61  ;;  %v5611_v3 = vld [vmem:[#allocation4 + $0x1a0] ss:$16 sps:$4 sm:$0xff]   ;;  %v5616_v8 = vld [vmem:[#allocation4 + $0x3a4] ss:$16 sps:$4 sm:$0xff]  }
 0x2b3   :  { %3107 = vmatprep.subr.bf16.mxu1 %v5616_v8  ;;  %3067 = vmatpush2.bf16.msra.mxu0 %v5611_v3  ;;  %v5664_v8 = vld [vmem:[#allocation4 + $0x2ac] ss:$16 sps:$4 sm:$0xff]  }
 0x2b4   :  { %v2186_v16 = vmul.f32 %v6680_v23, %v6680_v23  ;;  %v2187_v48 = vmul.f32 %v6683_v0, %v6683_v0  ;;  %v2188_v26 = vmul.f32 %v6686_v7, %v6686_v7  ;;  %v2189_v53 = vmul.f32 %v6689_v32, %v6689_v32  ;;  %3108 = vmatpush2.bf16.msra.mxu1 %v5614_v55  ;;  %v5661_v55 = vld [vmem:[#allocation4 + $0xac] ss:$16 sps:$4 sm:$0xff]  }
 0x2b5   :  { %3068 = vmatprep.subr.bf16.mxu0 %v5619_v35  ;;  %3109 = vmatprep.subr.bf16.mxu1 %v5622_v17  ;;  %v5659_v35 = vld [vmem:[#allocation4 + $0xa8] ss:$16 sps:$4 sm:$0xff]  }
 0x2b6   :  { %v2190_v18 = vadd.f32 %v2187_v48, %v2186_v16  ;;  %v5662_v17 = vld [vmem:[#allocation4 + $0x2a8] ss:$16 sps:$4 sm:$0xff]  }
 0x2b7   :  { %3069 = vmatpush2.bf16.msra.mxu0 %v5617_v25  ;;  %v5667_v25 = vld [vmem:[#allocation4 + $0x8c] ss:$16 sps:$4 sm:$0xff]  }
 0x2b8   :  { %v2191_v46 = vadd.f32 %v2190_v18, %v2188_v26  ;;  %3110 = vmatpush2.bf16.msra.mxu1 %v5620_v45  ;;  %3070 = vmatprep.subr.bf16.mxu0 %v5625_v24  ;;  %v5670_v45 = vld [vmem:[#allocation4 + $0x28c] ss:$16 sps:$4 sm:$0xff]   ;;  %v5665_v24 = vld [vmem:[#allocation4 + $0x88] ss:$16 sps:$4 sm:$0xff]  }
 0x2b9   :  { %3111 = vmatprep.subr.bf16.mxu1 %v5628_v37  ;;  %v5668_v37 = vld [vmem:[#allocation4 + $0x288] ss:$16 sps:$4 sm:$0xff]  }
 0x2ba   :  { %v2192_v2 = vadd.f32 %v2191_v46, %v2189_v53  ;;  %v5647_v46 = vld [vmem:[#allocation4 + $0xe8] ss:$16 sps:$4 sm:$0xff]  }
 0x2bb   :  { %3071 = vmatpush2.bf16.msra.mxu0 %v5623_v42  ;;  %v5673_v42 = vld [vmem:[#allocation4 + $0x6c] ss:$16 sps:$4 sm:$0xff]  }
 0x2bc   :  { %2193 = vadd.xlane.f32.xlu1 %v2192_v2  ;;  %3112 = vmatpush2.bf16.msra.mxu1 %v5626_v56  ;;  %v5650_v2 = vld [vmem:[#allocation4 + $0x2e8] ss:$16 sps:$4 sm:$0xff]   ;;  %v5676_v56 = vld [vmem:[#allocation4 + $0x26c] ss:$16 sps:$4 sm:$0xff]  }
 0x2bd   :  { %3072 = vmatprep.subr.bf16.mxu0 %v5631_v20  ;;  %3113 = vmatprep.subr.bf16.mxu1 %v5634_v52  ;;  %v5671_v20 = vld [vmem:[#allocation4 + $0x68] ss:$16 sps:$4 sm:$0xff]  }
 0x2be   :  { %v5674_v52 = vld [vmem:[#allocation4 + $0x268] ss:$16 sps:$4 sm:$0xff]  }
 0x2bf   :  { %3073 = vmatpush2.bf16.msra.mxu0 %v5629_v31  ;;  %v5679_v31 = vld [vmem:[#allocation4 + $0x4c] ss:$16 sps:$4 sm:$0xff]  }
 0x2c0   :  { %3114 = vmatpush2.bf16.msra.mxu1 %v5632_v54  ;;  %3074 = vmatprep.subr.bf16.mxu0 %v5637_v62  ;;  %v5682_v54 = vld [vmem:[#allocation4 + $0x24c] ss:$16 sps:$4 sm:$0xff]   ;;  %v5677_v62 = vld [vmem:[#allocation4 + $0x48] ss:$16 sps:$4 sm:$0xff]  }
 0x2c1   :  { %3115 = vmatprep.subr.bf16.mxu1 %v5640_v41  ;;  %v5680_v41 = vld [vmem:[#allocation4 + $0x248] ss:$16 sps:$4 sm:$0xff]  }
 0x2c3   :  { %3075 = vmatpush2.bf16.msra.mxu0 %v5635_v4  ;;  %v5685_v4 = vld [vmem:[#allocation4 + $0x2c] ss:$16 sps:$4 sm:$0xff]  }
 0x2c4   :  { %3116 = vmatpush2.bf16.msra.mxu1 %v5638_v43  ;;  %3076 = vmatprep.subr.bf16.mxu0 %v5643_v49  ;;  %v5688_v43 = vld [vmem:[#allocation4 + $0x22c] ss:$16 sps:$4 sm:$0xff]   ;;  %v5683_v49 = vld [vmem:[#allocation4 + $0x28] ss:$16 sps:$4 sm:$0xff]  }
 0x2c5   :  { %3117 = vmatprep.subr.bf16.mxu1 %v5646_v11  ;;  %v5686_v11 = vld [vmem:[#allocation4 + $0x228] ss:$16 sps:$4 sm:$0xff]  }
 0x2c7   :  { %3077 = vmatpush2.bf16.msra.mxu0 %v5641_v47  ;;  %v5691_v47 = vld [vmem:[#allocation4 + $0xc] ss:$16 sps:$4 sm:$0xff]  }
 0x2c8   :  { %3118 = vmatpush2.bf16.msra.mxu1 %v5644_v39  ;;  %3128 = vmatprep.subr.bf16.mxu0 %v5649_v51  ;;  %v5694_v39 = vld [vmem:[#allocation4 + $0x20c] ss:$16 sps:$4 sm:$0xff]   ;;  %v5689_v51 = vld [vmem:[#allocation4 + $0x8] ss:$16 sps:$4 sm:$0xff]  }
 0x2c9   :  { %3169 = vmatprep.subr.bf16.mxu1 %v5652_v50  ;;  %v5692_v50 = vld [vmem:[#allocation4 + $0x208] ss:$16 sps:$4 sm:$0xff]  }
 0x345   :  { %v2194_v57 = vpop.xlane.xlu1 %2193 }
 0x346   :  { %v2195_v12 = vmul.f32 0.001953125, %v2194_v57  ;;  %v5697_v57 = vld [vmem:[#allocation4 + $0x1ec] ss:$16 sps:$4 sm:$0xff]  }
 0x348   :  { %v2196_v63 = vadd.f32 1e-05, %v2195_v12  ;;  %v5700_v12 = vld [vmem:[#allocation4 + $0x3ec] ss:$16 sps:$4 sm:$0xff]  }
 0x34a   :  { %6031 = vrsqrt.f32 %v2196_v63  ;;  %v5695_v63 = vld [vmem:[#allocation4 + $0x1e8] ss:$16 sps:$4 sm:$0xff]  }
 0x357   :  { %v6032_v5 = vpop.eup %6031 }
 0x358   :  { %v2199_v9 = vmul.f32 %v6032_v5, %v6683_v0  ;;  %v2201_v33 = vmul.f32 %v6032_v5, %v6689_v32  ;;  %v2198_v29 = vmul.f32 %v6032_v5, %v6680_v23  ;;  %v2200_v60 = vmul.f32 %v6032_v5, %v6686_v7  ;;  %v5655_v23 = vld [vmem:[#allocation4 + $0xcc] ss:$16 sps:$4 sm:$0xff]   ;;  %v5653_v32 = vld [vmem:[#allocation4 + $0xc8] ss:$16 sps:$4 sm:$0xff]  }
 0x359   :  { %v5658_v7 = vld [vmem:[#allocation4 + $0x2cc] ss:$16 sps:$4 sm:$0xff]  }
 0x35a   :  { %v2224_v38 = vmul.f32 %v2210_v14, %v2199_v9  ;;  %v2226_v30 = vmul.f32 %v2218_v27, %v2201_v33  ;;  %v2223_v44 = vmul.f32 %v2206_v36, %v2198_v29  ;;  %v2225_v1 = vmul.f32 %v2214_v59, %v2200_v60  ;;  %v5706_v14 = vld [vmem:[#allocation4 + $0x3cc] ss:$16 sps:$4 sm:$0xff]   ;;  %v5701_v27 = vld [vmem:[#allocation4 + $0x1c8] ss:$16 sps:$4 sm:$0xff]  }
 0x35b   :  { %v5704_v36 = vld [vmem:[#allocation4 + $0x3c8] ss:$16 sps:$4 sm:$0xff]   ;;  %v5709_v59 = vld [vmem:[#allocation4 + $0x1ac] ss:$16 sps:$4 sm:$0xff]  }
 0x35c   :  { %v2249_v61 = vadd.f32 %v2235_v10, %v2224_v38  ;;  %v2251_v16 = vadd.f32 %v2243_v28, %v2226_v30  ;;  %v2248_v48 = vadd.f32 %v2231_v58, %v2223_v44  ;;  %v2250_v26 = vadd.f32 %v2239_v19, %v2225_v1  ;;  %v5712_v5 = vld [vmem:[#allocation4 + $0x3ac] ss:$16 sps:$4 sm:$0xff]   ;;  %v5707_v10 = vld [vmem:[#allocation4 + $0x1a8] ss:$16 sps:$4 sm:$0xff]  }
 0x35d   :  { %v5710_v28 = vld [vmem:[#allocation4 + $0x3a8] ss:$16 sps:$4 sm:$0xff]   ;;  %v5715_v58 = vld [vmem:[#allocation4 + $0x18c] ss:$16 sps:$4 sm:$0xff]  }
 0x35e   :  { %v2253_v18 = vpack.c.bf16 %v2249_v61, %v2249_v61  ;;  %v2255_v53 = vpack.c.bf16 %v2251_v16, %v2251_v16  ;;  %v6717_v3 = vpack.c.bf16 %v2248_v48, %v2248_v48  ;;  %v6719_v0 = vpack.c.bf16 %v2250_v26, %v2250_v26  ;;  %v5718_v19 = vld [vmem:[#allocation4 + $0x38c] ss:$16 sps:$4 sm:$0xff]   ;;  %v5713_v9 = vld [vmem:[#allocation4 + $0x188] ss:$16 sps:$4 sm:$0xff]  }
 0x35f   :  { %v5716_v33 = vld [vmem:[#allocation4 + $0x388] ss:$16 sps:$4 sm:$0xff]   ;;  %v5721_v29 = vld [vmem:[#allocation4 + $0x16c] ss:$16 sps:$4 sm:$0xff]  }
 0x360   :  { %3078 = vmatprep.mubr.bf16.mxu0 %v2253_v18  ;;  %3119 = vmatprep.mubr.bf16.mxu1 %v2255_v53  ;;  %v5724_v60 = vld [vmem:[#allocation4 + $0x36c] ss:$16 sps:$4 sm:$0xff]   ;;  %v5719_v38 = vld [vmem:[#allocation4 + $0x168] ss:$16 sps:$4 sm:$0xff]  }
 0x361   :  { %3079 = vmatmul.mubr.bf16.vlgmr.msra.gmra.mxu0 %v6717_v3  ;;  %3120 = vmatmul.mubr.bf16.vlgmr.msra.gmra.mxu1 %v6719_v0  ;;  %v5722_v30 = vld [vmem:[#allocation4 + $0x368] ss:$16 sps:$4 sm:$0xff]   ;;  %v5727_v44 = vld [vmem:[#allocation4 + $0x14c] ss:$16 sps:$4 sm:$0xff]  }
 0x362   :  { %3129 = vmatpush1.bf16.msra.mxu0 %v5647_v46  ;;  %3170 = vmatpush1.bf16.msra.mxu1 %v5650_v2  ;;  %v5730_v1 = vld [vmem:[#allocation4 + $0x34c] ss:$16 sps:$4 sm:$0xff]   ;;  %v5725_v61 = vld [vmem:[#allocation4 + $0x148] ss:$16 sps:$4 sm:$0xff]  }
 0x363   :  { %3160 = vmatprep.mubr.bf16.mxu0 %v2253_v18  ;;  %3201 = vmatprep.mubr.bf16.mxu1 %v2255_v53  ;;  %v5728_v16 = vld [vmem:[#allocation4 + $0x348] ss:$16 sps:$4 sm:$0xff]   ;;  %v5733_v48 = vld [vmem:[#allocation4 + $0x12c] ss:$16 sps:$4 sm:$0xff]  }
 0x364   :  { %3130 = vmatprep.subr.bf16.mxu0 %v5655_v23  ;;  %3171 = vmatprep.subr.bf16.mxu1 %v5658_v7  ;;  %v5736_v26 = vld [vmem:[#allocation4 + $0x32c] ss:$16 sps:$4 sm:$0xff]   ;;  %v5731_v18 = vld [vmem:[#allocation4 + $0x128] ss:$16 sps:$4 sm:$0xff]  }
 0x365   :  { %v5734_v53 = vld [vmem:[#allocation4 + $0x328] ss:$16 sps:$4 sm:$0xff]   ;;  %v5739_v46 = vld [vmem:[#allocation4 + $0x10c] ss:$16 sps:$4 sm:$0xff]  }
 0x366   :  { %3131 = vmatpush1.bf16.msra.mxu0 %v5653_v32  ;;  %3172 = vmatpush1.bf16.msra.mxu1 %v5656_v6  ;;  %v5742_v2 = vld [vmem:[#allocation4 + $0x30c] ss:$16 sps:$4 sm:$0xff]   ;;  %v5737_v23 = vld [vmem:[#allocation4 + $0x108] ss:$16 sps:$4 sm:$0xff]   ;;  %v5745_v32 = vld [vmem:[#allocation6 + $0xe4] ss:$16 sps:$4 sm:$0xff]  }
 0x367   :  { %3132 = vmatprep.subr.bf16.mxu0 %v5661_v55  ;;  %3173 = vmatprep.subr.bf16.mxu1 %v5664_v8  ;;  %v5740_v7 = vld [vmem:[#allocation4 + $0x308] ss:$16 sps:$4 sm:$0xff]   ;;  %v5743_v6 = vld [vmem:[#allocation6 + $0xe0] ss:$16 sps:$4 sm:$0xff]   ;;  %v5748_v55 = vld [vmem:[#allocation6 + $0xc4] ss:$16 sps:$4 sm:$0xff]  }
 0x368   :  { %v5746_v8 = vld [vmem:[#allocation6 + $0xc0] ss:$16 sps:$4 sm:$0xff]  }
 0x36a   :  { %3133 = vmatpush1.bf16.msra.mxu0 %v5659_v35  ;;  %3174 = vmatpush1.bf16.msra.mxu1 %v5662_v17  ;;  %v5751_v35 = vld [vmem:[#allocation6 + $0xa4] ss:$16 sps:$4 sm:$0xff]   ;;  %v5749_v17 = vld [vmem:[#allocation6 + $0xa0] ss:$16 sps:$4 sm:$0xff]  }
 0x36b   :  { %3134 = vmatprep.subr.bf16.mxu0 %v5667_v25  ;;  %3175 = vmatprep.subr.bf16.mxu1 %v5670_v45  ;;  %v5754_v25 = vld [vmem:[#allocation6 + $0x84] ss:$16 sps:$4 sm:$0xff]   ;;  %v5752_v45 = vld [vmem:[#allocation6 + $0x80] ss:$16 sps:$4 sm:$0xff]  }
 0x36e   :  { %3135 = vmatpush1.bf16.msra.mxu0 %v5665_v24  ;;  %3176 = vmatpush1.bf16.msra.mxu1 %v5668_v37  ;;  %v5757_v24 = vld [vmem:[#allocation6 + $0x64] ss:$16 sps:$4 sm:$0xff]   ;;  %v5791_v37 = vld [vmem:[#allocation6 + $0x2e0] ss:$16 sps:$4 sm:$0xff]  }
 0x36f   :  { %3136 = vmatprep.subr.bf16.mxu0 %v5673_v42  ;;  %3177 = vmatprep.subr.bf16.mxu1 %v5676_v56  ;;  %v5793_v42 = vld [vmem:[#allocation6 + $0x2e4] ss:$16 sps:$4 sm:$0xff]   ;;  %v5755_v56 = vld [vmem:[#allocation6 + $0x60] ss:$16 sps:$4 sm:$0xff]  }
 0x372   :  { %3137 = vmatpush1.bf16.msra.mxu0 %v5671_v20  ;;  %3178 = vmatpush1.bf16.msra.mxu1 %v5674_v52  ;;  %v5760_v20 = vld [vmem:[#allocation6 + $0x44] ss:$16 sps:$4 sm:$0xff]   ;;  %v5758_v52 = vld [vmem:[#allocation6 + $0x40] ss:$16 sps:$4 sm:$0xff]  }
 0x373   :  { %3138 = vmatprep.subr.bf16.mxu0 %v5679_v31  ;;  %3179 = vmatprep.subr.bf16.mxu1 %v5682_v54  ;;  %v5803_v31 = vld [vmem:[#allocation6 + $0x2a0] ss:$16 sps:$4 sm:$0xff]   ;;  %v5805_v54 = vld [vmem:[#allocation6 + $0x2a4] ss:$16 sps:$4 sm:$0xff]  }
 0x376   :  { %3139 = vmatpush1.bf16.msra.mxu0 %v5677_v62  ;;  %3180 = vmatpush1.bf16.msra.mxu1 %v5680_v41  ;;  %v5763_v62 = vld [vmem:[#allocation6 + $0x24] ss:$16 sps:$4 sm:$0xff]   ;;  %v5761_v41 = vld [vmem:[#allocation6 + $0x20] ss:$16 sps:$4 sm:$0xff]  }
 0x377   :  { %3140 = vmatprep.subr.bf16.mxu0 %v5685_v4  ;;  %3181 = vmatprep.subr.bf16.mxu1 %v5688_v43  ;;  %v5809_v4 = vld [vmem:[#allocation6 + $0x280] ss:$16 sps:$4 sm:$0xff]   ;;  %v5811_v43 = vld [vmem:[#allocation6 + $0x284] ss:$16 sps:$4 sm:$0xff]  }
 0x37a   :  { %3141 = vmatpush1.bf16.msra.mxu0 %v5683_v49  ;;  %3182 = vmatpush1.bf16.msra.mxu1 %v5686_v11  ;;  %v5766_v49 = vld [vmem:[#allocation6 + $0x4] ss:$16 sps:$4 sm:$0xff]   ;;  %v5764_v11 = vld [vmem:[#allocation6] ss:$16 sps:$4 sm:$0xff]  }
 0x37b   :  { %3142 = vmatprep.subr.bf16.mxu0 %v5691_v47  ;;  %3183 = vmatprep.subr.bf16.mxu1 %v5694_v39  ;;  %v5815_v47 = vld [vmem:[#allocation6 + $0x260] ss:$16 sps:$4 sm:$0xff]   ;;  %v5817_v39 = vld [vmem:[#allocation6 + $0x264] ss:$16 sps:$4 sm:$0xff]  }
 0x37e   :  { %3143 = vmatpush1.bf16.msra.mxu0 %v5689_v51  ;;  %3184 = vmatpush1.bf16.msra.mxu1 %v5692_v50  ;;  %v5769_v51 = vld [vmem:[#allocation6 + $0x1e4] ss:$16 sps:$4 sm:$0xff]   ;;  %v5767_v50 = vld [vmem:[#allocation6 + $0x1e0] ss:$16 sps:$4 sm:$0xff]  }
 0x37f   :  { %3144 = vmatprep.subr.bf16.mxu0 %v5697_v57  ;;  %3185 = vmatprep.subr.bf16.mxu1 %v5700_v12  ;;  %v5821_v57 = vld [vmem:[#allocation6 + $0x240] ss:$16 sps:$4 sm:$0xff]   ;;  %v5823_v12 = vld [vmem:[#allocation6 + $0x244] ss:$16 sps:$4 sm:$0xff]  }
 0x382   :  { %3145 = vmatpush2.bf16.msra.mxu0 %v5695_v63  ;;  %3186 = vmatpush2.bf16.msra.mxu1 %v5698_v22  ;;  %v5772_v63 = vld [vmem:[#allocation6 + $0x1c4] ss:$16 sps:$4 sm:$0xff]   ;;  %v5770_v22 = vld [vmem:[#allocation6 + $0x1c0] ss:$16 sps:$4 sm:$0xff]  }
 0x383   :  { %3146 = vmatprep.subr.bf16.mxu0 %v5703_v13  ;;  %3187 = vmatprep.subr.bf16.mxu1 %v5706_v14  ;;  %v5827_v13 = vld [vmem:[#allocation6 + $0x220] ss:$16 sps:$4 sm:$0xff]   ;;  %v5829_v14 = vld [vmem:[#allocation6 + $0x224] ss:$16 sps:$4 sm:$0xff]  }
 0x386   :  { %3147 = vmatpush2.bf16.msra.mxu0 %v5701_v27  ;;  %3188 = vmatpush2.bf16.msra.mxu1 %v5704_v36  ;;  %v5775_v27 = vld [vmem:[#allocation6 + $0x1a4] ss:$16 sps:$4 sm:$0xff]   ;;  %v5773_v36 = vld [vmem:[#allocation6 + $0x1a0] ss:$16 sps:$4 sm:$0xff]  }
 0x387   :  { %3148 = vmatprep.subr.bf16.mxu0 %v5709_v59  ;;  %3189 = vmatprep.subr.bf16.mxu1 %v5712_v5  ;;  %v5833_v59 = vld [vmem:[#allocation6 + $0x200] ss:$16 sps:$4 sm:$0xff]   ;;  %v5835_v5 = vld [vmem:[#allocation6 + $0x204] ss:$16 sps:$4 sm:$0xff]  }
 0x38a   :  { %3149 = vmatpush2.bf16.msra.mxu0 %v5707_v10  ;;  %3190 = vmatpush2.bf16.msra.mxu1 %v5710_v28  ;;  %v5778_v10 = vld [vmem:[#allocation6 + $0x184] ss:$16 sps:$4 sm:$0xff]   ;;  %v5776_v28 = vld [vmem:[#allocation6 + $0x180] ss:$16 sps:$4 sm:$0xff]  }
 0x38b   :  { %3150 = vmatprep.subr.bf16.mxu0 %v5715_v58  ;;  %3191 = vmatprep.subr.bf16.mxu1 %v5718_v19  ;;  %v5839_v58 = vld [vmem:[#allocation6 + $0x3e0] ss:$16 sps:$4 sm:$0xff]   ;;  %v5841_v19 = vld [vmem:[#allocation6 + $0x3e4] ss:$16 sps:$4 sm:$0xff]  }
 0x38e   :  { %3151 = vmatpush2.bf16.msra.mxu0 %v5713_v9  ;;  %3192 = vmatpush2.bf16.msra.mxu1 %v5716_v33  ;;  %v5781_v9 = vld [vmem:[#allocation6 + $0x164] ss:$16 sps:$4 sm:$0xff]   ;;  %v5779_v33 = vld [vmem:[#allocation6 + $0x160] ss:$16 sps:$4 sm:$0xff]  }
 0x38f   :  { %3152 = vmatprep.subr.bf16.mxu0 %v5721_v29  ;;  %3193 = vmatprep.subr.bf16.mxu1 %v5724_v60  ;;  %v5845_v29 = vld [vmem:[#allocation6 + $0x3c0] ss:$16 sps:$4 sm:$0xff]   ;;  %v5847_v60 = vld [vmem:[#allocation6 + $0x3c4] ss:$16 sps:$4 sm:$0xff]  }
 0x392   :  { %3153 = vmatpush2.bf16.msra.mxu0 %v5719_v38  ;;  %3194 = vmatpush2.bf16.msra.mxu1 %v5722_v30  ;;  %v5784_v38 = vld [vmem:[#allocation6 + $0x144] ss:$16 sps:$4 sm:$0xff]   ;;  %v5782_v30 = vld [vmem:[#allocation6 + $0x140] ss:$16 sps:$4 sm:$0xff]  }
 0x393   :  { %3154 = vmatprep.subr.bf16.mxu0 %v5727_v44  ;;  %3195 = vmatprep.subr.bf16.mxu1 %v5730_v1  ;;  %v5851_v44 = vld [vmem:[#allocation6 + $0x3a0] ss:$16 sps:$4 sm:$0xff]   ;;  %v5853_v1 = vld [vmem:[#allocation6 + $0x3a4] ss:$16 sps:$4 sm:$0xff]  }
 0x396   :  { %3155 = vmatpush2.bf16.msra.mxu0 %v5725_v61  ;;  %3196 = vmatpush2.bf16.msra.mxu1 %v5728_v16  ;;  %v5787_v61 = vld [vmem:[#allocation6 + $0x124] ss:$16 sps:$4 sm:$0xff]   ;;  %v5785_v16 = vld [vmem:[#allocation6 + $0x120] ss:$16 sps:$4 sm:$0xff]  }
 0x397   :  { %3156 = vmatprep.subr.bf16.mxu0 %v5733_v48  ;;  %3197 = vmatprep.subr.bf16.mxu1 %v5736_v26  ;;  %v5857_v48 = vld [vmem:[#allocation6 + $0x380] ss:$16 sps:$4 sm:$0xff]   ;;  %v5859_v26 = vld [vmem:[#allocation6 + $0x384] ss:$16 sps:$4 sm:$0xff]  }
 0x39a   :  { %3157 = vmatpush2.bf16.msra.mxu0 %v5731_v18  ;;  %3198 = vmatpush2.bf16.msra.mxu1 %v5734_v53  ;;  %v5790_v18 = vld [vmem:[#allocation6 + $0x104] ss:$16 sps:$4 sm:$0xff]   ;;  %v5788_v53 = vld [vmem:[#allocation6 + $0x100] ss:$16 sps:$4 sm:$0xff]  }
 0x39b   :  { %3158 = vmatprep.subr.bf16.mxu0 %v5739_v46  ;;  %3199 = vmatprep.subr.bf16.mxu1 %v5742_v2  ;;  %v5863_v46 = vld [vmem:[#allocation6 + $0x360] ss:$16 sps:$4 sm:$0xff]   ;;  %v5865_v2 = vld [vmem:[#allocation6 + $0x364] ss:$16 sps:$4 sm:$0xff]  }
 0x39e   :  { %3159 = vmatpush2.bf16.msra.mxu0 %v5737_v23  ;;  %3200 = vmatpush2.bf16.msra.mxu1 %v5740_v7  ;;  %v5796_v23 = vld [vmem:[#allocation6 + $0xec] ss:$16 sps:$4 sm:$0xff]   ;;  %v5869_v7 = vld [vmem:[#allocation6 + $0x340] ss:$16 sps:$4 sm:$0xff]  }
 0x39f   :  { %4008 = vmatprep.subr.bf16.mxu0 %v5745_v32  ;;  %4049 = vmatprep.subr.bf16.mxu1 %v5793_v42  ;;  %v5871_v32 = vld [vmem:[#allocation6 + $0x344] ss:$16 sps:$4 sm:$0xff]  }
 0x3a1   :  { %3161 = vmatmul.mubr.bf16.vlgmr.msra.gmra.mxu0 %v6717_v3  ;;  %3202 = vmatmul.mubr.bf16.vlgmr.msra.gmra.mxu1 %v6719_v0  ;;  %v5797_v3 = vld [vmem:[#allocation6 + $0x2c0] ss:$16 sps:$4 sm:$0xff]   ;;  %v5799_v0 = vld [vmem:[#allocation6 + $0x2c4] ss:$16 sps:$4 sm:$0xff]  }
 0x3a2   :  { %4009 = vmatpush1.bf16.msra.mxu0 %v5743_v6  ;;  %4050 = vmatpush1.bf16.msra.mxu1 %v5791_v37  ;;  %v5875_v6 = vld [vmem:[#allocation6 + $0x320] ss:$16 sps:$4 sm:$0xff]  }
 0x3a3   :  { %4010 = vmatprep.subr.bf16.mxu0 %v5748_v55  ;;  %4051 = vmatprep.subr.bf16.mxu1 %v5799_v0  ;;  %v5877_v55 = vld [vmem:[#allocation6 + $0x324] ss:$16 sps:$4 sm:$0xff]  }
 0x3a6   :  { %4011 = vmatpush1.bf16.msra.mxu0 %v5746_v8  ;;  %4052 = vmatpush1.bf16.msra.mxu1 %v5797_v3  ;;  %v5883_v8 = vld [vmem:[#allocation6 + $0x304] ss:$16 sps:$4 sm:$0xff]  }
 0x3a7   :  { %4012 = vmatprep.subr.bf16.mxu0 %v5751_v35  ;;  %4053 = vmatprep.subr.bf16.mxu1 %v5805_v54  ;;  %v5881_v35 = vld [vmem:[#allocation6 + $0x300] ss:$16 sps:$4 sm:$0xff]  }
 0x3aa   :  { %4013 = vmatpush1.bf16.msra.mxu0 %v5749_v17  ;;  %4054 = vmatpush1.bf16.msra.mxu1 %v5803_v31  ;;  %v5889_v17 = vld [vmem:[#allocation6 + $0x2ec] ss:$16 sps:$4 sm:$0xff]  }
 0x3ab   :  { %4014 = vmatprep.subr.bf16.mxu0 %v5754_v25  ;;  %4055 = vmatprep.subr.bf16.mxu1 %v5811_v43  ;;  %v6728_v25 = vld [vmem:[%s6821_s7] sm:$0xf] }
 0x3ae   :  { %4015 = vmatpush1.bf16.msra.mxu0 %v5752_v45  ;;  %4056 = vmatpush1.bf16.msra.mxu1 %v5809_v4  ;;  %v2389_v45 = vrot.slane %v6728_v25, %v6652_v15 }
 0x3af   :  { %4016 = vmatprep.subr.bf16.mxu0 %v5757_v24  ;;  %4057 = vmatprep.subr.bf16.mxu1 %v5817_v39  ;;  %v2393_v24 = vrot.slane %v6728_v25, %v6657_v21 }
 0x3b2   :  { %4017 = vmatpush1.bf16.msra.mxu0 %v5755_v56  ;;  %4058 = vmatpush1.bf16.msra.mxu1 %v5815_v47  ;;  %v5794_v47 = vld [vmem:[#allocation6 + $0xe8] ss:$16 sps:$4 sm:$0xff]  }
 0x3b3   :  { %4018 = vmatprep.subr.bf16.mxu0 %v5760_v20  ;;  %4059 = vmatprep.subr.bf16.mxu1 %v5823_v12  ;;  %v5806_v12 = vld [vmem:[#allocation6 + $0xa8] ss:$16 sps:$4 sm:$0xff]  }
 0x3b6   :  { %4019 = vmatpush1.bf16.msra.mxu0 %v5758_v52  ;;  %4060 = vmatpush1.bf16.msra.mxu1 %v5821_v57  ;;  %v5808_v57 = vld [vmem:[#allocation6 + $0xac] ss:$16 sps:$4 sm:$0xff]  }
 0x3b7   :  { %4020 = vmatprep.subr.bf16.mxu0 %v5763_v62  ;;  %4061 = vmatprep.subr.bf16.mxu1 %v5829_v14  ;;  %v5818_v14 = vld [vmem:[#allocation6 + $0x68] ss:$16 sps:$4 sm:$0xff]  }
 0x3ba   :  { %4021 = vmatpush1.bf16.msra.mxu0 %v5761_v41  ;;  %4062 = vmatpush1.bf16.msra.mxu1 %v5827_v13  ;;  %v5820_v13 = vld [vmem:[#allocation6 + $0x6c] ss:$16 sps:$4 sm:$0xff]  }
 0x3bb   :  { %4022 = vmatprep.subr.bf16.mxu0 %v5766_v49  ;;  %4063 = vmatprep.subr.bf16.mxu1 %v5835_v5  ;;  %v5830_v5 = vld [vmem:[#allocation6 + $0x28] ss:$16 sps:$4 sm:$0xff]  }
 0x3be   :  { %4023 = vmatpush1.bf16.msra.mxu0 %v5764_v11  ;;  %4064 = vmatpush1.bf16.msra.mxu1 %v5833_v59  ;;  %v5832_v59 = vld [vmem:[#allocation6 + $0x2c] ss:$16 sps:$4 sm:$0xff]  }
 0x3bf   :  { %4024 = vmatprep.subr.bf16.mxu0 %v5769_v51  ;;  %4065 = vmatprep.subr.bf16.mxu1 %v5841_v19  ;;  %v5802_v51 = vld [vmem:[#allocation6 + $0xcc] ss:$16 sps:$4 sm:$0xff]   ;;  %v5842_v19 = vld [vmem:[#allocation6 + $0x1e8] ss:$16 sps:$4 sm:$0xff]  }
 0x3c2   :  { %4025 = vmatpush2.bf16.msra.mxu0 %v5767_v50  ;;  %4066 = vmatpush2.bf16.msra.mxu1 %v5839_v58  ;;  %v5800_v50 = vld [vmem:[#allocation6 + $0xc8] ss:$16 sps:$4 sm:$0xff]   ;;  %v5844_v58 = vld [vmem:[#allocation6 + $0x1ec] ss:$16 sps:$4 sm:$0xff]  }
 0x3c3   :  { %4026 = vmatprep.subr.bf16.mxu0 %v5772_v63  ;;  %4067 = vmatprep.subr.bf16.mxu1 %v5847_v60  ;;  %v5814_v63 = vld [vmem:[#allocation6 + $0x8c] ss:$16 sps:$4 sm:$0xff]   ;;  %v5854_v60 = vld [vmem:[#allocation6 + $0x1a8] ss:$16 sps:$4 sm:$0xff]  }
 0x3c6   :  { %4027 = vmatpush2.bf16.msra.mxu0 %v5770_v22  ;;  %4068 = vmatpush2.bf16.msra.mxu1 %v5845_v29  ;;  %v5812_v22 = vld [vmem:[#allocation6 + $0x88] ss:$16 sps:$4 sm:$0xff]   ;;  %v5856_v29 = vld [vmem:[#allocation6 + $0x1ac] ss:$16 sps:$4 sm:$0xff]  }
 0x3c7   :  { %4028 = vmatprep.subr.bf16.mxu0 %v5775_v27  ;;  %4069 = vmatprep.subr.bf16.mxu1 %v5853_v1  ;;  %v5826_v27 = vld [vmem:[#allocation6 + $0x4c] ss:$16 sps:$4 sm:$0xff]   ;;  %v5866_v1 = vld [vmem:[#allocation6 + $0x168] ss:$16 sps:$4 sm:$0xff]  }
 0x3ca   :  { %4029 = vmatpush2.bf16.msra.mxu0 %v5773_v36  ;;  %4070 = vmatpush2.bf16.msra.mxu1 %v5851_v44  ;;  %v5824_v36 = vld [vmem:[#allocation6 + $0x48] ss:$16 sps:$4 sm:$0xff]   ;;  %v5868_v44 = vld [vmem:[#allocation6 + $0x16c] ss:$16 sps:$4 sm:$0xff]  }
 0x3cb   :  { %4030 = vmatprep.subr.bf16.mxu0 %v5778_v10  ;;  %4071 = vmatprep.subr.bf16.mxu1 %v5859_v26  ;;  %v5838_v10 = vld [vmem:[#allocation6 + $0xc] ss:$16 sps:$4 sm:$0xff]  }
 0x3cc   :  { %v5880_v26 = vld [vmem:[#allocation6 + $0x12c] ss:$16 sps:$4 sm:$0xff]  }
 0x3ce   :  { %4031 = vmatpush2.bf16.msra.mxu0 %v5776_v28  ;;  %4072 = vmatpush2.bf16.msra.mxu1 %v5857_v48  ;;  %v5836_v28 = vld [vmem:[#allocation6 + $0x8] ss:$16 sps:$4 sm:$0xff]  }
 0x3cf   :  { %4032 = vmatprep.subr.bf16.mxu0 %v5781_v9  ;;  %4073 = vmatprep.subr.bf16.mxu1 %v5865_v2  ;;  %v5850_v9 = vld [vmem:[#allocation6 + $0x1cc] ss:$16 sps:$4 sm:$0xff]   ;;  %v5872_v48 = vld [vmem:[#allocation6 + $0x148] ss:$16 sps:$4 sm:$0xff]  }
 0x3d2   :  { %4033 = vmatpush2.bf16.msra.mxu0 %v5779_v33  ;;  %4074 = vmatpush2.bf16.msra.mxu1 %v5863_v46  ;;  %v5848_v33 = vld [vmem:[#allocation6 + $0x1c8] ss:$16 sps:$4 sm:$0xff]  }
 0x3d3   :  { %4034 = vmatprep.subr.bf16.mxu0 %v5784_v38  ;;  %4075 = vmatprep.subr.bf16.mxu1 %v5871_v32  ;;  %v5862_v38 = vld [vmem:[#allocation6 + $0x18c] ss:$16 sps:$4 sm:$0xff]  }
 0x3d6   :  { %4035 = vmatpush2.bf16.msra.mxu0 %v5782_v30  ;;  %4076 = vmatpush2.bf16.msra.mxu1 %v5869_v7  ;;  %v5860_v30 = vld [vmem:[#allocation6 + $0x188] ss:$16 sps:$4 sm:$0xff]  }
 0x3d7   :  { %4036 = vmatprep.subr.bf16.mxu0 %v5787_v61  ;;  %4077 = vmatprep.subr.bf16.mxu1 %v5877_v55  ;;  %v5874_v61 = vld [vmem:[#allocation6 + $0x14c] ss:$16 sps:$4 sm:$0xff]  }
 0x3da   :  { %4037 = vmatpush2.bf16.msra.mxu0 %v5785_v16  ;;  %4078 = vmatpush2.bf16.msra.mxu1 %v5875_v6  ;;  %v2397_v16 = vrot.slane %v6728_v25, %v6665_v40  ;;  %v5886_v6 = vld [vmem:[#allocation6 + $0x10c] ss:$16 sps:$4 sm:$0xff]  }
 0x3db   :  { %4038 = vmatprep.subr.bf16.mxu0 %v5790_v18  ;;  %4079 = vmatprep.subr.bf16.mxu1 %v5883_v8  ;;  %v2401_v18 = vrot.slane %v6728_v25, %v6667_v34 }
 0x3de   :  { %4039 = vmatpush2.bf16.msra.mxu0 %v5788_v53  ;;  %4080 = vmatpush2.bf16.msra.mxu1 %v5881_v35 }
 0x3df   :  { %4090 = vmatprep.subr.bf16.mxu0 %v5796_v23  ;;  %4131 = vmatprep.subr.bf16.mxu1 %v5889_v17  ;;  %v5878_v23 = vld [vmem:[#allocation6 + $0x128] ss:$16 sps:$4 sm:$0xff]  }
 0x421   :  { %v3080_v37 = vpop.f32.mrf.mxu0  ;;  %v3121_v42 = vpop.f32.mrf.mxu1 }
 0x422   :  { %v3081_v56 = vadd.f32 %v3080_v37, %v2389_v45 }
 0x423   :  { %v3082_v3 = vpop.f32.mrf.mxu0  ;;  %v3123_v0 = vpop.f32.mrf.mxu1 }
 0x424   :  { %v3122_v20 = vadd.f32 %v3121_v42, %v3081_v56  ;;  %v3083_v52 = vadd.f32 %v3082_v3, %v2393_v24  ;;  %v5884_v24 = vld [vmem:[#allocation6 + $0x108] ss:$16 sps:$4 sm:$0xff]  }
 0x425   :  { %v3084_v31 = vpop.f32.mrf.mxu0  ;;  %v3125_v54 = vpop.f32.mrf.mxu1 }
 0x426   :  { %v3124_v62 = vadd.f32 %v3123_v0, %v3083_v52  ;;  %v3210_v41 = vmax.f32 %v3122_v20, 0.0  ;;  %v5887_v0 = vld [vmem:[#allocation6 + $0x2e8] ss:$16 sps:$4 sm:$0xff]   ;;  %v5892_v52 = vld [vmem:[#allocation6 + $0x2cc] ss:$16 sps:$4 sm:$0xff]  }
 0x427   :  { %v3085_v4 = vpop.f32.mrf.mxu0  ;;  %v3126_v43 = vpop.f32.mrf.mxu1  ;;  %v5890_v31 = vld [vmem:[#allocation6 + $0x2c8] ss:$16 sps:$4 sm:$0xff]   ;;  %v5895_v54 = vld [vmem:[#allocation6 + $0x2ac] ss:$16 sps:$4 sm:$0xff]  }
 0x428   :  { %v3211_v49 = vmax.f32 %v3124_v62, 0.0  ;;  %v6734_v39 = vpack.c.bf16 %v3210_v41, %v3210_v41  ;;  %v5893_v62 = vld [vmem:[#allocation6 + $0x2a8] ss:$16 sps:$4 sm:$0xff]   ;;  %v5898_v41 = vld [vmem:[#allocation6 + $0x28c] ss:$16 sps:$4 sm:$0xff]  }
 0x429   :  { %v5896_v4 = vld [vmem:[#allocation6 + $0x288] ss:$16 sps:$4 sm:$0xff]   ;;  %v5901_v43 = vld [vmem:[#allocation6 + $0x26c] ss:$16 sps:$4 sm:$0xff]  }
 0x42a   :  { %v3215_v11 = vpack.c.bf16 %v3211_v49, %v3211_v49  ;;  %v5899_v49 = vld [vmem:[#allocation6 + $0x268] ss:$16 sps:$4 sm:$0xff]  }
 0x42c   :  { %4040 = vmatprep.mubr.bf16.mxu0 %v3215_v11 }
 0x42d   :  { %4041 = vmatmul.mubr.bf16.vlgmr.msra.gmra.mxu0 %v6734_v39 }
 0x42e   :  { %4091 = vmatpush1.bf16.msra.mxu0 %v5794_v47  ;;  %4122 = vmatprep.mubr.bf16.mxu0 %v3215_v11  ;;  %v5904_v11 = vld [vmem:[#allocation6 + $0x24c] ss:$16 sps:$4 sm:$0xff]   ;;  %v5902_v47 = vld [vmem:[#allocation6 + $0x248] ss:$16 sps:$4 sm:$0xff]  }
 0x42f   :  { %4092 = vmatprep.subr.bf16.mxu0 %v5802_v51  ;;  %v5905_v51 = vld [vmem:[#allocation6 + $0x228] ss:$16 sps:$4 sm:$0xff]  }
 0x432   :  { %4093 = vmatpush1.bf16.msra.mxu0 %v5800_v50  ;;  %v5910_v50 = vld [vmem:[#allocation6 + $0x20c] ss:$16 sps:$4 sm:$0xff]  }
 0x433   :  { %4094 = vmatprep.subr.bf16.mxu0 %v5808_v57  ;;  %v5908_v57 = vld [vmem:[#allocation6 + $0x208] ss:$16 sps:$4 sm:$0xff]  }
 0x436   :  { %4095 = vmatpush1.bf16.msra.mxu0 %v5806_v12  ;;  %v5913_v12 = vld [vmem:[#allocation6 + $0x3ec] ss:$16 sps:$4 sm:$0xff]  }
 0x437   :  { %4096 = vmatprep.subr.bf16.mxu0 %v5814_v63  ;;  %v5911_v63 = vld [vmem:[#allocation6 + $0x3e8] ss:$16 sps:$4 sm:$0xff]  }
 0x43a   :  { %4097 = vmatpush1.bf16.msra.mxu0 %v5812_v22  ;;  %v5916_v22 = vld [vmem:[#allocation6 + $0x3cc] ss:$16 sps:$4 sm:$0xff]  }
 0x43b   :  { %4098 = vmatprep.subr.bf16.mxu0 %v5820_v13  ;;  %v5914_v13 = vld [vmem:[#allocation6 + $0x3c8] ss:$16 sps:$4 sm:$0xff]  }
 0x43e   :  { %4099 = vmatpush1.bf16.msra.mxu0 %v5818_v14  ;;  %v5919_v14 = vld [vmem:[#allocation6 + $0x3ac] ss:$16 sps:$4 sm:$0xff]  }
 0x43f   :  { %4100 = vmatprep.subr.bf16.mxu0 %v5826_v27  ;;  %v5917_v27 = vld [vmem:[#allocation6 + $0x3a8] ss:$16 sps:$4 sm:$0xff]  }
 0x442   :  { %4101 = vmatpush1.bf16.msra.mxu0 %v5824_v36  ;;  %v5922_v36 = vld [vmem:[#allocation6 + $0x38c] ss:$16 sps:$4 sm:$0xff]  }
 0x443   :  { %4102 = vmatprep.subr.bf16.mxu0 %v5832_v59  ;;  %v5920_v59 = vld [vmem:[#allocation6 + $0x388] ss:$16 sps:$4 sm:$0xff]  }
 0x446   :  { %4103 = vmatpush1.bf16.msra.mxu0 %v5830_v5  ;;  %v5925_v5 = vld [vmem:[#allocation6 + $0x36c] ss:$16 sps:$4 sm:$0xff]  }
 0x447   :  { %4104 = vmatprep.subr.bf16.mxu0 %v5838_v10  ;;  %v5923_v10 = vld [vmem:[#allocation6 + $0x368] ss:$16 sps:$4 sm:$0xff]  }
 0x44a   :  { %4105 = vmatpush1.bf16.msra.mxu0 %v5836_v28  ;;  %v5928_v28 = vld [vmem:[#allocation6 + $0x34c] ss:$16 sps:$4 sm:$0xff]  }
 0x44b   :  { %4106 = vmatprep.subr.bf16.mxu0 %v5844_v58  ;;  %v5926_v58 = vld [vmem:[#allocation6 + $0x348] ss:$16 sps:$4 sm:$0xff]  }
 0x44e   :  { %4107 = vmatpush2.bf16.msra.mxu0 %v5842_v19  ;;  %v5931_v19 = vld [vmem:[#allocation6 + $0x32c] ss:$16 sps:$4 sm:$0xff]  }
 0x44f   :  { %4108 = vmatprep.subr.bf16.mxu0 %v5850_v9  ;;  %v5929_v9 = vld [vmem:[#allocation6 + $0x328] ss:$16 sps:$4 sm:$0xff]  }
 0x452   :  { %4109 = vmatpush2.bf16.msra.mxu0 %v5848_v33  ;;  %v5934_v33 = vld [vmem:[#allocation6 + $0x30c] ss:$16 sps:$4 sm:$0xff]  }
 0x453   :  { %4110 = vmatprep.subr.bf16.mxu0 %v5856_v29  ;;  %v5932_v29 = vld [vmem:[#allocation6 + $0x308] ss:$16 sps:$4 sm:$0xff]  }
 0x456   :  { %4111 = vmatpush2.bf16.msra.mxu0 %v5854_v60 }
 0x457   :  { %4112 = vmatprep.subr.bf16.mxu0 %v5862_v38 }
 0x45a   :  { %4113 = vmatpush2.bf16.msra.mxu0 %v5860_v30 }
 0x45b   :  { %4114 = vmatprep.subr.bf16.mxu0 %v5868_v44 }
 0x45e   :  { %4115 = vmatpush2.bf16.msra.mxu0 %v5866_v1 }
 0x45f   :  { %4116 = vmatprep.subr.bf16.mxu0 %v5874_v61 }
 0x461   :  { %v3162_v53 = vpop.f32.mrf.mxu0  ;;  %v3203_v46 = vpop.f32.mrf.mxu1 }
 0x462   :  { %v3163_v2 = vadd.f32 %v3162_v53, %v2397_v16  ;;  %4117 = vmatpush2.bf16.msra.mxu0 %v5872_v48 }
 0x463   :  { %v3164_v7 = vpop.f32.mrf.mxu0  ;;  %v3205_v32 = vpop.f32.mrf.mxu1  ;;  %4118 = vmatprep.subr.bf16.mxu0 %v5880_v26 }
 0x464   :  { %v3204_v55 = vadd.f32 %v3203_v46, %v3163_v2  ;;  %v3165_v8 = vadd.f32 %v3164_v7, %v2401_v18  ;;  %v3346_v2 = vld [vmem:[%s6823_s9] sm:$0xf] }
 0x465   :  { %v3166_v35 = vpop.f32.mrf.mxu0  ;;  %v3207_v17 = vpop.f32.mrf.mxu1  ;;  %v3351_v7 = vrot.slane %v3346_v2, %v6652_v15 }
 0x466   :  { %v3206_v45 = vadd.f32 %v3205_v32, %v3165_v8  ;;  %4119 = vmatpush2.bf16.msra.mxu0 %v5878_v23  ;;  %v3212_v37 = vmax.f32 %v3204_v55, 0.0  ;;  %v3355_v23 = vrot.slane %v3346_v2, %v6657_v21  ;;  %v3363_v35 = vrot.slane %v3346_v2, %v6667_v34 }
 0x467   :  { %v3167_v42 = vpop.f32.mrf.mxu0  ;;  %v3208_v56 = vpop.f32.mrf.mxu1  ;;  %4120 = vmatprep.subr.bf16.mxu0 %v5886_v6  ;;  %v3359_v6 = vrot.slane %v3346_v2, %v6665_v40 }
 0x468   :  { %v3213_v25 = vmax.f32 %v3206_v45, 0.0  ;;  %v6741_v20 = vpack.c.bf16 %v3212_v37, %v3212_v37 }
 0x46a   :  { %v3217_v3 = vpack.c.bf16 %v3213_v25, %v3213_v25  ;;  %4121 = vmatpush2.bf16.msra.mxu0 %v5884_v24 }
 0x46c   :  { %4081 = vmatprep.mubr.bf16.mxu1 %v3217_v3 }
 0x46d   :  { %4082 = vmatmul.mubr.bf16.vlgmr.msra.gmra.mxu1 %v6741_v20  ;;  %4123 = vmatmul.mubr.bf16.vlgmr.msra.gmra.mxu0 %v6734_v39  ;;  %v5907_v39 = vld [vmem:[#allocation6 + $0x22c] ss:$16 sps:$4 sm:$0xff]  }
 0x46e   :  { %4132 = vmatpush1.bf16.msra.mxu1 %v5887_v0  ;;  %4163 = vmatprep.mubr.bf16.mxu1 %v3217_v3 }
 0x46f   :  { %4133 = vmatprep.subr.bf16.mxu1 %v5892_v52 }
 0x472   :  { %4134 = vmatpush1.bf16.msra.mxu1 %v5890_v31 }
 0x473   :  { %4135 = vmatprep.subr.bf16.mxu1 %v5895_v54  ;;  %v5935_v54 = vld [vmem:[#allocation7 + $0x70] ss:$8 sps:$4 sm:$0xff]  }
 0x476   :  { %4136 = vmatpush1.bf16.msra.mxu1 %v5893_v62  ;;  %v5937_v62 = vld [vmem:[#allocation7 + $0x74] ss:$8 sps:$4 sm:$0xff]  }
 0x477   :  { %4137 = vmatprep.subr.bf16.mxu1 %v5898_v41  ;;  %v5938_v41 = vld [vmem:[#allocation7 + $0x170] ss:$8 sps:$4 sm:$0xff]   ;;  %4650 = vmatprep.subr.bf16.mxu0 %v5937_v62  ;;  %v6009_v62 = vld [vmem:[#allocation7 + $0xb4] ss:$8 sps:$4 sm:$0xff]  }
 0x478   :  { %4651 = vmatpush1.bf16.msra.mxu0 %v5935_v54  ;;  %v6004_v54 = vld [vmem:[#allocation7 + $0x1c0] ss:$8 sps:$4 sm:$0xff]  }
 0x47a   :  { %4138 = vmatpush1.bf16.msra.mxu1 %v5896_v4  ;;  %v5940_v4 = vld [vmem:[#allocation7 + $0x174] ss:$8 sps:$4 sm:$0xff]  }
 0x47b   :  { %4139 = vmatprep.subr.bf16.mxu1 %v5901_v43  ;;  %v5943_v43 = vld [vmem:[#allocation7 + $0x64] ss:$8 sps:$4 sm:$0xff]  }
 0x47c   :  { %4652 = vmatprep.subr.bf16.mxu0 %v5943_v43  ;;  %v6010_v43 = vld [vmem:[#allocation7 + $0x1b0] ss:$8 sps:$4 sm:$0xff]  }
 0x47e   :  { %4140 = vmatpush1.bf16.msra.mxu1 %v5899_v49  ;;  %v5946_v49 = vld [vmem:[#allocation7 + $0x164] ss:$8 sps:$4 sm:$0xff]  }
 0x47f   :  { %4141 = vmatprep.subr.bf16.mxu1 %v5904_v11  ;;  %v5941_v11 = vld [vmem:[#allocation7 + $0x60] ss:$8 sps:$4 sm:$0xff]  }
 0x480   :  { %4653 = vmatpush1.bf16.msra.mxu0 %v5941_v11  ;;  %v6018_v11 = vld [vmem:[#allocation7 + $0x1a4] ss:$8 sps:$4 sm:$0xff]  }
 0x482   :  { %4142 = vmatpush1.bf16.msra.mxu1 %v5902_v47  ;;  %v5944_v47 = vld [vmem:[#allocation7 + $0x160] ss:$8 sps:$4 sm:$0xff]  }
 0x483   :  { %4143 = vmatprep.subr.bf16.mxu1 %v5907_v39  ;;  %v5949_v39 = vld [vmem:[#allocation7 + $0x54] ss:$8 sps:$4 sm:$0xff]  }
 0x484   :  { %4654 = vmatprep.subr.bf16.mxu0 %v5949_v39  ;;  %v6016_v39 = vld [vmem:[#allocation7 + $0x1a0] ss:$8 sps:$4 sm:$0xff]  }
 0x486   :  { %4144 = vmatpush1.bf16.msra.mxu1 %v5905_v51  ;;  %v5952_v51 = vld [vmem:[#allocation7 + $0x154] ss:$8 sps:$4 sm:$0xff]  }
 0x487   :  { %4145 = vmatprep.subr.bf16.mxu1 %v5910_v50  ;;  %v5947_v50 = vld [vmem:[#allocation7 + $0x50] ss:$8 sps:$4 sm:$0xff]  }
 0x488   :  { %4655 = vmatpush1.bf16.msra.mxu0 %v5947_v50  ;;  %v6024_v50 = vld [vmem:[#allocation7 + $0x194] ss:$8 sps:$4 sm:$0xff]  }
 0x48a   :  { %4146 = vmatpush1.bf16.msra.mxu1 %v5908_v57  ;;  %v5950_v57 = vld [vmem:[#allocation7 + $0x150] ss:$8 sps:$4 sm:$0xff]  }
 0x48b   :  { %4147 = vmatprep.subr.bf16.mxu1 %v5913_v12  ;;  %v5955_v12 = vld [vmem:[#allocation7 + $0x44] ss:$8 sps:$4 sm:$0xff]  }
 0x48c   :  { %4656 = vmatprep.subr.bf16.mxu0 %v5955_v12  ;;  %v6022_v12 = vld [vmem:[#allocation7 + $0x190] ss:$8 sps:$4 sm:$0xff]  }
 0x48e   :  { %4148 = vmatpush2.bf16.msra.mxu1 %v5911_v63  ;;  %v5958_v63 = vld [vmem:[#allocation7 + $0x144] ss:$8 sps:$4 sm:$0xff]  }
 0x48f   :  { %4149 = vmatprep.subr.bf16.mxu1 %v5916_v22  ;;  %v5953_v22 = vld [vmem:[#allocation7 + $0x40] ss:$8 sps:$4 sm:$0xff]  }
 0x490   :  { %4657 = vmatpush1.bf16.msra.mxu0 %v5953_v22  ;;  %v6030_v22 = vld [vmem:[#allocation7 + $0x184] ss:$8 sps:$4 sm:$0xff]  }
 0x492   :  { %4150 = vmatpush2.bf16.msra.mxu1 %v5914_v13  ;;  %v5956_v13 = vld [vmem:[#allocation7 + $0x140] ss:$8 sps:$4 sm:$0xff]  }
 0x493   :  { %4151 = vmatprep.subr.bf16.mxu1 %v5919_v14  ;;  %v5961_v14 = vld [vmem:[#allocation7 + $0x34] ss:$8 sps:$4 sm:$0xff]  }
 0x494   :  { %4658 = vmatprep.subr.bf16.mxu0 %v5961_v14  ;;  %v6028_v14 = vld [vmem:[#allocation7 + $0x180] ss:$8 sps:$4 sm:$0xff]  }
 0x496   :  { %4152 = vmatpush2.bf16.msra.mxu1 %v5917_v27  ;;  %v5964_v27 = vld [vmem:[#allocation7 + $0x134] ss:$8 sps:$4 sm:$0xff]  }
 0x497   :  { %4153 = vmatprep.subr.bf16.mxu1 %v5922_v36  ;;  %v5959_v36 = vld [vmem:[#allocation7 + $0x30] ss:$8 sps:$4 sm:$0xff]  }
 0x498   :  { %4659 = vmatpush1.bf16.msra.mxu0 %v5959_v36 }
 0x49a   :  { %4154 = vmatpush2.bf16.msra.mxu1 %v5920_v59  ;;  %v5962_v59 = vld [vmem:[#allocation7 + $0x130] ss:$8 sps:$4 sm:$0xff]  }
 0x49b   :  { %4155 = vmatprep.subr.bf16.mxu1 %v5925_v5  ;;  %v5967_v5 = vld [vmem:[#allocation7 + $0x24] ss:$8 sps:$4 sm:$0xff]  }
 0x49c   :  { %4660 = vmatprep.subr.bf16.mxu0 %v5967_v5  ;;  %v4172_v5 = vld [vmem:[%s6824_s10] sm:$0xf] }
 0x49e   :  { %4156 = vmatpush2.bf16.msra.mxu1 %v5923_v10  ;;  %v5970_v10 = vld [vmem:[#allocation7 + $0x124] ss:$8 sps:$4 sm:$0xff]  }
 0x49f   :  { %4157 = vmatprep.subr.bf16.mxu1 %v5928_v28  ;;  %v5965_v28 = vld [vmem:[#allocation7 + $0x20] ss:$8 sps:$4 sm:$0xff]  }
 0x4a0   :  { %4661 = vmatpush1.bf16.msra.mxu0 %v5965_v28  ;;  %v4208_v28 = vrot.slane %v4172_v5, %v6657_v21 }
 0x4a2   :  { %4158 = vmatpush2.bf16.msra.mxu1 %v5926_v58  ;;  %v5968_v58 = vld [vmem:[#allocation7 + $0x120] ss:$8 sps:$4 sm:$0xff]  }
 0x4a3   :  { %4159 = vmatprep.subr.bf16.mxu1 %v5931_v19  ;;  %v5973_v19 = vld [vmem:[#allocation7 + $0x14] ss:$8 sps:$4 sm:$0xff]  }
 0x4a4   :  { %4662 = vmatprep.subr.bf16.mxu0 %v5973_v19  ;;  %v4204_v19 = vrot.slane %v4172_v5, %v6652_v15 }
 0x4a6   :  { %4160 = vmatpush2.bf16.msra.mxu1 %v5929_v9  ;;  %v5976_v9 = vld [vmem:[#allocation7 + $0x114] ss:$8 sps:$4 sm:$0xff]  }
 0x4a7   :  { %4161 = vmatprep.subr.bf16.mxu1 %v5934_v33  ;;  %v5971_v33 = vld [vmem:[#allocation7 + $0x10] ss:$8 sps:$4 sm:$0xff]  }
 0x4a8   :  { %4663 = vmatpush1.bf16.msra.mxu0 %v5971_v33 }
 0x4aa   :  { %4162 = vmatpush2.bf16.msra.mxu1 %v5932_v29  ;;  %v5974_v29 = vld [vmem:[#allocation7 + $0x110] ss:$8 sps:$4 sm:$0xff]  }
 0x4ab   :  { %4691 = vmatprep.subr.bf16.mxu1 %v5940_v4  ;;  %v6007_v4 = vld [vmem:[#allocation7 + $0xb0] ss:$8 sps:$4 sm:$0xff]  }
 0x4ad   :  { %4164 = vmatmul.mubr.bf16.vlgmr.msra.gmra.mxu1 %v6741_v20 }
 0x4ae   :  { %4692 = vmatpush1.bf16.msra.mxu1 %v5938_v41  ;;  %v6012_v41 = vld [vmem:[#allocation7 + $0x1b4] ss:$8 sps:$4 sm:$0xff]  }
 0x4af   :  { %4693 = vmatprep.subr.bf16.mxu1 %v5946_v49  ;;  %v6015_v49 = vld [vmem:[#allocation7 + $0xa4] ss:$8 sps:$4 sm:$0xff]  }
 0x4b2   :  { %4694 = vmatpush1.bf16.msra.mxu1 %v5944_v47  ;;  %v6013_v47 = vld [vmem:[#allocation7 + $0xa0] ss:$8 sps:$4 sm:$0xff]  }
 0x4b3   :  { %4695 = vmatprep.subr.bf16.mxu1 %v5952_v51  ;;  %v6021_v51 = vld [vmem:[#allocation7 + $0x94] ss:$8 sps:$4 sm:$0xff]  }
 0x4b6   :  { %4696 = vmatpush1.bf16.msra.mxu1 %v5950_v57  ;;  %v6019_v57 = vld [vmem:[#allocation7 + $0x90] ss:$8 sps:$4 sm:$0xff]  }
 0x4b7   :  { %4697 = vmatprep.subr.bf16.mxu1 %v5958_v63  ;;  %v6027_v63 = vld [vmem:[#allocation7 + $0x84] ss:$8 sps:$4 sm:$0xff]  }
 0x4ba   :  { %4698 = vmatpush1.bf16.msra.mxu1 %v5956_v13  ;;  %v6025_v13 = vld [vmem:[#allocation7 + $0x80] ss:$8 sps:$4 sm:$0xff]  }
 0x4bb   :  { %4699 = vmatprep.subr.bf16.mxu1 %v5964_v27 }
 0x4be   :  { %4700 = vmatpush1.bf16.msra.mxu1 %v5962_v59 }
 0x4bf   :  { %4701 = vmatprep.subr.bf16.mxu1 %v5970_v10  ;;  %v4173_v10 = vld [vmem:[%s6825_s11] sm:$0xf] }
 0x4c2   :  { %4702 = vmatpush1.bf16.msra.mxu1 %v5968_v58  ;;  %v4216_v58 = vrot.slane %v4172_v5, %v6667_v34 }
 0x4c3   :  { %4703 = vmatprep.subr.bf16.mxu1 %v5976_v9  ;;  %v4212_v9 = vrot.slane %v4172_v5, %v6665_v40 }
 0x4c6   :  { %4704 = vmatpush1.bf16.msra.mxu1 %v5974_v29  ;;  %v4233_v29 = vrot.slane %v4173_v10, %v6657_v21 }
 0x4ed   :  { %v4042_v60 = vpop.f32.mrf.mxu0 }
 0x4ee   :  { %v4043_v55 = vadd.f32 %v4042_v60, %v3351_v7  ;;  %v5979_v60 = vld [vmem:[#allocation7 + $0x4] ss:$8 sps:$4 sm:$0xff]  }
 0x4ef   :  { %v4044_v38 = vpop.f32.mrf.mxu0  ;;  %4664 = vmatprep.subr.bf16.mxu0 %v5979_v60  ;;  %v4241_v60 = vrot.slane %v4173_v10, %v6667_v34 }
 0x4f0   :  { %v4045_v32 = vadd.f32 %v4044_v38, %v3355_v23  ;;  %v5982_v38 = vld [vmem:[#allocation7 + $0x104] ss:$8 sps:$4 sm:$0xff]  }
 0x4f1   :  { %v4046_v30 = vpop.f32.mrf.mxu0  ;;  %4705 = vmatprep.subr.bf16.mxu1 %v5982_v38  ;;  %v4229_v38 = vrot.slane %v4173_v10, %v6652_v15 }
 0x4f2   :  { %v5977_v30 = vld [vmem:[#allocation7] ss:$8 sps:$4 sm:$0xff]  }
 0x4f3   :  { %v4047_v44 = vpop.f32.mrf.mxu0  ;;  %4665 = vmatpush1.bf16.msra.mxu0 %v5977_v30  ;;  %v4237_v30 = vrot.slane %v4173_v10, %v6665_v40 }
 0x4f4   :  { %v5980_v44 = vld [vmem:[#allocation7 + $0x100] ss:$8 sps:$4 sm:$0xff]  }
 0x4f5   :  { %4706 = vmatpush1.bf16.msra.mxu1 %v5980_v44 }
 0x52d   :  { %v4083_v1 = vpop.f32.mrf.mxu1  ;;  %v4124_v61 = vpop.f32.mrf.mxu0 }
 0x52e   :  { %v6755_v17 = vadd.f32 %v4083_v1, %v4043_v55  ;;  %v4125_v45 = vadd.f32 %v4124_v61, %v3359_v6  ;;  %v5985_v1 = vld [vmem:[#allocation7 + $0xf4] ss:$8 sps:$4 sm:$0xff]  }
 0x52f   :  { %v4085_v16 = vpop.f32.mrf.mxu1  ;;  %v4126_v48 = vpop.f32.mrf.mxu0  ;;  %v5988_v61 = vld [vmem:[#allocation7 + $0x1f4] ss:$8 sps:$4 sm:$0xff]   ;;  %4666 = vmatprep.subr.bf16.mxu0 %v5985_v1 }
 0x530   :  { %v6752_v8 = vadd.f32 %v4085_v16, %v4045_v32  ;;  %v4127_v42 = vadd.f32 %v4126_v48, %v3363_v35  ;;  %v5983_v16 = vld [vmem:[#allocation7 + $0xf0] ss:$8 sps:$4 sm:$0xff]   ;;  %4707 = vmatprep.subr.bf16.mxu1 %v5988_v61 }
 0x531   :  { %v4087_v26 = vpop.f32.mrf.mxu1  ;;  %v4128_v18 = vpop.f32.mrf.mxu0  ;;  %v5986_v48 = vld [vmem:[#allocation7 + $0x1f0] ss:$8 sps:$4 sm:$0xff]   ;;  %4667 = vmatpush2.bf16.msra.mxu0 %v5983_v16 }
 0x532   :  { %v4174_v37 = vadd.f32 %v6752_v8, %v6755_v17  ;;  %v5991_v26 = vld [vmem:[#allocation7 + $0xe4] ss:$8 sps:$4 sm:$0xff]   ;;  %4708 = vmatpush2.bf16.msra.mxu1 %v5986_v48 }
 0x533   :  { %v4088_v53 = vpop.f32.mrf.mxu1  ;;  %v4129_v46 = vpop.f32.mrf.mxu0  ;;  %v5994_v18 = vld [vmem:[#allocation7 + $0x1e4] ss:$8 sps:$4 sm:$0xff]   ;;  %4668 = vmatprep.subr.bf16.mxu0 %v5991_v26 }
 0x534   :  { %v5989_v53 = vld [vmem:[#allocation7 + $0xe0] ss:$8 sps:$4 sm:$0xff]   ;;  %4709 = vmatprep.subr.bf16.mxu1 %v5994_v18 }
 0x535   :  { %v5992_v46 = vld [vmem:[#allocation7 + $0x1e0] ss:$8 sps:$4 sm:$0xff]   ;;  %4669 = vmatpush2.bf16.msra.mxu0 %v5989_v53 }
 0x536   :  { %4710 = vmatpush2.bf16.msra.mxu1 %v5992_v46 }
 0x56d   :  { %v4165_v24 = vpop.f32.mrf.mxu1 }
 0x56e   :  { %v6759_v56 = vadd.f32 %v4165_v24, %v4125_v45 }
 0x56f   :  { %v4167_v25 = vpop.f32.mrf.mxu1 }
 0x570   :  { %v4175_v3 = vadd.f32 %v4174_v37, %v6759_v56  ;;  %v6762_v0 = vadd.f32 %v4167_v25, %v4127_v42  ;;  %v5997_v25 = vld [vmem:[#allocation7 + $0xd4] ss:$8 sps:$4 sm:$0xff]  }
 0x571   :  { %v4169_v20 = vpop.f32.mrf.mxu1  ;;  %4670 = vmatprep.subr.bf16.mxu0 %v5997_v25 }
 0x572   :  { %v4176_v52 = vadd.f32 %v4175_v3, %v6762_v0  ;;  %v5998_v3 = vld [vmem:[#allocation7 + $0x1d0] ss:$8 sps:$4 sm:$0xff]   ;;  %v6003_v20 = vld [vmem:[#allocation7 + $0xc4] ss:$8 sps:$4 sm:$0xff]  }
 0x573   :  { %v4170_v31 = vpop.f32.mrf.mxu1 }
 0x574   :  { %4177 = vadd.xlane.f32.xlu1 %v4176_v52  ;;  %v6006_v52 = vld [vmem:[#allocation7 + $0x1c4] ss:$8 sps:$4 sm:$0xff]   ;;  %v6001_v31 = vld [vmem:[#allocation7 + $0xc0] ss:$8 sps:$4 sm:$0xff]  }
 0x5fd   :  { %v4178_v2 = vpop.xlane.xlu1 %4177 }
 0x5fe   :  { %v4179_v23 = vmul.f32 0.001953125, %v4178_v2 }
 0x600   :  { %v6766_v7 = vsub.f32 %v6755_v17, %v4179_v23  ;;  %v6769_v32 = vsub.f32 %v6752_v8, %v4179_v23  ;;  %v6772_v6 = vsub.f32 %v6759_v56, %v4179_v23  ;;  %v6775_v55 = vsub.f32 %v6762_v0, %v4179_v23  ;;  %v5995_v56 = vld [vmem:[#allocation7 + $0xd0] ss:$8 sps:$4 sm:$0xff]   ;;  %v6000_v0 = vld [vmem:[#allocation7 + $0x1d4] ss:$8 sps:$4 sm:$0xff]  }
 0x601   :  { %4711 = vmatprep.subr.bf16.mxu1 %v6000_v0  ;;  %4671 = vmatpush2.bf16.msra.mxu0 %v5995_v56 }
 0x602   :  { %v4184_v35 = vmul.f32 %v6766_v7, %v6766_v7  ;;  %v4185_v45 = vmul.f32 %v6769_v32, %v6769_v32  ;;  %v4186_v24 = vmul.f32 %v6772_v6, %v6772_v6  ;;  %v4187_v8 = vmul.f32 %v6775_v55, %v6775_v55  ;;  %4712 = vmatpush2.bf16.msra.mxu1 %v5998_v3 }
 0x603   :  { %4672 = vmatprep.subr.bf16.mxu0 %v6003_v20  ;;  %4713 = vmatprep.subr.bf16.mxu1 %v6006_v52 }
 0x604   :  { %v4188_v17 = vadd.f32 %v4185_v45, %v4184_v35 }
 0x605   :  { %4673 = vmatpush2.bf16.msra.mxu0 %v6001_v31 }
 0x606   :  { %v4189_v37 = vadd.f32 %v4188_v17, %v4186_v24  ;;  %4714 = vmatpush2.bf16.msra.mxu1 %v6004_v54  ;;  %4674 = vmatprep.subr.bf16.mxu0 %v6009_v62 }
 0x607   :  { %4715 = vmatprep.subr.bf16.mxu1 %v6012_v41 }
 0x608   :  { %v4190_v42 = vadd.f32 %v4189_v37, %v4187_v8 }
 0x609   :  { %4675 = vmatpush2.bf16.msra.mxu0 %v6007_v4 }
 0x60a   :  { %4191 = vadd.xlane.f32.xlu1 %v4190_v42  ;;  %4716 = vmatpush2.bf16.msra.mxu1 %v6010_v43 }
 0x60b   :  { %4676 = vmatprep.subr.bf16.mxu0 %v6015_v49  ;;  %4717 = vmatprep.subr.bf16.mxu1 %v6018_v11 }
 0x60d   :  { %4677 = vmatpush2.bf16.msra.mxu0 %v6013_v47 }
 0x60e   :  { %4718 = vmatpush2.bf16.msra.mxu1 %v6016_v39  ;;  %4678 = vmatprep.subr.bf16.mxu0 %v6021_v51 }
 0x60f   :  { %4719 = vmatprep.subr.bf16.mxu1 %v6024_v50 }
 0x611   :  { %4679 = vmatpush2.bf16.msra.mxu0 %v6019_v57 }
 0x612   :  { %4720 = vmatpush2.bf16.msra.mxu1 %v6022_v12  ;;  %4680 = vmatprep.subr.bf16.mxu0 %v6027_v63 }
 0x613   :  { %4721 = vmatprep.subr.bf16.mxu1 %v6030_v22 }
 0x615   :  { %4681 = vmatpush2.bf16.msra.mxu0 %v6025_v13 }
 0x616   :  { %4722 = vmatpush2.bf16.msra.mxu1 %v6028_v14 }
 0x693   :  { %v4192_v27 = vpop.xlane.xlu1 %4191 }
 0x694   :  { %v4193_v36 = vmul.f32 0.001953125, %v4192_v27 }
 0x696   :  { %v4194_v59 = vadd.f32 1e-05, %v4193_v36 }
 0x698   :  { %6033 = vrsqrt.f32 %v4194_v59 }
 0x6a5   :  { %v6034_v33 = vpop.eup %6033 }
 0x6a6   :  { %v4197_v44 = vmul.f32 %v6034_v33, %v6769_v32  ;;  %v4199_v1 = vmul.f32 %v6034_v33, %v6775_v55  ;;  %v4196_v61 = vmul.f32 %v6034_v33, %v6766_v7  ;;  %v4198_v16 = vmul.f32 %v6034_v33, %v6772_v6  ;;  %v4318_v7 = vld [vmem:[%s6827_s13] sm:$0x3] }
 0x6a7   :  { %v4323_v32 = vrot.slane %v4318_v7, %v6652_v15  ;;  %v4327_v6 = vrot.slane %v4318_v7, %v6657_v21 }
 0x6a8   :  { %v4222_v48 = vmul.f32 %v4208_v28, %v4197_v44  ;;  %v4224_v26 = vmul.f32 %v4216_v58, %v4199_v1  ;;  %v4221_v18 = vmul.f32 %v4204_v19, %v4196_v61  ;;  %v4223_v53 = vmul.f32 %v4212_v9, %v4198_v16 }
 0x6aa   :  { %v4247_v46 = vadd.f32 %v4233_v29, %v4222_v48  ;;  %v4249_v2 = vadd.f32 %v4241_v60, %v4224_v26  ;;  %v4246_v23 = vadd.f32 %v4229_v38, %v4221_v18  ;;  %v4248_v34 = vadd.f32 %v4237_v30, %v4223_v53 }
 0x6ac   :  { %v4251_v35 = vpack.c.bf16 %v4247_v46, %v4247_v46  ;;  %v4253_v45 = vpack.c.bf16 %v4249_v2, %v4249_v2  ;;  %v4250_v24 = vpack.c.bf16 %v4246_v23, %v4246_v23  ;;  %v4252_v40 = vpack.c.bf16 %v4248_v34, %v4248_v34 }
 0x6ae   :  { %4682 = vmatprep.mubr.bf16.mxu0 %v4251_v35  ;;  %4723 = vmatprep.mubr.bf16.mxu1 %v4253_v45 }
 0x6af   :  { %4683 = vmatmul.mubr.bf16.vlgmr.msra.gmra.mxu0 %v4250_v24  ;;  %4724 = vmatmul.mubr.bf16.vlgmr.msra.gmra.mxu1 %v4252_v40 }
 0x76f   :  { %v4684_v55 = vpop.f32.mrf.mxu0  ;;  %v4725_v17 = vpop.f32.mrf.mxu1 }
 0x770   :  { %v4685_v8 = vadd.f32 %v4684_v55, %v4323_v32 }
 0x771   :  { %v4686_v37 = vpop.f32.mrf.mxu0  ;;  %v4727_v42 = vpop.f32.mrf.mxu1 }
 0x772   :  { %v4726_v56 = vadd.f32 %v4725_v17, %v4685_v8  ;;  %v4687_v25 = vadd.f32 %v4686_v37, %v4327_v6 }
 0x773   :  { %v4688_v3 = vpop.f32.mrf.mxu0  ;;  %v4729_v0 = vpop.f32.mrf.mxu1 }
 0x774   :  { %4732 = vst [vmem:[%s6828_s14] sm:$0xff] %v4726_v56  ;;  %v4728_v20 = vadd.f32 %v4727_v42, %v4687_v25 }
 0x775   :  { %v4689_v52 = vpop.f32.mrf.mxu0  ;;  %v4730_v31 = vpop.f32.mrf.mxu1 }
 0x776   :  { %4733 = vst [vmem:[%s6828_s14 + $0x8] sm:$0xff] %v4728_v20 }
 0x777   :  { %4738 = vsyncpa [#allocation3], 1 }
 0x778   :  { %4739 = vsyncpa [#allocation5], 1 }
 0x779   :  { %4740 = vsyncpa [#allocation8], 1 }

</bundles_post_ra>
